<compile_context>
chip_gen: v5e
topology: v5e:2x2
jax: 0.10.0
libtpu: 0.0.40
codegen_flags: <defaults>
</compile_context>

<pallas_src>
import jax
import jax.numpy as jnp
from jax import lax
from jax.experimental import pallas as pl
from jax.experimental.pallas import tpu as pltpu


def _mnsrl_kernel(a_row_ref, c_row_ref, a_col_ref, c_col_ref, out_ref,
                  m_f, l_f, m_b, l_b, t_ref):
    """Grid = (row blocks, column blocks); online LSE over the column axis.

    a_row_ref / c_row_ref : (TM, D) row tile i of scale*normalized anchors /
                            normalized candidates (resident across j)
    a_col_ref / c_col_ref : (TN, D) column tile j of the same arrays
    out_ref               : (TM, 1) per-row loss (written at the last column)
    m_*, l_*              : (TM, 1) f32 running max / running sum-exp scratch
    t_ref                 : (TM, 1) f32 target logit (same for both directions)
    """
    j = pl.program_id(1)
    nj = pl.num_programs(1)

    @pl.when(j == 0)
    def _():
        m_f[...] = jnp.full_like(m_f, -jnp.inf)
        l_f[...] = jnp.zeros_like(l_f)
        m_b[...] = jnp.full_like(m_b, -jnp.inf)
        l_b[...] = jnp.zeros_like(l_b)
        # Target logit for global row r is scale * a_n[r].c_n[r]; identical for
        # the forward and backward directions, so compute it once from the
        # resident row tiles (VPU mul + lane reduce).  No (TM, TM) iota/mask
        # and no TM == TN coupling -> TN can match the MXU width independently.
        a32 = a_row_ref[...].astype(jnp.float32)
        c32 = c_row_ref[...].astype(jnp.float32)
        t_ref[...] = jnp.sum(a32 * c32, axis=-1, keepdims=True)

    # Contract on the last dim of BOTH operands: no transpose / relayout.
    dn = (((1,), (1,)), ((), ()))
    # forward : (scale * a_n)[rows i] . c_n[cols j]^T
    s_f = lax.dot_general(a_row_ref[...], c_col_ref[...], dn,
                          preferred_element_type=jnp.float32)
    # backward: c_n[rows i] . (scale * a_n)[cols j]^T
    s_b = lax.dot_general(c_row_ref[...], a_col_ref[...], dn,
                          preferred_element_type=jnp.float32)
    # TODO(synk): s_b(i,j) == s_f(j,i)^T; a single-matmul restructure with
    # persistent full-(B,1) column-LSE accumulators would halve MXU flops and
    # HBM column reads, at the cost of losing the "parallel" row axis.

    def _online_lse(m_ref, l_ref, s):
        m_old = m_ref[...]
        m_new = jnp.maximum(m_old, jnp.max(s, axis=-1, keepdims=True))
        l_ref[...] = (l_ref[...] * jnp.exp(m_old - m_new)
                      + jnp.sum(jnp.exp(s - m_new), axis=-1, keepdims=True))
        m_ref[...] = m_new

    _online_lse(m_f, l_f, s_f)
    _online_lse(m_b, l_b, s_b)

    @pl.when(j == nj - 1)
    def _():
        lse_f = m_f[...] + jnp.log(l_f[...])
        lse_b = m_b[...] + jnp.log(l_b[...])
        ce = (lse_f - t_ref[...]) + (lse_b - t_ref[...])   # (TM, 1)
        out_ref[...] = (0.5 * ce).astype(out_ref.dtype)


# --------------------------- tile selection helpers ---------------------------

def _chip_generation():
    try:
        kind = jax.devices()[0].device_kind.lower()
        for gen in (7, 6, 5):
            if "v%d" % gen in kind:
                return gen
    except Exception:
        pass
    return 6


def _vmem_budget_bytes():
    try:
        cap = int(pltpu.get_tpu_info().vmem_capacity_bytes)
    except Exception:
        cap = 64 << 20          # conservative fallback (v7x physical VMEM)
    return int(cap * 0.6)       # headroom for compiler temporaries / spills


def _pick_tile(total, target):
    """Largest tile <= target dividing `total`, preferring multiples of 128."""
    if total <= target:
        return total
    t = (target // 128) * 128
    while t >= 128:
        if total % t == 0:
            return t
        t -= 128
    t = (min(target, total) // 8) * 8
    while t >= 8:
        if total % t == 0:
            return t
        t -= 8
    return total


def _vmem_estimate(tm, tn, d, itemsize):
    rows = 2 * 2 * tm * d * itemsize      # a_row + c_row, double-buffered
    cols = 2 * 2 * tn * d * itemsize      # a_col + c_col, double-buffered
    out = 2 * tm * 4
    scratch = 5 * tm * 4
    temps = 8 * tm * tn * 4               # two f32 score blocks + exp temporaries
    return rows + cols + out + scratch + temps


# --------------------------------- wrapper -----------------------------------

def cached_mnsrl_loss(anchors, candidates, *, scale=20.0, block_rows=None,
                      block_cols=None, compute_dtype=jnp.bfloat16,
                      mini_batch_size=32):
    """Pallas implementation of the loss given precomputed sentence embeddings.

    `mini_batch_size` is accepted for API parity with the PyTorch module but
    does not affect the forward value (the mini-batch loop is a mathematical
    identity); the kernel uses its own roofline-driven row/column tiling.
    """
    del mini_batch_size  # loss value is independent of the GradCache chunking
    B, D = anchors.shape
    assert candidates.shape == (B, D)

    itemsize = jnp.dtype(compute_dtype).itemsize
    gen = _chip_generation()
    budget = _vmem_budget_bytes()

    # ---- row tile (TM): roofline-driven per generation -----------------------
    if block_rows is None:
        tm_target = {5: 256, 6: 512, 7: 384}.get(gen, 256)
        tm = _pick_tile(B, tm_target)
        if gen == 7 and B >= 256 and B // tm < 2:
            # keep >= 2 row blocks so the "parallel" axis splits across both TCs
            tm = _pick_tile(B, max(tm // 2, 128))
    else:
        tm = block_rows
    assert B % tm == 0, "batch must be divisible by the row tile"
    assert tm % 8 == 0 or tm == B, "row tile must be sublane-aligned"

    # ---- column tile (TN): full-residency fast path when it fits VMEM --------
    if block_cols is None:
        if _vmem_estimate(tm, B, D, itemsize) <= budget:
            tn = B                        # all candidates resident: single pass
        else:
            tn = _pick_tile(B, 128 if gen == 5 else 256)
            for _ in range(8):            # shrink if footprint is still too big
                if _vmem_estimate(tm, tn, D, itemsize) <= budget or tn <= 128:
                    break
                new_tn = _pick_tile(B, max(tn // 2, 128))
                if new_tn >= tn:
                    break
                tn = new_tn
    else:
        tn = block_cols
    assert B % tn == 0, "batch must be divisible by the column tile"
    assert tn % 8 == 0 or tn == B, "column tile must be sublane-aligned"

    # One-time normalization (util.cos_sim semantics: x / max(||x||, 1e-12));
    # `scale` folded into the anchors once so it applies exactly once to both
    # score directions with zero per-step cost.
    def _normalize(x):
        x = x.astype(jnp.float32)
        inv = lax.rsqrt(jnp.maximum(jnp.sum(x * x, axis=-1, keepdims=True), 1e-24))
        return x * inv

    a_n = (_normalize(anchors) * jnp.float32(scale)).astype(compute_dtype)
    c_n = _normalize(candidates).astype(compute_dtype)

    grid = (B // tm, B // tn)
    spec_row = pl.BlockSpec((tm, D), lambda i, j: (i, 0))
    spec_col = pl.BlockSpec((tn, D), lambda i, j: (j, 0))

    per_row = pl.pallas_call(
        _mnsrl_kernel,
        out_shape=jax.ShapeDtypeStruct((B, 1), jnp.float32),
        grid_spec=pltpu.PrefetchScalarGridSpec(
            num_scalar_prefetch=0,
            grid=grid,
            in_specs=[spec_row, spec_row, spec_col, spec_col],
            out_specs=pl.BlockSpec((tm, 1), lambda i, j: (i, 0)),
            scratch_shapes=[pltpu.VMEM((tm, 1), jnp.float32)] * 5,
        ),
        compiler_params=pltpu.CompilerParams(
            # rows are independent (megacore-shardable on v7x); columns are the
            # streamed LSE reduction axis.
            dimension_semantics=("parallel", "arbitrary"),
            vmem_limit_bytes=int(budget),
        ),
    )(a_n, c_n, a_n, c_n)

    return jnp.mean(per_row)


def _reference_loss(anchors, candidates, scale=20.0):
    """Plain-JAX reference of the PyTorch semantics (sanity check)."""
    a = anchors.astype(jnp.float32)
    c = candidates.astype(jnp.float32)
    a_n = a / jnp.maximum(jnp.linalg.norm(a, axis=-1, keepdims=True), 1e-12)
    c_n = c / jnp.maximum(jnp.linalg.norm(c, axis=-1, keepdims=True), 1e-12)
    B = a.shape[0]
    labels = jnp.arange(B)

    def ce(scores):
        return -jax.nn.log_softmax(scores, axis=-1)[jnp.arange(B), labels]

    f = ce(scale * (a_n @ c_n.T))
    b = ce(scale * (c_n @ a_n.T))
    return jnp.mean((f + b) * 0.5)


if __name__ == "__main__":
    SCALE = 20.0
    key = jax.random.PRNGKey(0)
    k_a, k_p = jax.random.split(key)

    # --- default bf16 path, auto tiles (residency fast path at this size) ----
    B, D = 256, 128
    anchors = jax.random.normal(k_a, (B, D), dtype=jnp.float32)
    positives = jax.random.normal(k_p, (B, D), dtype=jnp.float32)

    loss_bf16 = cached_mnsrl_loss(anchors, positives, scale=SCALE,
                                  compute_dtype=jnp.bfloat16)
    loss_bf16 = jax.block_until_ready(loss_bf16)
    ref = _reference_loss(anchors, positives, scale=SCALE)
    # bf16 operands => ~1e-2-level relative difference vs the f32 reference.
    assert jnp.allclose(loss_bf16, ref, rtol=3e-2, atol=3e-2), (loss_bf16, ref)

    # --- streamed path: decoupled TM != TN, several column steps, f32 --------
    B2, D2 = 384, 256
    a2 = jax.random.normal(jax.random.PRNGKey(1), (B2, D2), dtype=jnp.float32)
    p2 = jax.random.normal(jax.random.PRNGKey(2), (B2, D2), dtype=jnp.float32)
    loss_f32 = cached_mnsrl_loss(a2, p2, scale=SCALE, block_rows=192,
                                 block_cols=128, compute_dtype=jnp.float32)
    loss_f32 = jax.block_until_ready(loss_f32)
    ref2 = _reference_loss(a2, p2, scale=SCALE)
    assert jnp.allclose(loss_f32, ref2, rtol=1e-4, atol=1e-4), (loss_f32, ref2)

    # TODO(synk): the SentenceTransformer encoder forward and the GradCache
    # backward hook / RandContext replay have no forward-pass Pallas
    # equivalent; only the symmetric ranking loss on embeddings is kernelized.
    print("KERNEL_OK")
</pallas_src>

<mosaic_0001>
module attributes {stable_mosaic.version = 11 : i64} {
  func.func @_mnsrl_kernel(%arg0: i32, %arg1: i32, %arg2: memref<256x128xbf16, #tpu.memory_space<vmem>>, %arg3: memref<256x128xbf16, #tpu.memory_space<vmem>>, %arg4: memref<256x128xbf16, #tpu.memory_space<vmem>>, %arg5: memref<256x128xbf16, #tpu.memory_space<vmem>>, %arg6: memref<256x1xf32, #tpu.memory_space<vmem>>, %arg7: memref<256x1xf32, #tpu.memory_space<vmem>>, %arg8: memref<256x1xf32, #tpu.memory_space<vmem>>, %arg9: memref<256x1xf32, #tpu.memory_space<vmem>>, %arg10: memref<256x1xf32, #tpu.memory_space<vmem>>, %arg11: memref<256x1xf32, #tpu.memory_space<vmem>>) attributes {dimension_semantics = [#tpu.dimension_semantics<parallel>, #tpu.dimension_semantics<arbitrary>], iteration_bounds = array<i64: 1, 1>, scalar_prefetch = 0 : i64, scratch_operands = 5 : i64, tpu.core_type = #tpu.core_type<tc>, window_params = [{transform_indices = @transform_0, window_bounds = array<i64: 256, 128>}, {transform_indices = @transform_1, window_bounds = array<i64: 256, 128>}, {transform_indices = @transform_2, window_bounds = array<i64: 256, 128>}, {transform_indices = @transform_3, window_bounds = array<i64: 256, 128>}, {transform_indices = @transform_4, window_bounds = array<i64: 256, 1>}]} {
    %c0_i32 = arith.constant 0 : i32
    %0 = arith.cmpi eq, %arg1, %c0_i32 : i32
    %1 = arith.extui %0 : i1 to i32
    %c0_i32_0 = arith.constant 0 : i32
    %2 = arith.cmpi ne, %1, %c0_i32_0 : i32
    scf.if %2 {
      %cst_31 = arith.constant 0xFF800000 : f32
      %44 = vector.broadcast %cst_31 : f32 to vector<256x1xf32>
      %c0_32 = arith.constant 0 : index
      %c0_33 = arith.constant 0 : index
      %45 = vector.load %arg7[%c0_32, %c0_33] : memref<256x1xf32, #tpu.memory_space<vmem>>, vector<256x1xf32>
      tpu.vector_store %arg7[%c0_32, %c0_33], %44 {strides = array<i32>} : memref<256x1xf32, #tpu.memory_space<vmem>>, vector<256x1xf32>,
      %cst_34 = arith.constant 0.000000e+00 : f32
      %46 = vector.broadcast %cst_34 : f32 to vector<256x1xf32>
      %c0_35 = arith.constant 0 : index
      %c0_36 = arith.constant 0 : index
      %47 = vector.load %arg8[%c0_35, %c0_36] : memref<256x1xf32, #tpu.memory_space<vmem>>, vector<256x1xf32>
      tpu.vector_store %arg8[%c0_35, %c0_36], %46 {strides = array<i32>} : memref<256x1xf32, #tpu.memory_space<vmem>>, vector<256x1xf32>,
      %cst_37 = arith.constant 0xFF800000 : f32
      %48 = vector.broadcast %cst_37 : f32 to vector<256x1xf32>
      %c0_38 = arith.constant 0 : index
      %c0_39 = arith.constant 0 : index
      %49 = vector.load %arg9[%c0_38, %c0_39] : memref<256x1xf32, #tpu.memory_space<vmem>>, vector<256x1xf32>
      tpu.vector_store %arg9[%c0_38, %c0_39], %48 {strides = array<i32>} : memref<256x1xf32, #tpu.memory_space<vmem>>, vector<256x1xf32>,
      %cst_40 = arith.constant 0.000000e+00 : f32
      %50 = vector.broadcast %cst_40 : f32 to vector<256x1xf32>
      %c0_41 = arith.constant 0 : index
      %c0_42 = arith.constant 0 : index
      %51 = vector.load %arg10[%c0_41, %c0_42] : memref<256x1xf32, #tpu.memory_space<vmem>>, vector<256x1xf32>
      tpu.vector_store %arg10[%c0_41, %c0_42], %50 {strides = array<i32>} : memref<256x1xf32, #tpu.memory_space<vmem>>, vector<256x1xf32>,
      %c0_43 = arith.constant 0 : index
      %c0_44 = arith.constant 0 : index
      %52 = vector.load %arg2[%c0_43, %c0_44] : memref<256x128xbf16, #tpu.memory_space<vmem>>, vector<256x128xbf16>
      %53 = arith.extf %52 : vector<256x128xbf16> to vector<256x128xf32>
      %c0_45 = arith.constant 0 : index
      %c0_46 = arith.constant 0 : index
      %54 = vector.load %arg3[%c0_45, %c0_46] : memref<256x128xbf16, #tpu.memory_space<vmem>>, vector<256x128xbf16>
      %55 = arith.extf %54 : vector<256x128xbf16> to vector<256x128xf32>
      %56 = arith.mulf %53, %55 : vector<256x128xf32>
      %cst_47 = arith.constant dense<0.000000e+00> : vector<256xf32>
      %57 = vector.multi_reduction <add>, %56, %cst_47 [1] : vector<256x128xf32> to vector<256xf32>
      %58 = vector.shape_cast %57 : vector<256xf32> to vector<256x1xf32>
      %c0_48 = arith.constant 0 : index
      %c0_49 = arith.constant 0 : index
      %59 = vector.load %arg11[%c0_48, %c0_49] : memref<256x1xf32, #tpu.memory_space<vmem>>, vector<256x1xf32>
      tpu.vector_store %arg11[%c0_48, %c0_49], %58 {strides = array<i32>} : memref<256x1xf32, #tpu.memory_space<vmem>>, vector<256x1xf32>,
    } else {
    }
    %c0 = arith.constant 0 : index
    %c0_1 = arith.constant 0 : index
    %3 = vector.load %arg2[%c0, %c0_1] : memref<256x128xbf16, #tpu.memory_space<vmem>>, vector<256x128xbf16>
    %c0_2 = arith.constant 0 : index
    %c0_3 = arith.constant 0 : index
    %4 = vector.load %arg5[%c0_2, %c0_3] : memref<256x128xbf16, #tpu.memory_space<vmem>>, vector<256x128xbf16>
    %cst = arith.constant dense<0.000000e+00> : vector<256x256xf32>
    %5 = tpu.matmul %3, %4, %cst {dimension_numbers = #tpu.dot_dimension_numbers<[1], [1], [0], [0], [0, 0, 1, 0], [], []>} : vector<256x128xbf16>, vector<256x128xbf16>, vector<256x256xf32> -> vector<256x256xf32>
    %c0_4 = arith.constant 0 : index
    %c0_5 = arith.constant 0 : index
    %6 = vector.load %arg3[%c0_4, %c0_5] : memref<256x128xbf16, #tpu.memory_space<vmem>>, vector<256x128xbf16>
    %c0_6 = arith.constant 0 : index
    %c0_7 = arith.constant 0 : index
    %7 = vector.load %arg4[%c0_6, %c0_7] : memref<256x128xbf16, #tpu.memory_space<vmem>>, vector<256x128xbf16>
    %cst_8 = arith.constant dense<0.000000e+00> : vector<256x256xf32>
    %8 = tpu.matmul %6, %7, %cst_8 {dimension_numbers = #tpu.dot_dimension_numbers<[1], [1], [0], [0], [0, 0, 1, 0], [], []>} : vector<256x128xbf16>, vector<256x128xbf16>, vector<256x256xf32> -> vector<256x256xf32>
    %c0_9 = arith.constant 0 : index
    %c0_10 = arith.constant 0 : index
    %9 = vector.load %arg7[%c0_9, %c0_10] : memref<256x1xf32, #tpu.memory_space<vmem>>, vector<256x1xf32>
    %cst_11 = arith.constant dense<0xFF800000> : vector<256xf32>
    %10 = vector.multi_reduction <maximumf>, %5, %cst_11 [1] : vector<256x256xf32> to vector<256xf32>
    %11 = vector.shape_cast %10 : vector<256xf32> to vector<256x1xf32>
    %12 = arith.maximumf %9, %11 : vector<256x1xf32>
    %c0_12 = arith.constant 0 : index
    %c0_13 = arith.constant 0 : index
    %13 = vector.load %arg8[%c0_12, %c0_13] : memref<256x1xf32, #tpu.memory_space<vmem>>, vector<256x1xf32>
    %14 = arith.subf %9, %12 : vector<256x1xf32>
    %15 = math.exp %14 : vector<256x1xf32>
    %16 = arith.mulf %13, %15 : vector<256x1xf32>
    %17 = vector.broadcast %12 : vector<256x1xf32> to vector<256x256xf32>
    %18 = arith.subf %5, %17 : vector<256x256xf32>
    %19 = math.exp %18 : vector<256x256xf32>
    %cst_14 = arith.constant dense<0.000000e+00> : vector<256xf32>
    %20 = vector.multi_reduction <add>, %19, %cst_14 [1] : vector<256x256xf32> to vector<256xf32>
    %21 = vector.shape_cast %20 : vector<256xf32> to vector<256x1xf32>
    %22 = arith.addf %16, %21 : vector<256x1xf32>
    %c0_15 = arith.constant 0 : index
    %c0_16 = arith.constant 0 : index
    %23 = vector.load %arg8[%c0_15, %c0_16] : memref<256x1xf32, #tpu.memory_space<vmem>>, vector<256x1xf32>
    tpu.vector_store %arg8[%c0_15, %c0_16], %22 {strides = array<i32>} : memref<256x1xf32, #tpu.memory_space<vmem>>, vector<256x1xf32>,
    %c0_17 = arith.constant 0 : index
    %c0_18 = arith.constant 0 : index
    %24 = vector.load %arg7[%c0_17, %c0_18] : memref<256x1xf32, #tpu.memory_space<vmem>>, vector<256x1xf32>
    tpu.vector_store %arg7[%c0_17, %c0_18], %12 {strides = array<i32>} : memref<256x1xf32, #tpu.memory_space<vmem>>, vector<256x1xf32>,
    %c0_19 = arith.constant 0 : index
    %c0_20 = arith.constant 0 : index
    %25 = vector.load %arg9[%c0_19, %c0_20] : memref<256x1xf32, #tpu.memory_space<vmem>>, vector<256x1xf32>
    %cst_21 = arith.constant dense<0xFF800000> : vector<256xf32>
    %26 = vector.multi_reduction <maximumf>, %8, %cst_21 [1] : vector<256x256xf32> to vector<256xf32>
    %27 = vector.shape_cast %26 : vector<256xf32> to vector<256x1xf32>
    %28 = arith.maximumf %25, %27 : vector<256x1xf32>
    %c0_22 = arith.constant 0 : index
    %c0_23 = arith.constant 0 : index
    %29 = vector.load %arg10[%c0_22, %c0_23] : memref<256x1xf32, #tpu.memory_space<vmem>>, vector<256x1xf32>
    %30 = arith.subf %25, %28 : vector<256x1xf32>
    %31 = math.exp %30 : vector<256x1xf32>
    %32 = arith.mulf %29, %31 : vector<256x1xf32>
    %33 = vector.broadcast %28 : vector<256x1xf32> to vector<256x256xf32>
    %34 = arith.subf %8, %33 : vector<256x256xf32>
    %35 = math.exp %34 : vector<256x256xf32>
    %cst_24 = arith.constant dense<0.000000e+00> : vector<256xf32>
    %36 = vector.multi_reduction <add>, %35, %cst_24 [1] : vector<256x256xf32> to vector<256xf32>
    %37 = vector.shape_cast %36 : vector<256xf32> to vector<256x1xf32>
    %38 = arith.addf %32, %37 : vector<256x1xf32>
    %c0_25 = arith.constant 0 : index
    %c0_26 = arith.constant 0 : index
    %39 = vector.load %arg10[%c0_25, %c0_26] : memref<256x1xf32, #tpu.memory_space<vmem>>, vector<256x1xf32>
    tpu.vector_store %arg10[%c0_25, %c0_26], %38 {strides = array<i32>} : memref<256x1xf32, #tpu.memory_space<vmem>>, vector<256x1xf32>,
    %c0_27 = arith.constant 0 : index
    %c0_28 = arith.constant 0 : index
    %40 = vector.load %arg9[%c0_27, %c0_28] : memref<256x1xf32, #tpu.memory_space<vmem>>, vector<256x1xf32>
    tpu.vector_store %arg9[%c0_27, %c0_28], %28 {strides = array<i32>} : memref<256x1xf32, #tpu.memory_space<vmem>>, vector<256x1xf32>,
    %c0_i32_29 = arith.constant 0 : i32
    %41 = arith.cmpi eq, %arg1, %c0_i32_29 : i32
    %42 = arith.extui %41 : i1 to i32
    %c0_i32_30 = arith.constant 0 : i32
    %43 = arith.cmpi ne, %42, %c0_i32_30 : i32
    scf.if %43 {
      %c0_31 = arith.constant 0 : index
      %c0_32 = arith.constant 0 : index
      %44 = vector.load %arg7[%c0_31, %c0_32] : memref<256x1xf32, #tpu.memory_space<vmem>>, vector<256x1xf32>
      %c0_33 = arith.constant 0 : index
      %c0_34 = arith.constant 0 : index
      %45 = vector.load %arg8[%c0_33, %c0_34] : memref<256x1xf32, #tpu.memory_space<vmem>>, vector<256x1xf32>
      %46 = math.log %45 : vector<256x1xf32>
      %47 = arith.addf %44, %46 : vector<256x1xf32>
      %c0_35 = arith.constant 0 : index
      %c0_36 = arith.constant 0 : index
      %48 = vector.load %arg9[%c0_35, %c0_36] : memref<256x1xf32, #tpu.memory_space<vmem>>, vector<256x1xf32>
      %c0_37 = arith.constant 0 : index
      %c0_38 = arith.constant 0 : index
      %49 = vector.load %arg10[%c0_37, %c0_38] : memref<256x1xf32, #tpu.memory_space<vmem>>, vector<256x1xf32>
      %50 = math.log %49 : vector<256x1xf32>
      %51 = arith.addf %48, %50 : vector<256x1xf32>
      %c0_39 = arith.constant 0 : index
      %c0_40 = arith.constant 0 : index
      %52 = vector.load %arg11[%c0_39, %c0_40] : memref<256x1xf32, #tpu.memory_space<vmem>>, vector<256x1xf32>
      %53 = arith.subf %47, %52 : vector<256x1xf32>
      %c0_41 = arith.constant 0 : index
      %c0_42 = arith.constant 0 : index
      %54 = vector.load %arg11[%c0_41, %c0_42] : memref<256x1xf32, #tpu.memory_space<vmem>>, vector<256x1xf32>
      %55 = arith.subf %51, %54 : vector<256x1xf32>
      %56 = arith.addf %53, %55 : vector<256x1xf32>
      %cst_43 = arith.constant 5.000000e-01 : f32
      %57 = vector.broadcast %cst_43 : f32 to vector<256x1xf32>
      %58 = arith.mulf %57, %56 : vector<256x1xf32>
      %c0_44 = arith.constant 0 : index
      %c0_45 = arith.constant 0 : index
      %59 = vector.load %arg6[%c0_44, %c0_45] : memref<256x1xf32, #tpu.memory_space<vmem>>, vector<256x1xf32>
      tpu.vector_store %arg6[%c0_44, %c0_45], %58 {strides = array<i32>} : memref<256x1xf32, #tpu.memory_space<vmem>>, vector<256x1xf32>,
    } else {
    }
    return
  }
  func.func @transform_0(%arg0: i32, %arg1: i32) -> (i32, i32) {
    %c0_i32 = arith.constant 0 : i32
    %c0_i32_0 = arith.constant 0 : i32
    return %arg0, %c0_i32 : i32, i32
  }
  func.func @transform_1(%arg0: i32, %arg1: i32) -> (i32, i32) {
    %c0_i32 = arith.constant 0 : i32
    %c0_i32_0 = arith.constant 0 : i32
    return %arg0, %c0_i32 : i32, i32
  }
  func.func @transform_2(%arg0: i32, %arg1: i32) -> (i32, i32) {
    %c0_i32 = arith.constant 0 : i32
    %c0_i32_0 = arith.constant 0 : i32
    return %arg1, %c0_i32 : i32, i32
  }
  func.func @transform_3(%arg0: i32, %arg1: i32) -> (i32, i32) {
    %c0_i32 = arith.constant 0 : i32
    %c0_i32_0 = arith.constant 0 : i32
    return %arg1, %c0_i32 : i32, i32
  }
  func.func @transform_4(%arg0: i32, %arg1: i32) -> (i32, i32) {
    %c0_i32 = arith.constant 0 : i32
    %c0_i32_0 = arith.constant 0 : i32
    return %arg0, %c0_i32 : i32, i32
  }
}

</mosaic_0001>

<bundles_post_ra>
// kernel: tpu_custom_call.1
= control target key start
LH: loop header
LB: loop body
LE: loop exit
PB: predicated region body
PF: predicated region fallthrough
CT: control target
= control target key end

     0   :  { %9 = vsyncpa [#allocation8], 0  ;;  %s6643_s0 = inlined_call_operand.hbm [shape: bf16[256,128], index: 0, kind: input, shape index: {}]   ;;  %s6644_s1 = inlined_call_operand.hbm [shape: bf16[256,128], index: 1, kind: input, shape index: {}]   ;;  %s6645_s2 = inlined_call_operand.hbm [shape: bf16[256,128], index: 2, kind: input, shape index: {}]   ;;  %s6646_s3 = inlined_call_operand.hbm [shape: bf16[256,128], index: 3, kind: input, shape index: {}]   ;;  %s6647_s4 = inlined_call_operand.vmem [shape: f32[256,1], index: 4, kind: output, shape index: {}]  }
   0x1   :  { %10 = vsyncpa [#allocation10], 0 }
   0x2   :  { %11 = vsyncpa [#allocation13], 0  ;;  %s29_s17 = sshll.u32 %s6644_s1, 4  ;;  %s4692_s18 = smov [#allocation9]   ;;  %s30_s17 = int_to_ptr.hbm [resolvable:$true] %s29_s17 }
   0x3   :  { %s31_s19 = sshll.u32 %s4692_s18, 4  ;;  %s16_s22 = sshll.u32 %s6643_s0, 4  ;;  %s32_s19 = int_to_ptr.vmem [resolvable:$true] %s31_s19  ;;  %s17_s22 = int_to_ptr.hbm [resolvable:$true] %s16_s22 }
   0x4   :  { %s4693_s23 = smov 64   ;;  %s4694_s24 = smov 4  }
   0x5   :  { %37 = dma.hbm_to_vmem [thread:$0]  %s30_s17, 2048, %s32_s19, [#allocation10], %s4693_s23, %s4693_s23, %s4694_s24  }
   0x6   :  { %s4695_s25 = smov [#allocation7]   ;;  %s42_s29 = sshll.u32 %s6645_s2, 4  ;;  %s43_s29 = int_to_ptr.hbm [resolvable:$true] %s42_s29 }
   0x7   :  { %s18_s26 = sshll.u32 %s4695_s25, 4  ;;  %s55_s5 = sshll.u32 %s6646_s3, 4  ;;  %s19_s26 = int_to_ptr.vmem [resolvable:$true] %s18_s26  ;;  %s56_s5 = int_to_ptr.hbm [resolvable:$true] %s55_s5 }
   0x8   :  { %24 = dma.hbm_to_vmem [thread:$0]  %s17_s22, 2048, %s19_s26, [#allocation8], %s4693_s23, %s4693_s23, %s4694_s24  }
   0x9   :  { %s4696_s6 = smov [#allocation11]   ;;  %s4697_s0 = smov [#allocation12]  }
   0xa   :  { %s44_s7 = sshll.u32 %s4696_s6, 4  ;;  %s57_s8 = sshll.u32 %s4697_s0, 4  ;;  %s45_s7 = int_to_ptr.vmem [resolvable:$true] %s44_s7  ;;  %s58_s8 = int_to_ptr.vmem [resolvable:$true] %s57_s8 }
   0xb   :  { %50 = dma.hbm_to_vmem [thread:$0]  %s43_s29, 2048, %s45_s7, [#allocation10], %s4693_s23, %s4693_s23, %s4694_s24  }
   0xc   :  { %63 = dma.hbm_to_vmem [thread:$0]  %s56_s5, 2048, %s58_s8, [#allocation13], %s4693_s23, %s4693_s23, %s4694_s24  }
   0xd   :  { %4686 = dma.done.wait [#allocation8], 2048  }
   0xe   :  { %4687 = vsyncadd [#allocation8], 4294965248 }
   0xf   :  { %4688 = dma.done.wait [#allocation10], 4096  }
  0x10   :  { %4689 = vsyncadd [#allocation10], 4294963200 }
  0x11   :  { %4690 = dma.done.wait [#allocation13], 2048  }
  0x12   :  { %4691 = vsyncadd [#allocation13], 4294965248  ;;  %v3867_v0 = vld [vmem:[#allocation12 + $0x38] sm:$0xff]  ;;  %v3866_v4 = vld [vmem:[#allocation12 + $0x30] sm:$0xff]  ;;  %vm84_vm0 = vcmask 7168  }
  0x13   :  { %v3875_v1 = vld [vmem:[#allocation12 + $0x78] sm:$0xff]  ;;  %725 = vmatpush.bf16.xpose.msra.mxu0 %v3867_v0  ;;  %v3874_v5 = vld [vmem:[#allocation12 + $0x70] sm:$0xff]  ;;  %v3865_v8 = vld [vmem:[#allocation12 + $0x28] sm:$0xff] }
  0x14   :  { %v3899_v2 = vld [vmem:[#allocation11 + $0x38] sm:$0xff]  ;;  %814 = vmatpush.bf16.xpose.msra.mxu1 %v3875_v1  ;;  %v3898_v6 = vld [vmem:[#allocation11 + $0x30] sm:$0xff]  ;;  %v3873_v9 = vld [vmem:[#allocation12 + $0x68] sm:$0xff] }
  0x15   :  { %v3907_v3 = vld [vmem:[#allocation11 + $0x78] sm:$0xff]  ;;  %1159 = vmatpush.bf16.xpose.msra.mxu2 %v3899_v2  ;;  %v3906_v7 = vld [vmem:[#allocation11 + $0x70] sm:$0xff]  ;;  %v3897_v10 = vld [vmem:[#allocation11 + $0x28] sm:$0xff] }
  0x16   :  { %1248 = vmatpush.bf16.xpose.msra.mxu3 %v3907_v3  ;;  %v3905_v11 = vld [vmem:[#allocation11 + $0x68] sm:$0xff]  ;;  %v3864_v12 = vld [vmem:[#allocation12 + $0x20] sm:$0xff]  ;;  %v3863_v16 = vld [vmem:[#allocation12 + $0x18] sm:$0xff] }
  0x17   :  { %v3872_v13 = vld [vmem:[#allocation12 + $0x60] sm:$0xff]  ;;  %v3871_v17 = vld [vmem:[#allocation12 + $0x58] sm:$0xff]  ;;  %v3862_v20 = vld [vmem:[#allocation12 + $0x10] sm:$0xff] }
  0x18   :  { %v3896_v14 = vld [vmem:[#allocation11 + $0x20] sm:$0xff]  ;;  %v3895_v18 = vld [vmem:[#allocation11 + $0x18] sm:$0xff]  ;;  %v3870_v21 = vld [vmem:[#allocation12 + $0x50] sm:$0xff] }
  0x19   :  { %v3904_v15 = vld [vmem:[#allocation11 + $0x60] sm:$0xff]  ;;  %v3903_v19 = vld [vmem:[#allocation11 + $0x58] sm:$0xff]  ;;  %v3894_v22 = vld [vmem:[#allocation11 + $0x10] sm:$0xff] }
  0x1a   :  { %v3902_v23 = vld [vmem:[#allocation11 + $0x50] sm:$0xff]  ;;  %v3861_v24 = vld [vmem:[#allocation12 + $0x8] sm:$0xff]  ;;  %v3860_v28 = vld [vmem:[#allocation12] sm:$0xff] }
  0x1b   :  { %726 = vmatpush.bf16.xpose.msra.mxu0 %v3866_v4  ;;  %v3869_v25 = vld [vmem:[#allocation12 + $0x48] sm:$0xff]  ;;  %v3868_v29 = vld [vmem:[#allocation12 + $0x40] sm:$0xff]  ;;  %v4037_v41 = vld [vmem:[#allocation7 + $0x10] sm:$0xff]  }
  0x1c   :  { %815 = vmatpush.bf16.xpose.msra.mxu1 %v3874_v5  ;;  %v3893_v26 = vld [vmem:[#allocation11 + $0x8] sm:$0xff]  ;;  %v3892_v30 = vld [vmem:[#allocation11] sm:$0xff]  ;;  %v4052_v42 = vld [vmem:[#allocation9 + $0x10] sm:$0xff]   ;;  %v3918_v46 = vunpack.c.l.bf16 %v4037_v41  ;;  %v3919_v58 = vunpack.c.h.bf16 %v4037_v41 }
  0x1d   :  { %1160 = vmatpush.bf16.xpose.msra.mxu2 %v3898_v6  ;;  %v3901_v27 = vld [vmem:[#allocation11 + $0x48] sm:$0xff]  ;;  %v3900_v31 = vld [vmem:[#allocation11 + $0x40] sm:$0xff]  ;;  %v3982_v47 = vunpack.c.l.bf16 %v4052_v42  ;;  %v4038_v50 = vld [vmem:[#allocation7 + $0x18] sm:$0xff]   ;;  %v3983_v59 = vunpack.c.h.bf16 %v4052_v42 }
  0x1e   :  { %1249 = vmatpush.bf16.xpose.msra.mxu3 %v3906_v7  ;;  %v3844_v32 = vld [vmem:[#allocation7] sm:$0xff]  ;;  %v3845_v39 = vld [vmem:[#allocation7 + $0x8] sm:$0xff]  ;;  %v4053_v51 = vld [vmem:[#allocation9 + $0x18] sm:$0xff]   ;;  %v3922_v56 = vunpack.c.l.bf16 %v4038_v50  ;;  %v3923_v5 = vunpack.c.h.bf16 %v4038_v50 }
  0x1f   :  { %v3876_v33 = vld [vmem:[#allocation9] sm:$0xff]  ;;  %v3877_v40 = vld [vmem:[#allocation9 + $0x8] sm:$0xff]  ;;  %v345_v54 = vmul.f32 %v3982_v47, %v3918_v46  ;;  %v3986_v57 = vunpack.c.l.bf16 %v4053_v51  ;;  %v346_v63 = vmul.f32 %v3983_v59, %v3919_v58  ;;  %v3846_v1 = vld [vmem:[#allocation7 + $0x10] sm:$0xff]  ;;  %v3987_v6 = vunpack.c.h.bf16 %v4053_v51 }
  0x20   :  { %v3909_v34 = vld [vmem:[#allocation7] sm:$0xff]   ;;  %v4036_v43 = vld [vmem:[#allocation7 + $0x8] sm:$0xff]   ;;  %v3878_v2 = vld [vmem:[#allocation9 + $0x10] sm:$0xff] }
  0x21   :  { %v3973_v35 = vld [vmem:[#allocation9] sm:$0xff]   ;;  %v3910_v36 = vunpack.c.l.bf16 %v3909_v34  ;;  %v3911_v44 = vunpack.c.h.bf16 %v3909_v34  ;;  %v3914_v48 = vunpack.c.l.bf16 %v4036_v43  ;;  %v4051_v49 = vld [vmem:[#allocation9 + $0x8] sm:$0xff]   ;;  %381 = vadd.xlane.f32.xlu2 %v345_v54  ;;  %v3915_v60 = vunpack.c.h.bf16 %v4036_v43 }
  0x22   :  { %v3974_v37 = vunpack.c.l.bf16 %v3973_v35  ;;  %v3975_v45 = vunpack.c.h.bf16 %v3973_v35  ;;  %v3978_v52 = vunpack.c.l.bf16 %v4051_v49  ;;  %v3979_v61 = vunpack.c.h.bf16 %v4051_v49  ;;  %v4039_v3 = vld [vmem:[#allocation7 + $0x20] sm:$0xff]   ;;  %v4059_v41 = vld [vmem:[#allocation9 + $0x48] sm:$0xff]  }
  0x23   :  { %727 = vmatpush.bf16.xpose.msra.mxu0 %v3865_v8  ;;  %v347_v62 = vmul.f32 %v3986_v57, %v3922_v56  ;;  %v4054_v4 = vld [vmem:[#allocation9 + $0x20] sm:$0xff]   ;;  %v3926_v7 = vunpack.c.l.bf16 %v4039_v3  ;;  %v4010_v47 = vunpack.c.l.bf16 %v4059_v41  ;;  %v4060_v56 = vld [vmem:[#allocation9 + $0x50] sm:$0xff]   ;;  %v4011_v58 = vunpack.c.h.bf16 %v4059_v41 }
  0x24   :  { %816 = vmatpush.bf16.xpose.msra.mxu1 %v3873_v9  ;;  %v341_v38 = vmul.f32 %v3974_v37, %v3910_v36  ;;  %v342_v53 = vmul.f32 %v3975_v45, %v3911_v44  ;;  %v343_v55 = vmul.f32 %v3978_v52, %v3914_v48  ;;  %v344_v0 = vmul.f32 %v3979_v61, %v3915_v60  ;;  %v4043_v37 = vld [vmem:[#allocation7 + $0x40] sm:$0xff]  }
  0x25   :  { %1161 = vmatpush.bf16.xpose.msra.mxu2 %v3897_v10  ;;  %v3990_v8 = vunpack.c.l.bf16 %v4054_v4  ;;  %v3927_v9 = vunpack.c.h.bf16 %v4039_v3  ;;  %v3991_v10 = vunpack.c.h.bf16 %v4054_v4  ;;  %v3943_v44 = vunpack.c.h.bf16 %v4043_v37  ;;  %v3880_v54 = vld [vmem:[#allocation9 + $0x20] sm:$0xff] }
  0x26   :  { %1250 = vmatpush.bf16.xpose.msra.mxu3 %v3905_v11  ;;  %373 = vadd.xlane.f32.xlu0 %v341_v38  ;;  %v4040_v11 = vld [vmem:[#allocation7 + $0x28] sm:$0xff]   ;;  %v3942_v48 = vunpack.c.l.bf16 %v4043_v37  ;;  %v4014_v60 = vunpack.c.l.bf16 %v4060_v56  ;;  %v4062_v3 = vld [vmem:[#allocation9 + $0x60] sm:$0xff]  }
  0x27   :  { %377 = vadd.xlane.f32.xlu1 %v343_v55  ;;  %v4045_v55 = vld [vmem:[#allocation7 + $0x50] sm:$0xff]  }
  0x28   :  { %v3950_v59 = vunpack.c.l.bf16 %v4045_v55  ;;  %v3951_v61 = vunpack.c.h.bf16 %v4045_v55 }
  0x29   :  { %383 = vadd.xlane.f32.xlu2 %v346_v63  ;;  %v4046_v63 = vld [vmem:[#allocation7 + $0x58] sm:$0xff]  }
  0x2a   :  { %v361_v4 = vmul.f32 %v4014_v60, %v3950_v59 }
  0x2b   :  { %728 = vmatpush.bf16.xpose.msra.mxu0 %v3864_v12  ;;  %v348_v12 = vmul.f32 %v3987_v6, %v3923_v5  ;;  %v3955_v6 = vunpack.c.h.bf16 %v4046_v63 }
  0x2c   :  { %817 = vmatpush.bf16.xpose.msra.mxu1 %v3872_v13  ;;  %v4055_v13 = vld [vmem:[#allocation9 + $0x28] sm:$0xff]  }
  0x2d   :  { %1162 = vmatpush.bf16.xpose.msra.mxu2 %v3896_v14  ;;  %v4041_v14 = vld [vmem:[#allocation7 + $0x30] sm:$0xff]  }
  0x2e   :  { %1251 = vmatpush.bf16.xpose.msra.mxu3 %v3904_v15  ;;  %375 = vadd.xlane.f32.xlu0 %v342_v53  ;;  %v4056_v15 = vld [vmem:[#allocation9 + $0x30] sm:$0xff]   ;;  %v3848_v53 = vld [vmem:[#allocation7 + $0x20] sm:$0xff] }
  0x2f   :  { %379 = vadd.xlane.f32.xlu1 %v344_v0 }
  0x33   :  { %729 = vmatpush.bf16.xpose.msra.mxu0 %v3863_v16  ;;  %v349_v16 = vmul.f32 %v3990_v8, %v3926_v7 }
  0x34   :  { %818 = vmatpush.bf16.xpose.msra.mxu1 %v3871_v17  ;;  %v350_v17 = vmul.f32 %v3991_v10, %v3927_v9  ;;  %v4022_v9 = vunpack.c.l.bf16 %v4062_v3  ;;  %v3954_v10 = vunpack.c.l.bf16 %v4046_v63 }
  0x35   :  { %1163 = vmatpush.bf16.xpose.msra.mxu2 %v3895_v18  ;;  %389 = vadd.xlane.f32.xlu2 %v349_v16  ;;  %v3931_v18 = vunpack.c.h.bf16 %v4040_v11  ;;  %v3881_v16 = vld [vmem:[#allocation9 + $0x28] sm:$0xff] }
  0x36   :  { %1252 = vmatpush.bf16.xpose.msra.mxu3 %v3903_v19  ;;  %385 = vadd.xlane.f32.xlu0 %v347_v62  ;;  %v3995_v19 = vunpack.c.h.bf16 %v4055_v13  ;;  %v4015_v62 = vunpack.c.h.bf16 %v4060_v56 }
  0x37   :  { %387 = vadd.xlane.f32.xlu1 %v348_v12 }
  0x38   :  { %v362_v5 = vmul.f32 %v4015_v62, %v3951_v61  ;;  %v3884_v61 = vld [vmem:[#allocation9 + $0x40] sm:$0xff] }
  0x3b   :  { %730 = vmatpush.bf16.xpose.msra.mxu0 %v3862_v20  ;;  %v3934_v20 = vunpack.c.l.bf16 %v4041_v14 }
  0x3c   :  { %819 = vmatpush.bf16.xpose.msra.mxu1 %v3870_v21  ;;  %v3998_v21 = vunpack.c.l.bf16 %v4056_v15 }
  0x3d   :  { %1164 = vmatpush.bf16.xpose.msra.mxu2 %v3894_v22  ;;  %v3930_v22 = vunpack.c.l.bf16 %v4040_v11 }
  0x3e   :  { %1253 = vmatpush.bf16.xpose.msra.mxu3 %v3902_v23  ;;  %391 = vadd.xlane.f32.xlu0 %v350_v17  ;;  %v3994_v23 = vunpack.c.l.bf16 %v4055_v13  ;;  %v4048_v17 = vld [vmem:[#allocation7 + $0x68] sm:$0xff]  }
  0x43   :  { %731 = vmatpush.bf16.xpose.msra.mxu0 %v3861_v24  ;;  %v352_v24 = vmul.f32 %v3995_v19, %v3931_v18  ;;  %v4063_v18 = vld [vmem:[#allocation9 + $0x68] sm:$0xff]  }
  0x44   :  { %820 = vmatpush.bf16.xpose.msra.mxu1 %v3869_v25  ;;  %v353_v25 = vmul.f32 %v3998_v21, %v3934_v20  ;;  %v4023_v20 = vunpack.c.h.bf16 %v4062_v3  ;;  %v3962_v21 = vunpack.c.l.bf16 %v4048_v17 }
  0x45   :  { %1165 = vmatpush.bf16.xpose.msra.mxu2 %v3893_v26  ;;  %v351_v26 = vmul.f32 %v3994_v23, %v3930_v22  ;;  %395 = vadd.xlane.f32.xlu2 %v352_v24  ;;  %v4026_v22 = vunpack.c.l.bf16 %v4063_v18  ;;  %v3963_v23 = vunpack.c.h.bf16 %v4048_v17  ;;  %v4027_v24 = vunpack.c.h.bf16 %v4063_v18 }
  0x46   :  { %1254 = vmatpush.bf16.xpose.msra.mxu3 %v3901_v27  ;;  %v3847_v27 = vld [vmem:[#allocation7 + $0x18] sm:$0xff]  ;;  %397 = vadd.xlane.f32.xlu0 %v353_v25 }
  0x47   :  { %393 = vadd.xlane.f32.xlu1 %v351_v26  ;;  %v367_v26 = vmul.f32 %v4026_v22, %v3962_v21 }
  0x4b   :  { %732 = vmatpush.bf16.xpose.msra.mxu0 %v3860_v28  ;;  %v3879_v28 = vld [vmem:[#allocation9 + $0x18] sm:$0xff] }
  0x4c   :  { %821 = vmatpush.bf16.xpose.msra.mxu1 %v3868_v29  ;;  %v4042_v29 = vld [vmem:[#allocation7 + $0x38] sm:$0xff]  }
  0x4d   :  { %1166 = vmatpush.bf16.xpose.msra.mxu2 %v3892_v30  ;;  %v4057_v30 = vld [vmem:[#allocation9 + $0x38] sm:$0xff]   ;;  %v3939_v35 = vunpack.c.h.bf16 %v4042_v29 }
  0x4e   :  { %1255 = vmatpush.bf16.xpose.msra.mxu3 %v3900_v31  ;;  %v3935_v31 = vunpack.c.h.bf16 %v4041_v14  ;;  %v4002_v34 = vunpack.c.l.bf16 %v4057_v30  ;;  %v4003_v36 = vunpack.c.h.bf16 %v4057_v30  ;;  %v4050_v30 = vld [vmem:[#allocation7 + $0x78] sm:$0xff]  }
  0x4f   :  { %v3970_v37 = vunpack.c.l.bf16 %v4050_v30 }
  0x50   :  { %v356_v43 = vmul.f32 %v4003_v36, %v3939_v35  ;;  %v4065_v35 = vld [vmem:[#allocation9 + $0x78] sm:$0xff]   ;;  %v3850_v36 = vld [vmem:[#allocation7 + $0x30] sm:$0xff] }
  0x52   :  { %733 = vmatmul.bf16.vlgmr.msra.gmra.mxu0 %v3844_v32  ;;  %403 = vadd.xlane.f32.xlu0 %v356_v43  ;;  %v3971_v43 = vunpack.c.h.bf16 %v4050_v30 }
  0x53   :  { %822 = vmatmul.bf16.vlgmr.msra.gmra.mxu1 %v3844_v32  ;;  %v3999_v32 = vunpack.c.h.bf16 %v4056_v15  ;;  %v3849_v15 = vld [vmem:[#allocation7 + $0x28] sm:$0xff] }
  0x54   :  { %1167 = vmatmul.bf16.vlgmr.msra.gmra.mxu2 %v3876_v33 }
  0x55   :  { %1256 = vmatmul.bf16.vlgmr.msra.gmra.mxu3 %v3876_v33  ;;  %v3938_v33 = vunpack.c.l.bf16 %v4042_v29  ;;  %v354_v38 = vmul.f32 %v3999_v32, %v3935_v31  ;;  %v4064_v29 = vld [vmem:[#allocation9 + $0x70] sm:$0xff]  }
  0x56   :  { %v4031_v32 = vunpack.c.h.bf16 %v4064_v29 }
  0x57   :  { %v355_v42 = vmul.f32 %v4002_v34, %v3938_v33  ;;  %399 = vadd.xlane.f32.xlu1 %v354_v38  ;;  %v4030_v34 = vunpack.c.l.bf16 %v4064_v29  ;;  %v4034_v38 = vunpack.c.l.bf16 %v4065_v35 }
  0x59   :  { %401 = vadd.xlane.f32.xlu2 %v355_v42  ;;  %v371_v42 = vmul.f32 %v4034_v38, %v3970_v37 }
  0x62   :  { %738 = vmatmul.bf16.gmra.mxu0 %v3845_v39 }
  0x63   :  { %827 = vmatmul.bf16.gmra.mxu1 %v3845_v39  ;;  %v4058_v39 = vld [vmem:[#allocation9 + $0x40] sm:$0xff]  }
  0x64   :  { %1172 = vmatmul.bf16.gmra.mxu2 %v3877_v40  ;;  %v4007_v45 = vunpack.c.h.bf16 %v4058_v39  ;;  %v4006_v49 = vunpack.c.l.bf16 %v4058_v39  ;;  %v3882_v39 = vld [vmem:[#allocation9 + $0x30] sm:$0xff] }
  0x65   :  { %1261 = vmatmul.bf16.gmra.mxu3 %v3877_v40  ;;  %v4044_v40 = vld [vmem:[#allocation7 + $0x48] sm:$0xff]  }
  0x66   :  { %v3946_v46 = vunpack.c.l.bf16 %v4044_v40  ;;  %v358_v50 = vmul.f32 %v4007_v45, %v3943_v44  ;;  %v357_v52 = vmul.f32 %v4006_v49, %v3942_v48  ;;  %v3947_v57 = vunpack.c.h.bf16 %v4044_v40  ;;  %v3852_v48 = vld [vmem:[#allocation7 + $0x40] sm:$0xff] }
  0x67   :  { %v4035_v44 = vunpack.c.h.bf16 %v4065_v35 }
  0x68   :  { %v359_v51 = vmul.f32 %v4010_v47, %v3946_v46  ;;  %407 = vadd.xlane.f32.xlu2 %v358_v50  ;;  %405 = vadd.xlane.f32.xlu1 %v357_v52  ;;  %v360_v0 = vmul.f32 %v4011_v58, %v3947_v57  ;;  %v3851_v46 = vld [vmem:[#allocation7 + $0x38] sm:$0xff] }
  0x69   :  { %v372_v45 = vmul.f32 %v4035_v44, %v3971_v43  ;;  %v3883_v47 = vld [vmem:[#allocation9 + $0x38] sm:$0xff] }
  0x6a   :  { %409 = vadd.xlane.f32.xlu0 %v359_v51 }
  0x70   :  { %413 = vadd.xlane.f32.xlu2 %v361_v4  ;;  %411 = vadd.xlane.f32.xlu1 %v360_v0 }
  0x72   :  { %743 = vmatmul.bf16.gmra.mxu0 %v3846_v1  ;;  %415 = vadd.xlane.f32.xlu0 %v362_v5 }
  0x73   :  { %832 = vmatmul.bf16.gmra.mxu1 %v3846_v1  ;;  %v4061_v1 = vld [vmem:[#allocation9 + $0x58] sm:$0xff]  }
  0x74   :  { %1177 = vmatmul.bf16.gmra.mxu2 %v3878_v2  ;;  %v4019_v7 = vunpack.c.h.bf16 %v4061_v1  ;;  %v4018_v11 = vunpack.c.l.bf16 %v4061_v1 }
  0x75   :  { %1266 = vmatmul.bf16.gmra.mxu3 %v3878_v2  ;;  %v4047_v2 = vld [vmem:[#allocation7 + $0x60] sm:$0xff]  }
  0x76   :  { %v3958_v8 = vunpack.c.l.bf16 %v4047_v2  ;;  %v364_v12 = vmul.f32 %v4019_v7, %v3955_v6  ;;  %v363_v14 = vmul.f32 %v4018_v11, %v3954_v10  ;;  %v3959_v19 = vunpack.c.h.bf16 %v4047_v2 }
  0x78   :  { %v365_v13 = vmul.f32 %v4022_v9, %v3958_v8  ;;  %419 = vadd.xlane.f32.xlu2 %v364_v12  ;;  %417 = vadd.xlane.f32.xlu1 %v363_v14  ;;  %v366_v25 = vmul.f32 %v4023_v20, %v3959_v19 }
  0x7a   :  { %421 = vadd.xlane.f32.xlu0 %v365_v13 }
  0x80   :  { %425 = vadd.xlane.f32.xlu2 %v367_v26  ;;  %423 = vadd.xlane.f32.xlu1 %v366_v25 }
  0x82   :  { %748 = vmatmul.bf16.gmra.mxu0 %v3847_v27 }
  0x83   :  { %837 = vmatmul.bf16.gmra.mxu1 %v3847_v27  ;;  %v368_v27 = vmul.f32 %v4027_v24, %v3963_v23 }
  0x84   :  { %1182 = vmatmul.bf16.gmra.mxu2 %v3879_v28 }
  0x85   :  { %1271 = vmatmul.bf16.gmra.mxu3 %v3879_v28  ;;  %427 = vadd.xlane.f32.xlu0 %v368_v27  ;;  %v4049_v28 = vld [vmem:[#allocation7 + $0x70] sm:$0xff]  }
  0x86   :  { %v3967_v31 = vunpack.c.h.bf16 %v4049_v28  ;;  %v3966_v33 = vunpack.c.l.bf16 %v4049_v28 }
  0x88   :  { %v370_v40 = vmul.f32 %v4031_v32, %v3967_v31  ;;  %v369_v41 = vmul.f32 %v4030_v34, %v3966_v33 }
  0x8a   :  { %431 = vadd.xlane.f32.xlu2 %v370_v40  ;;  %429 = vadd.xlane.f32.xlu1 %v369_v41  ;;  %v3885_v40 = vld [vmem:[#allocation9 + $0x48] sm:$0xff] }
  0x8d   :  { %433 = vadd.xlane.f32.xlu0 %v371_v42 }
  0x92   :  { %753 = vmatmul.bf16.gmra.mxu0 %v3848_v53  ;;  %435 = vadd.xlane.f32.xlu1 %v372_v45  ;;  %v3853_v45 = vld [vmem:[#allocation7 + $0x48] sm:$0xff] }
  0x93   :  { %842 = vmatmul.bf16.gmra.mxu1 %v3848_v53 }
  0x94   :  { %1187 = vmatmul.bf16.gmra.mxu2 %v3880_v54  ;;  %v382_v59 = vpop.xlane.xlu2 %381 }
  0x95   :  { %1276 = vmatmul.bf16.gmra.mxu3 %v3880_v54  ;;  %441 = vst.msk [vmem:[#allocation6 + $0x20] sm:$0xff] %vm84_vm0, %v382_v59 }
  0x99   :  { %v374_v52 = vpop.xlane.xlu0 %373 }
  0x9a   :  { %437 = vst.msk [vmem:[#allocation6] sm:$0xff] %vm84_vm0, %v374_v52  ;;  %v378_v60 = vpop.xlane.xlu1 %377 }
  0x9b   :  { %439 = vst.msk [vmem:[#allocation6 + $0x10] sm:$0xff] %vm84_vm0, %v378_v60 }
  0x9c   :  { %v384_v5 = vpop.xlane.xlu2 %383 }
  0x9d   :  { %442 = vst.msk [vmem:[#allocation6 + $0x28] sm:$0xff] %vm84_vm0, %v384_v5 }
  0xa1   :  { %v376_v58 = vpop.xlane.xlu0 %375 }
  0xa2   :  { %758 = vmatmul.bf16.gmra.mxu0 %v3849_v15  ;;  %438 = vst.msk [vmem:[#allocation6 + $0x8] sm:$0xff] %vm84_vm0, %v376_v58  ;;  %v380_v6 = vpop.xlane.xlu1 %379 }
  0xa3   :  { %847 = vmatmul.bf16.gmra.mxu1 %v3849_v15  ;;  %440 = vst.msk [vmem:[#allocation6 + $0x18] sm:$0xff] %vm84_vm0, %v380_v6 }
  0xa4   :  { %1192 = vmatmul.bf16.gmra.mxu2 %v3881_v16 }
  0xa5   :  { %1281 = vmatmul.bf16.gmra.mxu3 %v3881_v16 }
  0xa8   :  { %v390_v13 = vpop.xlane.xlu2 %389 }
  0xa9   :  { %v386_v4 = vpop.xlane.xlu0 %385  ;;  %445 = vst.msk [vmem:[#allocation6 + $0x40] sm:$0xff] %vm84_vm0, %v390_v13 }
  0xaa   :  { %443 = vst.msk [vmem:[#allocation6 + $0x30] sm:$0xff] %vm84_vm0, %v386_v4  ;;  %v388_v15 = vpop.xlane.xlu1 %387 }
  0xab   :  { %444 = vst.msk [vmem:[#allocation6 + $0x38] sm:$0xff] %vm84_vm0, %v388_v15 }
  0xb1   :  { %v392_v14 = vpop.xlane.xlu0 %391 }
  0xb2   :  { %763 = vmatmul.bf16.gmra.mxu0 %v3850_v36  ;;  %446 = vst.msk [vmem:[#allocation6 + $0x48] sm:$0xff] %vm84_vm0, %v392_v14 }
  0xb3   :  { %852 = vmatmul.bf16.gmra.mxu1 %v3850_v36 }
  0xb4   :  { %1197 = vmatmul.bf16.gmra.mxu2 %v3882_v39 }
  0xb5   :  { %1286 = vmatmul.bf16.gmra.mxu3 %v3882_v39 }
  0xb8   :  { %v396_v22 = vpop.xlane.xlu2 %395 }
  0xb9   :  { %v398_v23 = vpop.xlane.xlu0 %397  ;;  %448 = vst.msk [vmem:[#allocation6 + $0x58] sm:$0xff] %vm84_vm0, %v396_v22 }
  0xba   :  { %v394_v24 = vpop.xlane.xlu1 %393  ;;  %449 = vst.msk [vmem:[#allocation6 + $0x60] sm:$0xff] %vm84_vm0, %v398_v23 }
  0xbb   :  { %447 = vst.msk [vmem:[#allocation6 + $0x50] sm:$0xff] %vm84_vm0, %v394_v24 }
  0xc2   :  { %768 = vmatmul.bf16.gmra.mxu0 %v3851_v46 }
  0xc3   :  { %857 = vmatmul.bf16.gmra.mxu1 %v3851_v46 }
  0xc4   :  { %1202 = vmatmul.bf16.gmra.mxu2 %v3883_v47 }
  0xc5   :  { %1291 = vmatmul.bf16.gmra.mxu3 %v3883_v47  ;;  %v404_v32 = vpop.xlane.xlu0 %403 }
  0xc6   :  { %452 = vst.msk [vmem:[#allocation6 + $0x78] sm:$0xff] %vm84_vm0, %v404_v32 }
  0xca   :  { %v400_v33 = vpop.xlane.xlu1 %399 }
  0xcb   :  { %450 = vst.msk [vmem:[#allocation6 + $0x68] sm:$0xff] %vm84_vm0, %v400_v33 }
  0xcc   :  { %v402_v31 = vpop.xlane.xlu2 %401 }
  0xcd   :  { %451 = vst.msk [vmem:[#allocation6 + $0x70] sm:$0xff] %vm84_vm0, %v402_v31 }
  0xcf   :  { %v4738_v49 = vpop.f32.mrf.mxu0 }
  0xd0   :  { %v4740_v50 = vpop.f32.mrf.mxu1 }
  0xd1   :  { %v1369_v51 = vmax.f32 %v4738_v49, %v4740_v50 }
  0xd2   :  { %773 = vmatmul.bf16.gmra.mxu0 %v3852_v48 }
  0xd3   :  { %862 = vmatmul.bf16.gmra.mxu1 %v3852_v48  ;;  %1370 = vmax.xlane.f32.xlu2 %v1369_v51 }
  0xd4   :  { %1207 = vmatmul.bf16.gmra.mxu2 %v3884_v61 }
  0xd5   :  { %1296 = vmatmul.bf16.gmra.mxu3 %v3884_v61 }
  0xd7   :  { %v4745_v53 = vpop.f32.mrf.mxu2  ;;  %v4749_v55 = vpop.f32.mrf.mxu0 }
  0xd8   :  { %6886 = vst [vmem:[#allocation17_spill] sm:$0xff] %v4745_v53  ;;  %v4747_v54 = vpop.f32.mrf.mxu3  ;;  %v4751_v56 = vpop.f32.mrf.mxu1 }
  0xd9   :  { %6887 = vst [vmem:[#allocation18_spill] sm:$0xff] %v4747_v54  ;;  %v2234_v57 = vmax.f32 %v4745_v53, %v4747_v54  ;;  %v1372_v3 = vmax.f32 %v4749_v55, %v4751_v56  ;;  %v3886_v53 = vld [vmem:[#allocation9 + $0x50] sm:$0xff] }
  0xdb   :  { %2235 = vmax.xlane.f32.xlu0 %v2234_v57  ;;  %v408_v41 = vpop.xlane.xlu2 %407  ;;  %v406_v43 = vpop.xlane.xlu1 %405 }
  0xdc   :  { %454 = vst.msk [vmem:[#allocation6 + $0x88] sm:$0xff] %vm84_vm0, %v408_v41 }
  0xdd   :  { %v410_v42 = vpop.xlane.xlu0 %409  ;;  %453 = vst.msk [vmem:[#allocation6 + $0x80] sm:$0xff] %vm84_vm0, %v406_v43 }
  0xde   :  { %455 = vst.msk [vmem:[#allocation6 + $0x90] sm:$0xff] %vm84_vm0, %v410_v42 }
  0xdf   :  { %v4758_v62 = vpop.f32.mrf.mxu2  ;;  %v4762_v0 = vpop.f32.mrf.mxu0 }
  0xe0   :  { %6888 = vst [vmem:[#allocation19_spill] sm:$0xff] %v4758_v62  ;;  %v4760_v63 = vpop.f32.mrf.mxu3  ;;  %v4764_v1 = vpop.f32.mrf.mxu1 }
  0xe1   :  { %6889 = vst [vmem:[#allocation20_spill] sm:$0xff] %v4760_v63  ;;  %v2237_v2 = vmax.f32 %v4758_v62, %v4760_v63  ;;  %v1375_v7 = vmax.f32 %v4762_v0, %v4764_v1 }
  0xe2   :  { %778 = vmatmul.bf16.gmra.mxu0 %v3853_v45 }
  0xe3   :  { %2238 = vmax.xlane.f32.xlu1 %v2237_v2  ;;  %1373 = vmax.xlane.f32.xlu0 %v1372_v3  ;;  %v414_v57 = vpop.xlane.xlu2 %413  ;;  %v412_v59 = vpop.xlane.xlu1 %411 }
  0xe4   :  { %1212 = vmatmul.bf16.gmra.mxu2 %v3885_v40  ;;  %867 = vmatmul.bf16.gmra.mxu1 %v3853_v45  ;;  %457 = vst.msk [vmem:[#allocation6 + $0xa0] sm:$0xff] %vm84_vm0, %v414_v57 }
  0xe5   :  { %1301 = vmatmul.bf16.gmra.mxu3 %v3885_v40  ;;  %v416_v58 = vpop.xlane.xlu0 %415  ;;  %456 = vst.msk [vmem:[#allocation6 + $0x98] sm:$0xff] %vm84_vm0, %v412_v59 }
  0xe6   :  { %458 = vst.msk [vmem:[#allocation6 + $0xa8] sm:$0xff] %vm84_vm0, %v416_v58  ;;  %v4698_v58 = vmov -inf  }
  0xe7   :  { %v4775_v8 = vpop.f32.mrf.mxu2  ;;  %v4779_v10 = vpop.f32.mrf.mxu0  ;;  %85 = vst.msk [vmem:[#allocation2] sm:$0xff] %vm84_vm0, %v4698_v58 }
  0xe8   :  { %6890 = vst [vmem:[#allocation21_spill] sm:$0xff] %v4775_v8  ;;  %v4777_v9 = vpop.f32.mrf.mxu3  ;;  %v4781_v11 = vpop.f32.mrf.mxu1 }
  0xe9   :  { %6891 = vst [vmem:[#allocation22_spill] sm:$0xff] %v4777_v9  ;;  %v2240_v12 = vmax.f32 %v4775_v8, %v4777_v9  ;;  %v1378_v20 = vmax.f32 %v4779_v10, %v4781_v11 }
  0xea   :  { %86 = vst.msk [vmem:[#allocation2 + $0x8] sm:$0xff] %vm84_vm0, %v4698_v58 }
  0xeb   :  { %2241 = vmax.xlane.f32.xlu2 %v2240_v12  ;;  %1376 = vmax.xlane.f32.xlu1 %v1375_v7  ;;  %v420_v6 = vpop.xlane.xlu2 %419  ;;  %v418_v12 = vpop.xlane.xlu1 %417  ;;  %87 = vst.msk [vmem:[#allocation2 + $0x10] sm:$0xff] %vm84_vm0, %v4698_v58 }
  0xec   :  { %460 = vst.msk [vmem:[#allocation6 + $0xb8] sm:$0xff] %vm84_vm0, %v420_v6 }
  0xed   :  { %v422_v7 = vpop.xlane.xlu0 %421  ;;  %459 = vst.msk [vmem:[#allocation6 + $0xb0] sm:$0xff] %vm84_vm0, %v418_v12 }
  0xee   :  { %461 = vst.msk [vmem:[#allocation6 + $0xc0] sm:$0xff] %vm84_vm0, %v422_v7 }
  0xef   :  { %v4787_v16 = vpop.f32.mrf.mxu2  ;;  %v4792_v18 = vpop.f32.mrf.mxu0  ;;  %88 = vst.msk [vmem:[#allocation2 + $0x18] sm:$0xff] %vm84_vm0, %v4698_v58 }
  0xf0   :  { %6892 = vst [vmem:[#allocation23_spill] sm:$0xff] %v4787_v16  ;;  %v4789_v17 = vpop.f32.mrf.mxu3  ;;  %v4794_v19 = vpop.f32.mrf.mxu1 }
  0xf1   :  { %6893 = vst [vmem:[#allocation24_spill] sm:$0xff] %v4789_v17  ;;  %v2243_v21 = vmax.f32 %v4787_v16, %v4789_v17  ;;  %v1381_v25 = vmax.f32 %v4792_v18, %v4794_v19 }
  0xf2   :  { %89 = vst.msk [vmem:[#allocation2 + $0x20] sm:$0xff] %vm84_vm0, %v4698_v58 }
  0xf3   :  { %1379 = vmax.xlane.f32.xlu2 %v1378_v20  ;;  %2244 = vmax.xlane.f32.xlu0 %v2243_v21  ;;  %v426_v23 = vpop.xlane.xlu2 %425  ;;  %v424_v24 = vpop.xlane.xlu1 %423  ;;  %90 = vst.msk [vmem:[#allocation2 + $0x28] sm:$0xff] %vm84_vm0, %v4698_v58 }
  0xf4   :  { %463 = vst.msk [vmem:[#allocation6 + $0xd0] sm:$0xff] %vm84_vm0, %v426_v23  ;;  %1217 = vmatmul.bf16.gmra.mxu2 %v3886_v53 }
  0xf5   :  { %462 = vst.msk [vmem:[#allocation6 + $0xc8] sm:$0xff] %vm84_vm0, %v424_v24  ;;  %1306 = vmatmul.bf16.gmra.mxu3 %v3886_v53 }
  0xf6   :  { %91 = vst.msk [vmem:[#allocation2 + $0x30] sm:$0xff] %vm84_vm0, %v4698_v58 }
  0xf7   :  { %v4804_v26 = vpop.f32.mrf.mxu2  ;;  %v4809_v28 = vpop.f32.mrf.mxu0  ;;  %92 = vst.msk [vmem:[#allocation2 + $0x38] sm:$0xff] %vm84_vm0, %v4698_v58 }
  0xf8   :  { %6894 = vst [vmem:[#allocation25_spill] sm:$0xff] %v4804_v26  ;;  %v4806_v27 = vpop.f32.mrf.mxu3  ;;  %v4811_v29 = vpop.f32.mrf.mxu1 }
  0xf9   :  { %6895 = vst [vmem:[#allocation26_spill] sm:$0xff] %v4806_v27  ;;  %v2246_v30 = vmax.f32 %v4804_v26, %v4806_v27  ;;  %v1384_v39 = vmax.f32 %v4809_v28, %v4811_v29 }
  0xfa   :  { %93 = vst.msk [vmem:[#allocation2 + $0x40] sm:$0xff] %vm84_vm0, %v4698_v58 }
  0xfb   :  { %2247 = vmax.xlane.f32.xlu1 %v2246_v30  ;;  %1382 = vmax.xlane.f32.xlu0 %v1381_v25  ;;  %v428_v25 = vpop.xlane.xlu0 %427  ;;  %94 = vst.msk [vmem:[#allocation2 + $0x48] sm:$0xff] %vm84_vm0, %v4698_v58 }
  0xfc   :  { %464 = vst.msk [vmem:[#allocation6 + $0xd8] sm:$0xff] %vm84_vm0, %v428_v25 }
  0xfd   :  { %v432_v40 = vpop.xlane.xlu2 %431  ;;  %v430_v42 = vpop.xlane.xlu1 %429  ;;  %95 = vst.msk [vmem:[#allocation2 + $0x50] sm:$0xff] %vm84_vm0, %v4698_v58 }
  0xfe   :  { %466 = vst.msk [vmem:[#allocation6 + $0xe8] sm:$0xff] %vm84_vm0, %v432_v40 }
  0xff   :  { %v4817_v34 = vpop.f32.mrf.mxu2  ;;  %v4822_v36 = vpop.f32.mrf.mxu0  ;;  %465 = vst.msk [vmem:[#allocation6 + $0xe0] sm:$0xff] %vm84_vm0, %v430_v42 }
 0x100   :  { %6896 = vst [vmem:[#allocation27_spill] sm:$0xff] %v4817_v34  ;;  %v4819_v35 = vpop.f32.mrf.mxu3  ;;  %v4824_v37 = vpop.f32.mrf.mxu1 }
 0x101   :  { %6897 = vst [vmem:[#allocation28_spill] sm:$0xff] %v4819_v35  ;;  %v2249_v38 = vmax.f32 %v4817_v34, %v4819_v35  ;;  %v1387_v44 = vmax.f32 %v4822_v36, %v4824_v37  ;;  %v5189_v34 = vld [vmem:[#allocation2 + $0x28] sm:$0xff] }
 0x102   :  { %6898 = vst [vmem:[#allocation29_spill] sm:$0xff] %v4822_v36  ;;  %v3857_v36 = vld [vmem:[#allocation7 + $0x68] sm:$0xff] }
 0x103   :  { %6899 = vst [vmem:[#allocation30_spill] sm:$0xff] %v4824_v37  ;;  %2250 = vmax.xlane.f32.xlu2 %v2249_v38  ;;  %1385 = vmax.xlane.f32.xlu1 %v1384_v39  ;;  %v434_v59 = vpop.xlane.xlu0 %433 }
 0x104   :  { %467 = vst.msk [vmem:[#allocation6 + $0xf0] sm:$0xff] %vm84_vm0, %v434_v59 }
 0x105   :  { %96 = vst.msk [vmem:[#allocation2 + $0x58] sm:$0xff] %vm84_vm0, %v4698_v58 }
 0x106   :  { %97 = vst.msk [vmem:[#allocation2 + $0x60] sm:$0xff] %vm84_vm0, %v4698_v58 }
 0x107   :  { %v4834_v46 = vpop.f32.mrf.mxu2  ;;  %v4839_v48 = vpop.f32.mrf.mxu0  ;;  %98 = vst.msk [vmem:[#allocation2 + $0x68] sm:$0xff] %vm84_vm0, %v4698_v58 }
 0x108   :  { %6900 = vst [vmem:[#allocation31_spill] sm:$0xff] %v4834_v46  ;;  %v4836_v47 = vpop.f32.mrf.mxu3  ;;  %v4841_v51 = vpop.f32.mrf.mxu1 }
 0x109   :  { %6901 = vst [vmem:[#allocation32_spill] sm:$0xff] %v4836_v47  ;;  %v2252_v52 = vmax.f32 %v4834_v46, %v4836_v47  ;;  %v1390_v5 = vmax.f32 %v4839_v48, %v4841_v51 }
 0x10a   :  { %6902 = vst [vmem:[#allocation33_spill] sm:$0xff] %v4839_v48 }
 0x10b   :  { %6903 = vst [vmem:[#allocation34_spill] sm:$0xff] %v4841_v51  ;;  %1388 = vmax.xlane.f32.xlu2 %v1387_v44  ;;  %2253 = vmax.xlane.f32.xlu0 %v2252_v52 }
 0x10c   :  { %99 = vst.msk [vmem:[#allocation2 + $0x70] sm:$0xff] %vm84_vm0, %v4698_v58 }
 0x10d   :  { %100 = vst.msk [vmem:[#allocation2 + $0x78] sm:$0xff] %vm84_vm0, %v4698_v58 }
 0x10e   :  { %101 = vst.msk [vmem:[#allocation2 + $0x80] sm:$0xff] %vm84_vm0, %v4698_v58 }
 0x10f   :  { %v4847_v60 = vpop.f32.mrf.mxu2  ;;  %v4852_v2 = vpop.f32.mrf.mxu0  ;;  %102 = vst.msk [vmem:[#allocation2 + $0x88] sm:$0xff] %vm84_vm0, %v4698_v58 }
 0x110   :  { %6904 = vst [vmem:[#allocation35_spill] sm:$0xff] %v4847_v60  ;;  %v4849_v61 = vpop.f32.mrf.mxu3  ;;  %v4854_v3 = vpop.f32.mrf.mxu1 }
 0x111   :  { %6905 = vst [vmem:[#allocation36_spill] sm:$0xff] %v4849_v61  ;;  %v2255_v4 = vmax.f32 %v4847_v60, %v4849_v61  ;;  %v1393_v13 = vmax.f32 %v4852_v2, %v4854_v3 }
 0x112   :  { %103 = vst.msk [vmem:[#allocation2 + $0x90] sm:$0xff] %vm84_vm0, %v4698_v58 }
 0x113   :  { %2256 = vmax.xlane.f32.xlu1 %v2255_v4  ;;  %1391 = vmax.xlane.f32.xlu0 %v1390_v5  ;;  %104 = vst.msk [vmem:[#allocation2 + $0x98] sm:$0xff] %vm84_vm0, %v4698_v58 }
 0x114   :  { %105 = vst.msk [vmem:[#allocation2 + $0xa0] sm:$0xff] %vm84_vm0, %v4698_v58 }
 0x115   :  { %106 = vst.msk [vmem:[#allocation2 + $0xa8] sm:$0xff] %vm84_vm0, %v4698_v58 }
 0x116   :  { %107 = vst.msk [vmem:[#allocation2 + $0xb0] sm:$0xff] %vm84_vm0, %v4698_v58 }
 0x117   :  { %v4864_v14 = vpop.f32.mrf.mxu2  ;;  %v4869_v20 = vpop.f32.mrf.mxu0  ;;  %108 = vst.msk [vmem:[#allocation2 + $0xb8] sm:$0xff] %vm84_vm0, %v4698_v58 }
 0x118   :  { %6906 = vst [vmem:[#allocation37_spill] sm:$0xff] %v4864_v14  ;;  %v4866_v15 = vpop.f32.mrf.mxu3  ;;  %v4871_v21 = vpop.f32.mrf.mxu1 }
 0x119   :  { %6907 = vst [vmem:[#allocation38_spill] sm:$0xff] %v4866_v15  ;;  %v2258_v22 = vmax.f32 %v4864_v14, %v4866_v15  ;;  %v1396_v38 = vmax.f32 %v4869_v20, %v4871_v21 }
 0x11a   :  { %6908 = vst [vmem:[#allocation39_spill] sm:$0xff] %v4869_v20  ;;  %v3856_v20 = vld [vmem:[#allocation7 + $0x60] sm:$0xff] }
 0x11b   :  { %6909 = vst [vmem:[#allocation40_spill] sm:$0xff] %v4871_v21  ;;  %2259 = vmax.xlane.f32.xlu2 %v2258_v22  ;;  %1394 = vmax.xlane.f32.xlu1 %v1393_v13  ;;  %v3888_v21 = vld [vmem:[#allocation9 + $0x60] sm:$0xff] }
 0x11c   :  { %109 = vst.msk [vmem:[#allocation2 + $0xc0] sm:$0xff] %vm84_vm0, %v4698_v58 }
 0x11d   :  { %110 = vst.msk [vmem:[#allocation2 + $0xc8] sm:$0xff] %vm84_vm0, %v4698_v58 }
 0x11e   :  { %111 = vst.msk [vmem:[#allocation2 + $0xd0] sm:$0xff] %vm84_vm0, %v4698_v58 }
 0x11f   :  { %v4877_v30 = vpop.f32.mrf.mxu2  ;;  %v4882_v32 = vpop.f32.mrf.mxu0  ;;  %112 = vst.msk [vmem:[#allocation2 + $0xd8] sm:$0xff] %vm84_vm0, %v4698_v58 }
 0x120   :  { %6910 = vst [vmem:[#allocation41_spill] sm:$0xff] %v4877_v30  ;;  %v4879_v31 = vpop.f32.mrf.mxu3  ;;  %v4884_v33 = vpop.f32.mrf.mxu1 }
 0x121   :  { %6911 = vst [vmem:[#allocation42_spill] sm:$0xff] %v4879_v31  ;;  %v2261_v39 = vmax.f32 %v4877_v30, %v4879_v31  ;;  %v1399_v41 = vmax.f32 %v4882_v32, %v4884_v33  ;;  %v5022_v31 = vpop.xlane.xlu1 %435 }
 0x122   :  { %6912 = vst [vmem:[#allocation43_spill] sm:$0xff] %v4882_v32 }
 0x123   :  { %6913 = vst [vmem:[#allocation44_spill] sm:$0xff] %v4884_v33  ;;  %1397 = vmax.xlane.f32.xlu2 %v1396_v38  ;;  %2262 = vmax.xlane.f32.xlu0 %v2261_v39 }
 0x124   :  { %113 = vst.msk [vmem:[#allocation2 + $0xe0] sm:$0xff] %vm84_vm0, %v4698_v58 }
 0x125   :  { %114 = vst.msk [vmem:[#allocation2 + $0xe8] sm:$0xff] %vm84_vm0, %v4698_v58 }
 0x126   :  { %115 = vst.msk [vmem:[#allocation2 + $0xf0] sm:$0xff] %vm84_vm0, %v4698_v58 }
 0x127   :  { %v4893_v43 = vpop.f32.mrf.mxu2  ;;  %v4898_v45 = vpop.f32.mrf.mxu0  ;;  %116 = vst.msk [vmem:[#allocation2 + $0xf8] sm:$0xff] %vm84_vm0, %v4698_v58 }
 0x128   :  { %6914 = vst [vmem:[#allocation45_spill] sm:$0xff] %v4893_v43  ;;  %v4895_v44 = vpop.f32.mrf.mxu3  ;;  %v4900_v52 = vpop.f32.mrf.mxu1 }
 0x129   :  { %6915 = vst [vmem:[#allocation46_spill] sm:$0xff] %v4895_v44  ;;  %v2264_v57 = vmax.f32 %v4893_v43, %v4895_v44  ;;  %v1402_v13 = vmax.f32 %v4898_v45, %v4900_v52 }
 0x12a   :  { %6916 = vst [vmem:[#allocation47_spill] sm:$0xff] %v4900_v52 }
 0x12b   :  { %2265 = vmax.xlane.f32.xlu1 %v2264_v57  ;;  %1400 = vmax.xlane.f32.xlu0 %v1399_v41  ;;  %149 = vst.msk [vmem:[#allocation4] sm:$0xff] %vm84_vm0, %v4698_v58 }
 0x12c   :  { %150 = vst.msk [vmem:[#allocation4 + $0x8] sm:$0xff] %vm84_vm0, %v4698_v58 }
 0x12d   :  { %151 = vst.msk [vmem:[#allocation4 + $0x10] sm:$0xff] %vm84_vm0, %v4698_v58 }
 0x12e   :  { %152 = vst.msk [vmem:[#allocation4 + $0x18] sm:$0xff] %vm84_vm0, %v4698_v58 }
 0x12f   :  { %v4917_v4 = vpop.f32.mrf.mxu2  ;;  %v4923_v6 = vpop.f32.mrf.mxu0  ;;  %153 = vst.msk [vmem:[#allocation4 + $0x20] sm:$0xff] %vm84_vm0, %v4698_v58 }
 0x130   :  { %6917 = vst [vmem:[#allocation48_spill] sm:$0xff] %v4917_v4  ;;  %v4919_v5 = vpop.f32.mrf.mxu3  ;;  %v4925_v7 = vpop.f32.mrf.mxu1 }
 0x131   :  { %6918 = vst [vmem:[#allocation49_spill] sm:$0xff] %v4919_v5  ;;  %v2267_v12 = vmax.f32 %v4917_v4, %v4919_v5  ;;  %v1405_v22 = vmax.f32 %v4923_v6, %v4925_v7  ;;  %v4699_v5 = vmov 0   ;;  %v5099_v4 = vld [vmem:[#allocation2 + $0x10] sm:$0xff] }
 0x132   :  { %6919 = vst [vmem:[#allocation50_spill] sm:$0xff] %v4923_v6  ;;  %v5046_v46 = vld [vmem:[#allocation4] sm:$0xff]  ;;  %4075 = vset.pattern.permute.xlu1 %v4699_v5  ;;  %4076 = vset.pattern.permute.xlu2 %v4699_v5 }
 0x133   :  { %6920 = vst [vmem:[#allocation51_spill] sm:$0xff] %v4925_v7  ;;  %2268 = vmax.xlane.f32.xlu2 %v2267_v12  ;;  %1403 = vmax.xlane.f32.xlu1 %v1402_v13 }
 0x134   :  { %154 = vst.msk [vmem:[#allocation4 + $0x28] sm:$0xff] %vm84_vm0, %v4698_v58  ;;  %4077 = vset.pattern.permute.xlu0 %v4699_v5  ;;  %v5123_v5 = vld [vmem:[#allocation2 + $0x18] sm:$0xff]  ;;  %v5141_v35 = vld [vmem:[#allocation4 + $0x10] sm:$0xff] }
 0x135   :  { %155 = vst.msk [vmem:[#allocation4 + $0x30] sm:$0xff] %vm84_vm0, %v4698_v58 }
 0x136   :  { %6935 = vst [vmem:[#allocation66_spill] sm:$0xff] %v5046_v46 }
 0x137   :  { %v4947_v23 = vpop.f32.mrf.mxu2  ;;  %v4953_v25 = vpop.f32.mrf.mxu0  ;;  %156 = vst.msk [vmem:[#allocation4 + $0x38] sm:$0xff] %vm84_vm0, %v4698_v58 }
 0x138   :  { %6921 = vst [vmem:[#allocation52_spill] sm:$0xff] %v4947_v23  ;;  %v4949_v24 = vpop.f32.mrf.mxu3  ;;  %v4955_v38 = vpop.f32.mrf.mxu1 }
 0x139   :  { %6922 = vst [vmem:[#allocation53_spill] sm:$0xff] %v4949_v24  ;;  %v2270_v39 = vmax.f32 %v4947_v23, %v4949_v24  ;;  %v1408_v57 = vmax.f32 %v4953_v25, %v4955_v38 }
 0x13a   :  { %6923 = vst [vmem:[#allocation54_spill] sm:$0xff] %v4953_v25 }
 0x13b   :  { %6924 = vst [vmem:[#allocation55_spill] sm:$0xff] %v4955_v38  ;;  %1406 = vmax.xlane.f32.xlu2 %v1405_v22  ;;  %2271 = vmax.xlane.f32.xlu0 %v2270_v39 }
 0x13c   :  { %157 = vst.msk [vmem:[#allocation4 + $0x40] sm:$0xff] %vm84_vm0, %v4698_v58 }
 0x13d   :  { %158 = vst.msk [vmem:[#allocation4 + $0x48] sm:$0xff] %vm84_vm0, %v4698_v58 }
 0x13e   :  { %159 = vst.msk [vmem:[#allocation4 + $0x50] sm:$0xff] %vm84_vm0, %v4698_v58 }
 0x13f   :  { %v4973_v40 = vpop.f32.mrf.mxu2  ;;  %v4985_v59 = vpop.f32.mrf.mxu0  ;;  %160 = vst.msk [vmem:[#allocation4 + $0x58] sm:$0xff] %vm84_vm0, %v4698_v58 }
 0x140   :  { %6925 = vst [vmem:[#allocation56_spill] sm:$0xff] %v4973_v40  ;;  %v4975_v41 = vpop.f32.mrf.mxu3  ;;  %v4987_v12 = vpop.f32.mrf.mxu1 }
 0x141   :  { %6926 = vst [vmem:[#allocation57_spill] sm:$0xff] %v4975_v41  ;;  %v2273_v42 = vmax.f32 %v4973_v40, %v4975_v41  ;;  %v1411_v13 = vmax.f32 %v4985_v59, %v4987_v12 }
 0x142   :  { %6927 = vst [vmem:[#allocation58_spill] sm:$0xff] %v4985_v59 }
 0x143   :  { %6928 = vst [vmem:[#allocation59_spill] sm:$0xff] %v4987_v12  ;;  %2274 = vmax.xlane.f32.xlu1 %v2273_v42  ;;  %1409 = vmax.xlane.f32.xlu0 %v1408_v57  ;;  %v5007_v42 = vld [vmem:[#allocation2] sm:$0xff] }
 0x144   :  { %161 = vst.msk [vmem:[#allocation4 + $0x60] sm:$0xff] %vm84_vm0, %v4698_v58 }
 0x145   :  { %162 = vst.msk [vmem:[#allocation4 + $0x68] sm:$0xff] %vm84_vm0, %v4698_v58 }
 0x146   :  { %v1371_v24 = vpop.xlane.xlu2 %1370  ;;  %163 = vst.msk [vmem:[#allocation4 + $0x70] sm:$0xff] %vm84_vm0, %v4698_v58 }
 0x147   :  { %v5003_v22 = vpop.f32.mrf.mxu2  ;;  %v5018_v23 = vmax.f32 %v5007_v42, %v1371_v24  ;;  %v5024_v30 = vpop.f32.mrf.mxu0  ;;  %164 = vst.msk [vmem:[#allocation4 + $0x78] sm:$0xff] %vm84_vm0, %v4698_v58 }
 0x148   :  { %6929 = vst [vmem:[#allocation60_spill] sm:$0xff] %v5003_v22  ;;  %v5005_v39 = vpop.f32.mrf.mxu3  ;;  %v5026_v47 = vpop.f32.mrf.mxu1 }
 0x149   :  { %6930 = vst [vmem:[#allocation61_spill] sm:$0xff] %v5005_v39  ;;  %v2276_v57 = vmax.f32 %v5003_v22, %v5005_v39  ;;  %v1414_v17 = vmax.f32 %v5024_v30, %v5026_v47  ;;  %v3854_v22 = vld [vmem:[#allocation7 + $0x50] sm:$0xff] }
 0x14a   :  { %6931 = vst [vmem:[#allocation62_spill] sm:$0xff] %v5024_v30  ;;  %v5063_v30 = vld [vmem:[#allocation4 + $0x8] sm:$0xff]  ;;  %783 = vmatmul.bf16.gmra.mxu0 %v3854_v22  ;;  %872 = vmatmul.bf16.gmra.mxu1 %v3854_v22 }
 0x14b   :  { %2277 = vmax.xlane.f32.xlu2 %v2276_v57  ;;  %1412 = vmax.xlane.f32.xlu1 %v1411_v13  ;;  %6932 = vst [vmem:[#allocation63_spill] sm:$0xff] %v5026_v47 }
 0x14c   :  { %2170 = vst.msk [vmem:[#allocation2] sm:$0xff] %vm84_vm0, %v5018_v23 }
 0x14d   :  { %6937 = vst [vmem:[#allocation68_spill] sm:$0xff] %v5063_v30 }
 0x14e   :  { %v2236_v24 = vpop.xlane.xlu0 %2235  ;;  %165 = vst.msk [vmem:[#allocation4 + $0x80] sm:$0xff] %vm84_vm0, %v4698_v58 }
 0x14f   :  { %v5040_v13 = vpop.f32.mrf.mxu2  ;;  %v5055_v54 = vmax.f32 %v5046_v46, %v2236_v24  ;;  %166 = vst.msk [vmem:[#allocation4 + $0x88] sm:$0xff] %vm84_vm0, %v4698_v58 }
 0x150   :  { %6933 = vst [vmem:[#allocation64_spill] sm:$0xff] %v5040_v13  ;;  %v5042_v57 = vpop.f32.mrf.mxu3  ;;  %v5069_v39 = vpop.f32.mrf.mxu1 }
 0x151   :  { %6934 = vst [vmem:[#allocation65_spill] sm:$0xff] %v5042_v57  ;;  %v2279_v16 = vmax.f32 %v5040_v13, %v5042_v57  ;;  %v5065_v57 = vld [vmem:[#allocation2 + $0x8] sm:$0xff]  ;;  %v5067_v13 = vpop.f32.mrf.mxu0 }
 0x152   :  { %6936 = vst [vmem:[#allocation67_spill] sm:$0xff] %v5055_v54  ;;  %v1417_v46 = vmax.f32 %v5067_v13, %v5069_v39 }
 0x153   :  { %1415 = vmax.xlane.f32.xlu2 %v1414_v17  ;;  %2280 = vmax.xlane.f32.xlu0 %v2279_v16  ;;  %6938 = vst [vmem:[#allocation69_spill] sm:$0xff] %v5067_v13 }
 0x154   :  { %6939 = vst [vmem:[#allocation70_spill] sm:$0xff] %v5069_v39 }
 0x155   :  { %167 = vst.msk [vmem:[#allocation4 + $0x90] sm:$0xff] %vm84_vm0, %v4698_v58 }
 0x156   :  { %v2239_v16 = vpop.xlane.xlu1 %2238  ;;  %v1374_v17 = vpop.xlane.xlu0 %1373  ;;  %168 = vst.msk [vmem:[#allocation4 + $0x98] sm:$0xff] %vm84_vm0, %v4698_v58 }
 0x157   :  { %v5078_v24 = vmax.f32 %v5063_v30, %v2239_v16  ;;  %v5081_v47 = vmax.f32 %v5065_v57, %v1374_v17  ;;  %169 = vst.msk [vmem:[#allocation4 + $0xa0] sm:$0xff] %vm84_vm0, %v4698_v58  ;;  %v3855_v17 = vld [vmem:[#allocation7 + $0x58] sm:$0xff]  ;;  %v5260_v40 = vpop.f32.mrf.mxu2 }
 0x158   :  { %170 = vst.msk [vmem:[#allocation4 + $0xa8] sm:$0xff] %vm84_vm0, %v4698_v58  ;;  %v5262_v7 = vpop.f32.mrf.mxu3  ;;  %v5294_v43 = vpop.f32.mrf.mxu1 }
 0x159   :  { %6940 = vst [vmem:[#allocation71_spill] sm:$0xff] %v5078_v24  ;;  %v5292_v44 = vpop.f32.mrf.mxu0 }
 0x15a   :  { %171 = vst.msk [vmem:[#allocation4 + $0xb0] sm:$0xff] %vm84_vm0, %v4698_v58  ;;  %788 = vmatmul.bf16.gmra.mxu0 %v3855_v17  ;;  %877 = vmatmul.bf16.gmra.mxu1 %v3855_v17  ;;  %v5163_v17 = vld [vmem:[#allocation2 + $0x20] sm:$0xff] }
 0x15b   :  { %1418 = vmax.xlane.f32.xlu0 %v1417_v46  ;;  %172 = vst.msk [vmem:[#allocation4 + $0xb8] sm:$0xff] %vm84_vm0, %v4698_v58 }
 0x15c   :  { %173 = vst.msk [vmem:[#allocation4 + $0xc0] sm:$0xff] %vm84_vm0, %v4698_v58 }
 0x15d   :  { %174 = vst.msk [vmem:[#allocation4 + $0xc8] sm:$0xff] %vm84_vm0, %v4698_v58 }
 0x15e   :  { %v2242_v22 = vpop.xlane.xlu2 %2241  ;;  %v1377_v16 = vpop.xlane.xlu1 %1376  ;;  %6941 = vst [vmem:[#allocation72_spill] sm:$0xff] %v5123_v5 }
 0x15f   :  { %v5108_v53 = vmax.f32 %v5099_v4, %v1377_v16  ;;  %v5125_v16 = vld [vmem:[#allocation4 + $0x18] sm:$0xff]  ;;  %175 = vst.msk [vmem:[#allocation4 + $0xd0] sm:$0xff] %vm84_vm0, %v4698_v58  ;;  %v5326_v25 = vpop.f32.mrf.mxu2 }
 0x160   :  { %6942 = vst [vmem:[#allocation73_spill] sm:$0xff] %v5125_v16 }
 0x161   :  { %176 = vst.msk [vmem:[#allocation4 + $0xd8] sm:$0xff] %vm84_vm0, %v4698_v58  ;;  %v5352_v63 = vpop.f32.mrf.mxu0  ;;  %v5354_v62 = vpop.f32.mrf.mxu1 }
 0x162   :  { %177 = vst.msk [vmem:[#allocation4 + $0xe0] sm:$0xff] %vm84_vm0, %v4698_v58 }
 0x163   :  { %178 = vst.msk [vmem:[#allocation4 + $0xe8] sm:$0xff] %vm84_vm0, %v4698_v58 }
 0x164   :  { %1659 = vperm.xlu1 %4075, %v5018_v23   ;;  %6945 = vst [vmem:[#allocation76_spill] sm:$0xff] %v5141_v35 }
 0x165   :  { %179 = vst.msk [vmem:[#allocation4 + $0xf0] sm:$0xff] %vm84_vm0, %v4698_v58 }
 0x166   :  { %v1380_v46 = vpop.xlane.xlu2 %1379  ;;  %v2245_v30 = vpop.xlane.xlu0 %2244  ;;  %180 = vst.msk [vmem:[#allocation4 + $0xf8] sm:$0xff] %vm84_vm0, %v4698_v58 }
 0x167   :  { %v5134_v15 = vmax.f32 %v5123_v5, %v1380_v46  ;;  %v5137_v14 = vmax.f32 %v5125_v16, %v2245_v30  ;;  %468 = vst.msk [vmem:[#allocation6 + $0xf8] sm:$0xff] %vm84_vm0, %v5022_v31  ;;  %v5154_v30 = vmax.f32 %v5141_v35, %v2242_v22  ;;  %v5159_v46 = vld [vmem:[#allocation4 + $0x20] sm:$0xff] }
 0x168   :  { %3034 = vst.msk [vmem:[#allocation4] sm:$0xff] %vm84_vm0, %v5055_v54 }
 0x169   :  { %6943 = vst [vmem:[#allocation74_spill] sm:$0xff] %v5134_v15 }
 0x16a   :  { %6944 = vst [vmem:[#allocation75_spill] sm:$0xff] %v5137_v14  ;;  %793 = vmatmul.bf16.gmra.mxu0 %v3856_v20  ;;  %882 = vmatmul.bf16.gmra.mxu1 %v3856_v20  ;;  %v1423_v20 = vmax.f32 %v5352_v63, %v5354_v62 }
 0x16b   :  { %6946 = vst [vmem:[#allocation77_spill] sm:$0xff] %v5154_v30  ;;  %2524 = vperm.xlu2 %4076, %v5055_v54  }
 0x16c   :  { %6947 = vst [vmem:[#allocation78_spill] sm:$0xff] %v5159_v46 }
 0x16d   :  { %3035 = vst.msk [vmem:[#allocation4 + $0x8] sm:$0xff] %vm84_vm0, %v5078_v24 }
 0x16e   :  { %6948 = vst [vmem:[#allocation79_spill] sm:$0xff] %v5163_v17  ;;  %v2248_v58 = vpop.xlane.xlu1 %2247  ;;  %v1383_v31 = vpop.xlane.xlu0 %1382 }
 0x16f   :  { %2171 = vst.msk [vmem:[#allocation2 + $0x8] sm:$0xff] %vm84_vm0, %v5081_v47  ;;  %v5170_v22 = vmax.f32 %v5159_v46, %v2248_v58  ;;  %2529 = vperm.xlu0 %4077, %v5078_v24   ;;  %v5176_v9 = vmax.f32 %v5163_v17, %v1383_v31  ;;  %v5187_v58 = vld [vmem:[#allocation4 + $0x28] sm:$0xff]  ;;  %v4700_v31 = vmov 0.0  }
 0x170   :  { %3036 = vst.msk [vmem:[#allocation4 + $0x10] sm:$0xff] %vm84_vm0, %v5154_v30 }
 0x171   :  { %6949 = vst [vmem:[#allocation80_spill] sm:$0xff] %v5170_v22 }
 0x172   :  { %2172 = vst.msk [vmem:[#allocation2 + $0x10] sm:$0xff] %vm84_vm0, %v5108_v53 }
 0x173   :  { %6950 = vst [vmem:[#allocation81_spill] sm:$0xff] %v5176_v9  ;;  %1664 = vperm.xlu2 %4076, %v5081_v47  }
 0x174   :  { %2173 = vst.msk [vmem:[#allocation2 + $0x18] sm:$0xff] %vm84_vm0, %v5134_v15 }
 0x175   :  { %3037 = vst.msk [vmem:[#allocation4 + $0x18] sm:$0xff] %vm84_vm0, %v5137_v14 }
 0x176   :  { %3038 = vst.msk [vmem:[#allocation4 + $0x20] sm:$0xff] %vm84_vm0, %v5170_v22  ;;  %v2251_v16 = vpop.xlane.xlu2 %2250  ;;  %v1386_v54 = vpop.xlane.xlu1 %1385 }
 0x177   :  { %2174 = vst.msk [vmem:[#allocation2 + $0x20] sm:$0xff] %vm84_vm0, %v5176_v9  ;;  %v5196_v35 = vmax.f32 %v5187_v58, %v2251_v16  ;;  %v5199_v46 = vmax.f32 %v5189_v34, %v1386_v54  ;;  %1669 = vperm.xlu0 %4077, %v5108_v53   ;;  %v5213_v54 = vld [vmem:[#allocation2 + $0x30] sm:$0xff] }
 0x178   :  { %6951 = vst [vmem:[#allocation82_spill] sm:$0xff] %v5187_v58  ;;  %v5215_v16 = vld [vmem:[#allocation4 + $0x30] sm:$0xff] }
 0x179   :  { %118 = vst.msk [vmem:[#allocation3 + $0x8] sm:$0xff] %vm84_vm0, %v4700_v31 }
 0x17a   :  { %117 = vst.msk [vmem:[#allocation3] sm:$0xff] %vm84_vm0, %v4700_v31  ;;  %798 = vmatmul.bf16.gmra.mxu0 %v3857_v36  ;;  %887 = vmatmul.bf16.gmra.mxu1 %v3857_v36 }
 0x17b   :  { %6952 = vst [vmem:[#allocation83_spill] sm:$0xff] %v5196_v35  ;;  %1674 = vperm.xlu2 %4076, %v5134_v15  }
 0x17c   :  { %119 = vst.msk [vmem:[#allocation3 + $0x10] sm:$0xff] %vm84_vm0, %v4700_v31 }
 0x17d   :  { %120 = vst.msk [vmem:[#allocation3 + $0x18] sm:$0xff] %vm84_vm0, %v4700_v31 }
 0x17e   :  { %3039 = vst.msk [vmem:[#allocation4 + $0x28] sm:$0xff] %vm84_vm0, %v5196_v35  ;;  %v1389_v58 = vpop.xlane.xlu2 %1388  ;;  %v2254_v24 = vpop.xlane.xlu0 %2253 }
 0x17f   :  { %2175 = vst.msk [vmem:[#allocation2 + $0x28] sm:$0xff] %vm84_vm0, %v5199_v46  ;;  %v5224_v8 = vmax.f32 %v5213_v54, %v1389_v58  ;;  %v5227_v39 = vmax.f32 %v5215_v16, %v2254_v24  ;;  %2539 = vperm.xlu0 %4077, %v5137_v14   ;;  %v5240_v58 = vld [vmem:[#allocation4 + $0x38] sm:$0xff] }
 0x180   :  { %121 = vst.msk [vmem:[#allocation3 + $0x20] sm:$0xff] %vm84_vm0, %v4700_v31  ;;  %v5242_v24 = vld [vmem:[#allocation2 + $0x38] sm:$0xff] }
 0x181   :  { %6953 = vst [vmem:[#allocation84_spill] sm:$0xff] %v5213_v54 }
 0x182   :  { %6954 = vst [vmem:[#allocation85_spill] sm:$0xff] %v5215_v16 }
 0x183   :  { %122 = vst.msk [vmem:[#allocation3 + $0x28] sm:$0xff] %vm84_vm0, %v4700_v31 }
 0x184   :  { %123 = vst.msk [vmem:[#allocation3 + $0x30] sm:$0xff] %vm84_vm0, %v4700_v31 }
 0x185   :  { %124 = vst.msk [vmem:[#allocation3 + $0x38] sm:$0xff] %vm84_vm0, %v4700_v31 }
 0x186   :  { %6955 = vst [vmem:[#allocation86_spill] sm:$0xff] %v5224_v8  ;;  %v2257_v16 = vpop.xlane.xlu1 %2256  ;;  %v1392_v14 = vpop.xlane.xlu0 %1391 }
 0x187   :  { %6956 = vst [vmem:[#allocation87_spill] sm:$0xff] %v5227_v39  ;;  %v5251_v13 = vmax.f32 %v5240_v58, %v2257_v16  ;;  %v5254_v41 = vmax.f32 %v5242_v24, %v1392_v14  ;;  %v2282_v14 = vmax.f32 %v5260_v40, %v5262_v7  ;;  %v5272_v16 = vld [vmem:[#allocation4 + $0x40] sm:$0xff] }
 0x188   :  { %125 = vst.msk [vmem:[#allocation3 + $0x40] sm:$0xff] %vm84_vm0, %v4700_v31 }
 0x189   :  { %126 = vst.msk [vmem:[#allocation3 + $0x48] sm:$0xff] %vm84_vm0, %v4700_v31 }
 0x18a   :  { %2176 = vst.msk [vmem:[#allocation2 + $0x30] sm:$0xff] %vm84_vm0, %v5224_v8 }
 0x18b   :  { %3040 = vst.msk [vmem:[#allocation4 + $0x30] sm:$0xff] %vm84_vm0, %v5227_v39 }
 0x18c   :  { %127 = vst.msk [vmem:[#allocation3 + $0x50] sm:$0xff] %vm84_vm0, %v4700_v31 }
 0x18d   :  { %6957 = vst [vmem:[#allocation88_spill] sm:$0xff] %v5240_v58  ;;  %v5274_v58 = vld [vmem:[#allocation2 + $0x40] sm:$0xff] }
 0x18e   :  { %6958 = vst [vmem:[#allocation89_spill] sm:$0xff] %v5242_v24  ;;  %v2260_v6 = vpop.xlane.xlu2 %2259  ;;  %v1395_v54 = vpop.xlane.xlu1 %1394  ;;  %2283 = vmax.xlane.f32.xlu1 %v2282_v14  ;;  %v3887_v14 = vld [vmem:[#allocation9 + $0x58] sm:$0xff] }
 0x18f   :  { %128 = vst.msk [vmem:[#allocation3 + $0x58] sm:$0xff] %vm84_vm0, %v4700_v31  ;;  %1222 = vmatmul.bf16.gmra.mxu2 %v3887_v14  ;;  %1311 = vmatmul.bf16.gmra.mxu3 %v3887_v14 }
 0x190   :  { %129 = vst.msk [vmem:[#allocation3 + $0x60] sm:$0xff] %vm84_vm0, %v4700_v31 }
 0x191   :  { %130 = vst.msk [vmem:[#allocation3 + $0x68] sm:$0xff] %vm84_vm0, %v4700_v31 }
 0x192   :  { %6959 = vst [vmem:[#allocation90_spill] sm:$0xff] %v5251_v13 }
 0x193   :  { %6960 = vst [vmem:[#allocation91_spill] sm:$0xff] %v5254_v41 }
 0x194   :  { %131 = vst.msk [vmem:[#allocation3 + $0x70] sm:$0xff] %vm84_vm0, %v4700_v31 }
 0x195   :  { %132 = vst.msk [vmem:[#allocation3 + $0x78] sm:$0xff] %vm84_vm0, %v4700_v31 }
 0x196   :  { %6961 = vst [vmem:[#allocation92_spill] sm:$0xff] %v5260_v40  ;;  %v5286_v40 = vmax.f32 %v5274_v58, %v1395_v54  ;;  %v5304_v54 = vld [vmem:[#allocation4 + $0x48] sm:$0xff]  ;;  %v1398_v61 = vpop.xlane.xlu2 %1397  ;;  %v2263_v60 = vpop.xlane.xlu0 %2262 }
 0x197   :  { %6962 = vst [vmem:[#allocation93_spill] sm:$0xff] %v5262_v7  ;;  %v5283_v7 = vmax.f32 %v5272_v16, %v2260_v6  ;;  %v5302_v6 = vld [vmem:[#allocation2 + $0x48] sm:$0xff]  ;;  %v5318_v38 = vmax.f32 %v5304_v54, %v2263_v60  ;;  %v5334_v60 = vld [vmem:[#allocation4 + $0x50] sm:$0xff] }
 0x198   :  { %3041 = vst.msk [vmem:[#allocation4 + $0x38] sm:$0xff] %vm84_vm0, %v5251_v13  ;;  %v5315_v14 = vmax.f32 %v5302_v6, %v1398_v61  ;;  %v5336_v61 = vld [vmem:[#allocation2 + $0x50] sm:$0xff] }
 0x199   :  { %2177 = vst.msk [vmem:[#allocation2 + $0x38] sm:$0xff] %vm84_vm0, %v5254_v41 }
 0x19a   :  { %133 = vst.msk [vmem:[#allocation3 + $0x80] sm:$0xff] %vm84_vm0, %v4700_v31 }
 0x19b   :  { %6963 = vst [vmem:[#allocation94_spill] sm:$0xff] %v5272_v16  ;;  %v1420_v16 = vmax.f32 %v5292_v44, %v5294_v43 }
 0x19c   :  { %6964 = vst [vmem:[#allocation95_spill] sm:$0xff] %v5274_v58 }
 0x19d   :  { %134 = vst.msk [vmem:[#allocation3 + $0x88] sm:$0xff] %vm84_vm0, %v4700_v31  ;;  %1421 = vmax.xlane.f32.xlu1 %v1420_v16  ;;  %v5328_v16 = vpop.f32.mrf.mxu3 }
 0x19e   :  { %135 = vst.msk [vmem:[#allocation3 + $0x90] sm:$0xff] %vm84_vm0, %v4700_v31 }
 0x19f   :  { %136 = vst.msk [vmem:[#allocation3 + $0x98] sm:$0xff] %vm84_vm0, %v4700_v31  ;;  %1227 = vmatmul.bf16.gmra.mxu2 %v3888_v21  ;;  %1316 = vmatmul.bf16.gmra.mxu3 %v3888_v21 }
 0x1a0   :  { %6965 = vst [vmem:[#allocation96_spill] sm:$0xff] %v5283_v7 }
 0x1a1   :  { %6966 = vst [vmem:[#allocation97_spill] sm:$0xff] %v5286_v40 }
 0x1a2   :  { %137 = vst.msk [vmem:[#allocation3 + $0xa0] sm:$0xff] %vm84_vm0, %v4700_v31 }
 0x1a3   :  { %138 = vst.msk [vmem:[#allocation3 + $0xa8] sm:$0xff] %vm84_vm0, %v4700_v31 }
 0x1a4   :  { %6967 = vst [vmem:[#allocation98_spill] sm:$0xff] %v5292_v44 }
 0x1a5   :  { %6968 = vst [vmem:[#allocation99_spill] sm:$0xff] %v5294_v43  ;;  %v5372_v43 = vld [vmem:[#allocation2 + $0x58] sm:$0xff] }
 0x1a6   :  { %3042 = vst.msk [vmem:[#allocation4 + $0x40] sm:$0xff] %vm84_vm0, %v5283_v7  ;;  %v2269_v21 = vpop.xlane.xlu2 %2268 }
 0x1a7   :  { %2178 = vst.msk [vmem:[#allocation2 + $0x40] sm:$0xff] %vm84_vm0, %v5286_v40 }
 0x1a8   :  { %139 = vst.msk [vmem:[#allocation3 + $0xb0] sm:$0xff] %vm84_vm0, %v4700_v31 }
 0x1a9   :  { %6969 = vst [vmem:[#allocation100_spill] sm:$0xff] %v5302_v6  ;;  %v1401_v6 = vpop.xlane.xlu0 %1400 }
 0x1aa   :  { %6970 = vst [vmem:[#allocation101_spill] sm:$0xff] %v5304_v54  ;;  %v2266_v54 = vpop.xlane.xlu1 %2265  ;;  %v5348_v26 = vmax.f32 %v5336_v61, %v1401_v6  ;;  %v2285_v6 = vmax.f32 %v5326_v25, %v5328_v16 }
 0x1ab   :  { %140 = vst.msk [vmem:[#allocation3 + $0xb8] sm:$0xff] %vm84_vm0, %v4700_v31  ;;  %v5345_v27 = vmax.f32 %v5334_v60, %v2266_v54  ;;  %v5364_v54 = vpop.f32.mrf.mxu2 }
 0x1ac   :  { %141 = vst.msk [vmem:[#allocation3 + $0xc0] sm:$0xff] %vm84_vm0, %v4700_v31  ;;  %2286 = vmax.xlane.f32.xlu2 %v2285_v6 }
 0x1ad   :  { %142 = vst.msk [vmem:[#allocation3 + $0xc8] sm:$0xff] %vm84_vm0, %v4700_v31 }
 0x1ae   :  { %6971 = vst [vmem:[#allocation102_spill] sm:$0xff] %v5315_v14 }
 0x1af   :  { %6972 = vst [vmem:[#allocation103_spill] sm:$0xff] %v5318_v38 }
 0x1b0   :  { %143 = vst.msk [vmem:[#allocation3 + $0xd0] sm:$0xff] %vm84_vm0, %v4700_v31 }
 0x1b1   :  { %144 = vst.msk [vmem:[#allocation3 + $0xd8] sm:$0xff] %vm84_vm0, %v4700_v31 }
 0x1b2   :  { %2179 = vst.msk [vmem:[#allocation2 + $0x48] sm:$0xff] %vm84_vm0, %v5315_v14 }
 0x1b3   :  { %6973 = vst [vmem:[#allocation104_spill] sm:$0xff] %v5326_v25  ;;  %v1404_v25 = vpop.xlane.xlu1 %1403 }
 0x1b4   :  { %6974 = vst [vmem:[#allocation105_spill] sm:$0xff] %v5328_v16  ;;  %v5386_v44 = vmax.f32 %v5372_v43, %v1404_v25  ;;  %v5400_v25 = vpop.f32.mrf.mxu1  ;;  %1424 = vmax.xlane.f32.xlu2 %v1423_v20 }
 0x1b5   :  { %3043 = vst.msk [vmem:[#allocation4 + $0x48] sm:$0xff] %vm84_vm0, %v5318_v38 }
 0x1b6   :  { %145 = vst.msk [vmem:[#allocation3 + $0xe0] sm:$0xff] %vm84_vm0, %v4700_v31  ;;  %2534 = vperm.xlu1 %4075, %v5154_v30  }
 0x1b7   :  { %6975 = vst [vmem:[#allocation106_spill] sm:$0xff] %v5334_v60  ;;  %v5366_v60 = vpop.f32.mrf.mxu3 }
 0x1b8   :  { %6976 = vst [vmem:[#allocation107_spill] sm:$0xff] %v5336_v61  ;;  %v5370_v61 = vld [vmem:[#allocation4 + $0x58] sm:$0xff]  ;;  %v2288_v16 = vmax.f32 %v5364_v54, %v5366_v60 }
 0x1b9   :  { %146 = vst.msk [vmem:[#allocation3 + $0xe8] sm:$0xff] %vm84_vm0, %v4700_v31  ;;  %v5383_v6 = vmax.f32 %v5370_v61, %v2269_v21  ;;  %v5398_v21 = vpop.f32.mrf.mxu0 }
 0x1ba   :  { %147 = vst.msk [vmem:[#allocation3 + $0xf0] sm:$0xff] %vm84_vm0, %v4700_v31  ;;  %2289 = vmax.xlane.f32.xlu0 %v2288_v16  ;;  %v1426_v16 = vmax.f32 %v5398_v21, %v5400_v25 }
 0x1bb   :  { %148 = vst.msk [vmem:[#allocation3 + $0xf8] sm:$0xff] %vm84_vm0, %v4700_v31 }
 0x1bc   :  { %6977 = vst [vmem:[#allocation108_spill] sm:$0xff] %v5345_v27 }
 0x1bd   :  { %6978 = vst [vmem:[#allocation109_spill] sm:$0xff] %v5348_v26 }
 0x1be   :  { %181 = vst.msk [vmem:[#allocation5] sm:$0xff] %vm84_vm0, %v4700_v31  ;;  %1679 = vperm.xlu1 %4075, %v5176_v9  }
 0x1bf   :  { %6979 = vst [vmem:[#allocation110_spill] sm:$0xff] %v5352_v63 }
 0x1c0   :  { %6980 = vst [vmem:[#allocation111_spill] sm:$0xff] %v5354_v62  ;;  %v2272_v62 = vpop.xlane.xlu0 %2271 }
 0x1c1   :  { %182 = vst.msk [vmem:[#allocation5 + $0x8] sm:$0xff] %vm84_vm0, %v4700_v31 }
 0x1c2   :  { %3044 = vst.msk [vmem:[#allocation4 + $0x50] sm:$0xff] %vm84_vm0, %v5345_v27  ;;  %1427 = vmax.xlane.f32.xlu0 %v1426_v16 }
 0x1c3   :  { %2180 = vst.msk [vmem:[#allocation2 + $0x50] sm:$0xff] %vm84_vm0, %v5348_v26 }
 0x1c4   :  { %6981 = vst [vmem:[#allocation112_spill] sm:$0xff] %v5364_v54  ;;  %v1407_v54 = vpop.xlane.xlu2 %1406 }
 0x1c5   :  { %6982 = vst [vmem:[#allocation113_spill] sm:$0xff] %v5366_v60  ;;  %v5406_v60 = vld [vmem:[#allocation4 + $0x60] sm:$0xff] }
 0x1c6   :  { %183 = vst.msk [vmem:[#allocation5 + $0x10] sm:$0xff] %vm84_vm0, %v4700_v31  ;;  %v5420_v63 = vmax.f32 %v5406_v60, %v2272_v62  ;;  %v5433_v62 = vld [vmem:[#allocation4 + $0x68] sm:$0xff] }
 0x1c7   :  { %6983 = vst [vmem:[#allocation114_spill] sm:$0xff] %v5370_v61  ;;  %v5404_v61 = vld [vmem:[#allocation2 + $0x60] sm:$0xff]  ;;  %v5526_v15 = vpop.f32.mrf.mxu1 }
 0x1c8   :  { %6984 = vst [vmem:[#allocation115_spill] sm:$0xff] %v5372_v43  ;;  %v5417_v20 = vmax.f32 %v5404_v61, %v1407_v54  ;;  %v5435_v54 = vld [vmem:[#allocation2 + $0x68] sm:$0xff]  ;;  %v1410_v30 = vpop.xlane.xlu0 %1409  ;;  %v5524_v43 = vpop.f32.mrf.mxu0 }
 0x1c9   :  { %184 = vst.msk [vmem:[#allocation5 + $0x18] sm:$0xff] %vm84_vm0, %v4700_v31 }
 0x1ca   :  { %185 = vst.msk [vmem:[#allocation5 + $0x20] sm:$0xff] %vm84_vm0, %v4700_v31 }
 0x1cb   :  { %186 = vst.msk [vmem:[#allocation5 + $0x28] sm:$0xff] %vm84_vm0, %v4700_v31 }
 0x1cc   :  { %6985 = vst [vmem:[#allocation116_spill] sm:$0xff] %v5383_v6  ;;  %2544 = vperm.xlu2 %4076, %v5170_v22  }
 0x1cd   :  { %6986 = vst [vmem:[#allocation117_spill] sm:$0xff] %v5386_v44 }
 0x1ce   :  { %187 = vst.msk [vmem:[#allocation5 + $0x30] sm:$0xff] %vm84_vm0, %v4700_v31 }
 0x1cf   :  { %188 = vst.msk [vmem:[#allocation5 + $0x38] sm:$0xff] %vm84_vm0, %v4700_v31  ;;  %v5538_v12 = vpop.f32.mrf.mxu1 }
 0x1d0   :  { %3045 = vst.msk [vmem:[#allocation4 + $0x58] sm:$0xff] %vm84_vm0, %v5383_v6  ;;  %v5536_v32 = vpop.f32.mrf.mxu0 }
 0x1d1   :  { %2181 = vst.msk [vmem:[#allocation2 + $0x58] sm:$0xff] %vm84_vm0, %v5386_v44  ;;  %v1432_v36 = vmax.f32 %v5536_v32, %v5538_v12 }
 0x1d2   :  { %6987 = vst [vmem:[#allocation118_spill] sm:$0xff] %v5398_v21 }
 0x1d3   :  { %6988 = vst [vmem:[#allocation119_spill] sm:$0xff] %v5400_v25 }
 0x1d4   :  { %189 = vst.msk [vmem:[#allocation5 + $0x40] sm:$0xff] %vm84_vm0, %v4700_v31  ;;  %1684 = vperm.xlu2 %4076, %v5199_v46  }
 0x1d5   :  { %6989 = vst [vmem:[#allocation120_spill] sm:$0xff] %v5404_v61  ;;  %v5447_v61 = vmax.f32 %v5435_v54, %v1410_v30  ;;  %v5462_v30 = vld [vmem:[#allocation2 + $0x70] sm:$0xff] }
 0x1d6   :  { %6990 = vst [vmem:[#allocation121_spill] sm:$0xff] %v5406_v60  ;;  %v2275_v60 = vpop.xlane.xlu1 %2274  ;;  %2554 = vperm.xlu0 %4077, %v5227_v39   ;;  %v5513_v39 = vld [vmem:[#allocation2 + $0x80] sm:$0xff] }
 0x1d7   :  { %190 = vst.msk [vmem:[#allocation5 + $0x48] sm:$0xff] %vm84_vm0, %v4700_v31  ;;  %v5444_v16 = vmax.f32 %v5433_v62, %v2275_v60  ;;  %v5460_v60 = vld [vmem:[#allocation4 + $0x70] sm:$0xff] }
 0x1d8   :  { %191 = vst.msk [vmem:[#allocation5 + $0x50] sm:$0xff] %vm84_vm0, %v4700_v31 }
 0x1d9   :  { %192 = vst.msk [vmem:[#allocation5 + $0x58] sm:$0xff] %vm84_vm0, %v4700_v31 }
 0x1da   :  { %6991 = vst [vmem:[#allocation122_spill] sm:$0xff] %v5417_v20 }
 0x1db   :  { %6992 = vst [vmem:[#allocation123_spill] sm:$0xff] %v5420_v63 }
 0x1dc   :  { %193 = vst.msk [vmem:[#allocation5 + $0x60] sm:$0xff] %vm84_vm0, %v4700_v31 }
 0x1dd   :  { %194 = vst.msk [vmem:[#allocation5 + $0x68] sm:$0xff] %vm84_vm0, %v4700_v31 }
 0x1de   :  { %2182 = vst.msk [vmem:[#allocation2 + $0x60] sm:$0xff] %vm84_vm0, %v5417_v20 }
 0x1df   :  { %3046 = vst.msk [vmem:[#allocation4 + $0x60] sm:$0xff] %vm84_vm0, %v5420_v63 }
 0x1e0   :  { %195 = vst.msk [vmem:[#allocation5 + $0x70] sm:$0xff] %vm84_vm0, %v4700_v31 }
 0x1e1   :  { %6993 = vst [vmem:[#allocation124_spill] sm:$0xff] %v5433_v62  ;;  %v2278_v62 = vpop.xlane.xlu2 %2277 }
 0x1e2   :  { %6994 = vst [vmem:[#allocation125_spill] sm:$0xff] %v5435_v54  ;;  %v1413_v54 = vpop.xlane.xlu1 %1412  ;;  %v5471_v25 = vmax.f32 %v5460_v60, %v2278_v62  ;;  %v5487_v62 = vld [vmem:[#allocation2 + $0x78] sm:$0xff] }
 0x1e3   :  { %196 = vst.msk [vmem:[#allocation5 + $0x78] sm:$0xff] %vm84_vm0, %v4700_v31  ;;  %v5474_v21 = vmax.f32 %v5462_v30, %v1413_v54  ;;  %v5489_v54 = vld [vmem:[#allocation4 + $0x78] sm:$0xff] }
 0x1e4   :  { %197 = vst.msk [vmem:[#allocation5 + $0x80] sm:$0xff] %vm84_vm0, %v4700_v31 }
 0x1e5   :  { %198 = vst.msk [vmem:[#allocation5 + $0x88] sm:$0xff] %vm84_vm0, %v4700_v31 }
 0x1e6   :  { %6995 = vst [vmem:[#allocation126_spill] sm:$0xff] %v5444_v16 }
 0x1e7   :  { %6996 = vst [vmem:[#allocation127_spill] sm:$0xff] %v5447_v61 }
 0x1e8   :  { %199 = vst.msk [vmem:[#allocation5 + $0x90] sm:$0xff] %vm84_vm0, %v4700_v31 }
 0x1e9   :  { %200 = vst.msk [vmem:[#allocation5 + $0x98] sm:$0xff] %vm84_vm0, %v4700_v31 }
 0x1ea   :  { %3047 = vst.msk [vmem:[#allocation4 + $0x68] sm:$0xff] %vm84_vm0, %v5444_v16 }
 0x1eb   :  { %2183 = vst.msk [vmem:[#allocation2 + $0x68] sm:$0xff] %vm84_vm0, %v5447_v61 }
 0x1ec   :  { %201 = vst.msk [vmem:[#allocation5 + $0xa0] sm:$0xff] %vm84_vm0, %v4700_v31 }
 0x1ed   :  { %6997 = vst [vmem:[#allocation128_spill] sm:$0xff] %v5460_v60  ;;  %v1416_v60 = vpop.xlane.xlu2 %1415 }
 0x1ee   :  { %6998 = vst [vmem:[#allocation129_spill] sm:$0xff] %v5462_v30  ;;  %v2281_v30 = vpop.xlane.xlu0 %2280  ;;  %v5499_v24 = vmax.f32 %v5487_v62, %v1416_v60 }
 0x1ef   :  { %202 = vst.msk [vmem:[#allocation5 + $0xa8] sm:$0xff] %vm84_vm0, %v4700_v31  ;;  %v5502_v22 = vmax.f32 %v5489_v54, %v2281_v30 }
 0x1f0   :  { %203 = vst.msk [vmem:[#allocation5 + $0xb0] sm:$0xff] %vm84_vm0, %v4700_v31 }
 0x1f1   :  { %204 = vst.msk [vmem:[#allocation5 + $0xb8] sm:$0xff] %vm84_vm0, %v4700_v31 }
 0x1f2   :  { %6999 = vst [vmem:[#allocation130_spill] sm:$0xff] %v5471_v25 }
 0x1f3   :  { %7000 = vst [vmem:[#allocation131_spill] sm:$0xff] %v5474_v21 }
 0x1f4   :  { %205 = vst.msk [vmem:[#allocation5 + $0xc0] sm:$0xff] %vm84_vm0, %v4700_v31 }
 0x1f5   :  { %206 = vst.msk [vmem:[#allocation5 + $0xc8] sm:$0xff] %vm84_vm0, %v4700_v31 }
 0x1f6   :  { %3048 = vst.msk [vmem:[#allocation4 + $0x70] sm:$0xff] %vm84_vm0, %v5471_v25  ;;  %v1419_v60 = vpop.xlane.xlu0 %1418 }
 0x1f7   :  { %2184 = vst.msk [vmem:[#allocation2 + $0x70] sm:$0xff] %vm84_vm0, %v5474_v21  ;;  %v5516_v30 = vmax.f32 %v5513_v39, %v1419_v60 }
 0x1f8   :  { %207 = vst.msk [vmem:[#allocation5 + $0xd0] sm:$0xff] %vm84_vm0, %v4700_v31 }
 0x1f9   :  { %7001 = vst [vmem:[#allocation132_spill] sm:$0xff] %v5487_v62  ;;  %v3889_v62 = vld [vmem:[#allocation9 + $0x68] sm:$0xff] }
 0x1fa   :  { %7002 = vst [vmem:[#allocation133_spill] sm:$0xff] %v5489_v54  ;;  %v5520_v54 = vpop.f32.mrf.mxu2  ;;  %1232 = vmatmul.bf16.gmra.mxu2 %v3889_v62  ;;  %1321 = vmatmul.bf16.gmra.mxu3 %v3889_v62 }
 0x1fb   :  { %208 = vst.msk [vmem:[#allocation5 + $0xd8] sm:$0xff] %vm84_vm0, %v4700_v31 }
 0x1fc   :  { %209 = vst.msk [vmem:[#allocation5 + $0xe0] sm:$0xff] %vm84_vm0, %v4700_v31 }
 0x1fd   :  { %210 = vst.msk [vmem:[#allocation5 + $0xe8] sm:$0xff] %vm84_vm0, %v4700_v31 }
 0x1fe   :  { %7003 = vst [vmem:[#allocation134_spill] sm:$0xff] %v5499_v24 }
 0x1ff   :  { %7004 = vst [vmem:[#allocation135_spill] sm:$0xff] %v5502_v22 }
 0x200   :  { %211 = vst.msk [vmem:[#allocation5 + $0xf0] sm:$0xff] %vm84_vm0, %v4700_v31 }
 0x201   :  { %212 = vst.msk [vmem:[#allocation5 + $0xf8] sm:$0xff] %vm84_vm0, %v4700_v31  ;;  %v5522_v31 = vpop.f32.mrf.mxu3 }
 0x202   :  { %2185 = vst.msk [vmem:[#allocation2 + $0x78] sm:$0xff] %vm84_vm0, %v5499_v24  ;;  %v5528_v5 = vpop.f32.mrf.mxu2  ;;  %v2291_v60 = vmax.f32 %v5520_v54, %v5522_v31 }
 0x203   :  { %3049 = vst.msk [vmem:[#allocation4 + $0x78] sm:$0xff] %vm84_vm0, %v5502_v22 }
 0x204   :  { %7005 = vst [vmem:[#allocation136_spill] sm:$0xff] %v5513_v39  ;;  %2292 = vmax.xlane.f32.xlu1 %v2291_v60  ;;  %v1429_v39 = vmax.f32 %v5524_v43, %v5526_v15  ;;  %v5546_v60 = vpop.f32.mrf.mxu0 }
 0x205   :  { %2186 = vst.msk [vmem:[#allocation2 + $0x80] sm:$0xff] %vm84_vm0, %v5516_v30 }
 0x206   :  { %7006 = vst [vmem:[#allocation137_spill] sm:$0xff] %v5520_v54 }
 0x207   :  { %7007 = vst [vmem:[#allocation138_spill] sm:$0xff] %v5522_v31  ;;  %v5548_v31 = vpop.f32.mrf.mxu1 }
 0x208   :  { %7008 = vst [vmem:[#allocation139_spill] sm:$0xff] %v5524_v43  ;;  %v3858_v43 = vld [vmem:[#allocation7 + $0x70] sm:$0xff] }
 0x209   :  { %7009 = vst [vmem:[#allocation140_spill] sm:$0xff] %v5526_v15  ;;  %v5530_v33 = vpop.f32.mrf.mxu3  ;;  %v1435_v15 = vmax.f32 %v5546_v60, %v5548_v31  ;;  %803 = vmatmul.bf16.gmra.mxu0 %v3858_v43  ;;  %892 = vmatmul.bf16.gmra.mxu1 %v3858_v43 }
 0x20a   :  { %7010 = vst [vmem:[#allocation141_spill] sm:$0xff] %v5528_v5  ;;  %v5540_v62 = vpop.f32.mrf.mxu2  ;;  %v2294_v54 = vmax.f32 %v5528_v5, %v5530_v33 }
 0x20b   :  { %7011 = vst [vmem:[#allocation142_spill] sm:$0xff] %v5530_v33 }
 0x20c   :  { %7012 = vst [vmem:[#allocation143_spill] sm:$0xff] %v5536_v32  ;;  %1430 = vmax.xlane.f32.xlu1 %v1429_v39  ;;  %2295 = vmax.xlane.f32.xlu2 %v2294_v54  ;;  %v5554_v39 = vpop.permute.xlu1 %1659  ;;  %v5572_v54 = vld [vmem:[#allocation2 + $0x88] sm:$0xff] }
 0x20d   :  { %7013 = vst [vmem:[#allocation144_spill] sm:$0xff] %v5538_v12 }
 0x20e   :  { %7014 = vst [vmem:[#allocation145_spill] sm:$0xff] %v5540_v62 }
 0x20f   :  { %7016 = vst [vmem:[#allocation147_spill] sm:$0xff] %v5546_v60  ;;  %v5600_v60 = vld [vmem:[#allocation2 + $0x90] sm:$0xff] }
 0x210   :  { %7017 = vst [vmem:[#allocation148_spill] sm:$0xff] %v5548_v31 }
 0x211   :  { %v5542_v59 = vpop.f32.mrf.mxu3  ;;  %7021 = vst [vmem:[#allocation152_spill] sm:$0xff] %v5572_v54 }
 0x212   :  { %7015 = vst [vmem:[#allocation146_spill] sm:$0xff] %v5542_v59  ;;  %v2297_v37 = vmax.f32 %v5540_v62, %v5542_v59  ;;  %v5556_v59 = vpop.permute.xlu2 %2524  ;;  %v5562_v62 = vpop.permute.xlu0 %2529 }
 0x213   :  { %7018 = vst [vmem:[#allocation149_spill] sm:$0xff] %v5556_v59  ;;  %v5597_v59 = vld [vmem:[#allocation4 + $0x90] sm:$0xff] }
 0x214   :  { %2298 = vmax.xlane.f32.xlu0 %v2297_v37  ;;  %1433 = vmax.xlane.f32.xlu2 %v1432_v36  ;;  %v5560_v37 = vld [vmem:[#allocation4 + $0x80] sm:$0xff]  ;;  %7020 = vst [vmem:[#allocation151_spill] sm:$0xff] %v5562_v62  ;;  %v2284_v33 = vpop.xlane.xlu1 %2283  ;;  %v3891_v62 = vld [vmem:[#allocation9 + $0x78] sm:$0xff] }
 0x215   :  { %7019 = vst [vmem:[#allocation150_spill] sm:$0xff] %v5560_v37  ;;  %v5565_v5 = vmax.f32 %v5560_v37, %v2284_v33  ;;  %v5590_v37 = vld [vmem:[#allocation4 + $0x88] sm:$0xff] }
 0x216   :  { %7023 = vst [vmem:[#allocation154_spill] sm:$0xff] %v5590_v37 }
 0x217   :  { %3050 = vst.msk [vmem:[#allocation4 + $0x80] sm:$0xff] %vm84_vm0, %v5565_v5 }
 0x218   :  { %7025 = vst [vmem:[#allocation156_spill] sm:$0xff] %v5597_v59 }
 0x219   :  { %7026 = vst [vmem:[#allocation157_spill] sm:$0xff] %v5600_v60 }
 0x21a   :  { %v5574_v12 = vpop.permute.xlu0 %1669 }
 0x21c   :  { %1436 = vmax.xlane.f32.xlu0 %v1435_v15  ;;  %v5570_v15 = vpop.permute.xlu2 %1664  ;;  %v1422_v36 = vpop.xlane.xlu1 %1421 }
 0x21d   :  { %v5577_v43 = vmax.f32 %v5572_v54, %v1422_v36  ;;  %v5616_v54 = vld [vmem:[#allocation2 + $0x98] sm:$0xff] }
 0x21e   :  { %7031 = vst [vmem:[#allocation162_spill] sm:$0xff] %v5616_v54 }
 0x21f   :  { %2187 = vst.msk [vmem:[#allocation2 + $0x88] sm:$0xff] %vm84_vm0, %v5577_v43 }
 0x224   :  { %v5583_v33 = vpop.permute.xlu2 %1674 }
 0x225   :  { %2549 = vperm.xlu1 %4075, %v5196_v35   ;;  %v5587_v35 = vpop.permute.xlu0 %2539 }
 0x226   :  { %7022 = vst [vmem:[#allocation153_spill] sm:$0xff] %v5587_v35  ;;  %v3890_v35 = vld [vmem:[#allocation9 + $0x70] sm:$0xff] }
 0x227   :  { %1237 = vmatmul.bf16.gmra.mxu2 %v3890_v35  ;;  %1326 = vmatmul.bf16.gmra.mxu3 %v3890_v35  ;;  %v5623_v35 = vpop.f32.mrf.mxu0 }
 0x228   :  { %7032 = vst [vmem:[#allocation163_spill] sm:$0xff] %v5623_v35  ;;  %v5649_v52 = vpop.permute.xlu1 %2534 }
 0x229   :  { %7042 = vst [vmem:[#allocation173_spill] sm:$0xff] %v5649_v52 }
 0x22c   :  { %1694 = vperm.xlu2 %4076, %v5254_v41   ;;  %v2287_v36 = vpop.xlane.xlu2 %2286 }
 0x22d   :  { %1689 = vperm.xlu1 %4075, %v5224_v8   ;;  %v5593_v32 = vmax.f32 %v5590_v37, %v2287_v36  ;;  %v2290_v31 = vpop.xlane.xlu0 %2289  ;;  %v5612_v37 = vpop.f32.mrf.mxu2 }
 0x22e   :  { %7029 = vst [vmem:[#allocation160_spill] sm:$0xff] %v5612_v37 }
 0x22f   :  { %7024 = vst [vmem:[#allocation155_spill] sm:$0xff] %v5593_v32  ;;  %v5631_v41 = vpop.f32.mrf.mxu0 }
 0x230   :  { %1704 = vperm.xlu0 %4077, %v5315_v14   ;;  %3051 = vst.msk [vmem:[#allocation4 + $0x88] sm:$0xff] %vm84_vm0, %v5593_v32 }
 0x231   :  { %7036 = vst [vmem:[#allocation167_spill] sm:$0xff] %v5631_v41 }
 0x234   :  { %2559 = vperm.xlu2 %4076, %v5251_v13   ;;  %v1425_v14 = vpop.xlane.xlu2 %1424  ;;  %v5614_v13 = vpop.f32.mrf.mxu3 }
 0x235   :  { %1699 = vperm.xlu1 %4075, %v5286_v40   ;;  %v5608_v36 = vmax.f32 %v5600_v60, %v1425_v14  ;;  %7030 = vst [vmem:[#allocation161_spill] sm:$0xff] %v5614_v13  ;;  %v5625_v14 = vpop.f32.mrf.mxu1  ;;  %v5627_v60 = vpop.f32.mrf.mxu2  ;;  %v2300_v9 = vmax.f32 %v5612_v37, %v5614_v13 }
 0x236   :  { %7033 = vst [vmem:[#allocation164_spill] sm:$0xff] %v5625_v14  ;;  %v1438_v13 = vmax.f32 %v5623_v35, %v5625_v14 }
 0x237   :  { %7028 = vst [vmem:[#allocation159_spill] sm:$0xff] %v5608_v36  ;;  %1242 = vmatmul.bf16.gmra.mxu2 %v3891_v62  ;;  %1331 = vmatmul.bf16.gmra.mxu3 %v3891_v62  ;;  %v5643_v40 = vpop.f32.mrf.mxu0  ;;  %v3859_v62 = vld [vmem:[#allocation7 + $0x78] sm:$0xff] }
 0x238   :  { %2569 = vperm.xlu0 %4077, %v5318_v38   ;;  %v5603_v38 = vmax.f32 %v5597_v59, %v2290_v31  ;;  %2188 = vst.msk [vmem:[#allocation2 + $0x90] sm:$0xff] %vm84_vm0, %v5608_v36  ;;  %v1428_v31 = vpop.xlane.xlu0 %1427  ;;  %808 = vmatmul.bf16.gmra.mxu0 %v3859_v62 }
 0x239   :  { %v5619_v59 = vmax.f32 %v5616_v54, %v1428_v31  ;;  %7034 = vst [vmem:[#allocation165_spill] sm:$0xff] %v5627_v60  ;;  %897 = vmatmul.bf16.gmra.mxu1 %v3859_v62  ;;  %v5659_v62 = vld [vmem:[#allocation4 + $0x98] sm:$0xff] }
 0x23a   :  { %7027 = vst [vmem:[#allocation158_spill] sm:$0xff] %v5603_v38 }
 0x23b   :  { %3052 = vst.msk [vmem:[#allocation4 + $0x90] sm:$0xff] %vm84_vm0, %v5603_v38 }
 0x23c   :  { %2189 = vst.msk [vmem:[#allocation2 + $0x98] sm:$0xff] %vm84_vm0, %v5619_v59  ;;  %v5629_v8 = vpop.f32.mrf.mxu3 }
 0x23d   :  { %7035 = vst [vmem:[#allocation166_spill] sm:$0xff] %v5629_v8  ;;  %v5633_v17 = vpop.f32.mrf.mxu1  ;;  %v5635_v31 = vpop.f32.mrf.mxu2 }
 0x23e   :  { %7037 = vst [vmem:[#allocation168_spill] sm:$0xff] %v5633_v17 }
 0x23f   :  { %7038 = vst [vmem:[#allocation169_spill] sm:$0xff] %v5635_v31 }
 0x240   :  { %7040 = vst [vmem:[#allocation171_spill] sm:$0xff] %v5643_v40 }
 0x241   :  { %7043 = vst [vmem:[#allocation174_spill] sm:$0xff] %v5659_v62 }
 0x244   :  { %v5637_v54 = vpop.f32.mrf.mxu3 }
 0x245   :  { %7039 = vst [vmem:[#allocation170_spill] sm:$0xff] %v5637_v54  ;;  %v2306_v58 = vmax.f32 %v5635_v31, %v5637_v54  ;;  %v5645_v51 = vpop.f32.mrf.mxu1  ;;  %v5657_v54 = vpop.permute.xlu1 %1679 }
 0x246   :  { %7041 = vst [vmem:[#allocation172_spill] sm:$0xff] %v5645_v51  ;;  %v1444_v48 = vmax.f32 %v5643_v40, %v5645_v51  ;;  %v5664_v51 = vpop.permute.xlu2 %2544 }
 0x247   :  { %7045 = vst [vmem:[#allocation176_spill] sm:$0xff] %v5664_v51 }
 0x24c   :  { %v5710_v40 = vpop.f32.mrf.mxu3 }
 0x24d   :  { %7056 = vst [vmem:[#allocation187_spill] sm:$0xff] %v5710_v40 }
 0x25f   :  { %2301 = vmax.xlane.f32.xlu1 %v2300_v9  ;;  %v2303_v9 = vmax.f32 %v5627_v60, %v5629_v8  ;;  %v5708_v60 = vpop.f32.mrf.mxu2 }
 0x260   :  { %7055 = vst [vmem:[#allocation186_spill] sm:$0xff] %v5708_v60  ;;  %v2309_v51 = vmax.f32 %v5708_v60, %v5710_v40 }
 0x261   :  { %2304 = vmax.xlane.f32.xlu2 %v2303_v9 }
 0x262   :  { %2307 = vmax.xlane.f32.xlu0 %v2306_v58  ;;  %v1441_v58 = vmax.f32 %v5631_v41, %v5633_v17 }
 0x267   :  { %1439 = vmax.xlane.f32.xlu1 %v1438_v13  ;;  %v5671_v13 = vld [vmem:[#allocation2 + $0xa0] sm:$0xff] }
 0x268   :  { %7047 = vst [vmem:[#allocation178_spill] sm:$0xff] %v5671_v13 }
 0x269   :  { %1442 = vmax.xlane.f32.xlu2 %v1441_v58 }
 0x26a   :  { %1445 = vmax.xlane.f32.xlu0 %v1444_v48  ;;  %v5669_v48 = vpop.permute.xlu0 %2554 }
 0x26b   :  { %7046 = vst [vmem:[#allocation177_spill] sm:$0xff] %v5669_v48 }
 0x277   :  { %v2293_v31 = vpop.xlane.xlu1 %2292 }
 0x278   :  { %v5662_v37 = vmax.f32 %v5659_v62, %v2293_v31  ;;  %v5679_v31 = vpop.permute.xlu2 %1684  ;;  %v5681_v62 = vld [vmem:[#allocation4 + $0xa8] sm:$0xff] }
 0x279   :  { %7049 = vst [vmem:[#allocation180_spill] sm:$0xff] %v5681_v62 }
 0x27a   :  { %7044 = vst [vmem:[#allocation175_spill] sm:$0xff] %v5662_v37 }
 0x27b   :  { %3053 = vst.msk [vmem:[#allocation4 + $0x98] sm:$0xff] %vm84_vm0, %v5662_v37 }
 0x27e   :  { %1719 = vperm.xlu0 %4077, %v5417_v20   ;;  %v5693_v20 = vld [vmem:[#allocation2 + $0xb0] sm:$0xff] }
 0x27f   :  { %v1431_v9 = vpop.xlane.xlu1 %1430  ;;  %7052 = vst [vmem:[#allocation183_spill] sm:$0xff] %v5693_v20 }
 0x280   :  { %v5674_v58 = vmax.f32 %v5671_v13, %v1431_v9  ;;  %2564 = vperm.xlu1 %4075, %v5283_v7   ;;  %v5691_v9 = vld [vmem:[#allocation4 + $0xa0] sm:$0xff]  ;;  %v2296_v7 = vpop.xlane.xlu2 %2295 }
 0x281   :  { %1709 = vperm.xlu2 %4076, %v5348_v26   ;;  %7051 = vst [vmem:[#allocation182_spill] sm:$0xff] %v5691_v9  ;;  %v5696_v8 = vmax.f32 %v5691_v9, %v2296_v7  ;;  %v5719_v9 = vpop.f32.mrf.mxu1 }
 0x282   :  { %7048 = vst [vmem:[#allocation179_spill] sm:$0xff] %v5674_v58 }
 0x283   :  { %2190 = vst.msk [vmem:[#allocation2 + $0xa0] sm:$0xff] %vm84_vm0, %v5674_v58 }
 0x284   :  { %7053 = vst [vmem:[#allocation184_spill] sm:$0xff] %v5696_v8 }
 0x285   :  { %3054 = vst.msk [vmem:[#allocation4 + $0xa0] sm:$0xff] %vm84_vm0, %v5696_v8 }
 0x286   :  { %2584 = vperm.xlu0 %4077, %v5420_v63   ;;  %7059 = vst [vmem:[#allocation190_spill] sm:$0xff] %v5719_v9 }
 0x287   :  { %v2299_v17 = vpop.xlane.xlu0 %2298 }
 0x288   :  { %v5685_v41 = vmax.f32 %v5681_v62, %v2299_v17  ;;  %1714 = vperm.xlu1 %4075, %v5386_v44   ;;  %v5706_v62 = vld [vmem:[#allocation2 + $0xa8] sm:$0xff]  ;;  %v1434_v48 = vpop.xlane.xlu2 %1433 }
 0x289   :  { %2574 = vperm.xlu2 %4076, %v5345_v27   ;;  %7054 = vst [vmem:[#allocation185_spill] sm:$0xff] %v5706_v62  ;;  %v5713_v7 = vmax.f32 %v5706_v62, %v1434_v48  ;;  %v5723_v27 = vpop.f32.mrf.mxu3  ;;  %v5727_v52 = vpop.f32.mrf.mxu1 }
 0x28a   :  { %7050 = vst [vmem:[#allocation181_spill] sm:$0xff] %v5685_v41 }
 0x28b   :  { %3055 = vst.msk [vmem:[#allocation4 + $0xa8] sm:$0xff] %vm84_vm0, %v5685_v41 }
 0x28c   :  { %7057 = vst [vmem:[#allocation188_spill] sm:$0xff] %v5713_v7 }
 0x28d   :  { %2191 = vst.msk [vmem:[#allocation2 + $0xa8] sm:$0xff] %vm84_vm0, %v5713_v7 }
 0x28e   :  { %7061 = vst [vmem:[#allocation192_spill] sm:$0xff] %v5723_v27 }
 0x28f   :  { %v1437_v63 = vpop.xlane.xlu0 %1436  ;;  %7063 = vst [vmem:[#allocation194_spill] sm:$0xff] %v5727_v52 }
 0x290   :  { %v5701_v17 = vmax.f32 %v5693_v20, %v1437_v63  ;;  %v5717_v63 = vpop.f32.mrf.mxu0  ;;  %v5721_v20 = vpop.f32.mrf.mxu2 }
 0x291   :  { %7058 = vst [vmem:[#allocation189_spill] sm:$0xff] %v5717_v63  ;;  %v5731_v35 = vpop.f32.mrf.mxu3  ;;  %v5737_v26 = vpop.f32.mrf.mxu1  ;;  %v2312_v58 = vmax.f32 %v5721_v20, %v5723_v27  ;;  %v5762_v27 = vld [vmem:[#allocation4 + $0xb0] sm:$0xff] }
 0x292   :  { %2192 = vst.msk [vmem:[#allocation2 + $0xb0] sm:$0xff] %vm84_vm0, %v5701_v17  ;;  %v5755_v40 = vpop.permute.xlu2 %1694 }
 0x293   :  { %7060 = vst [vmem:[#allocation191_spill] sm:$0xff] %v5721_v20 }
 0x294   :  { %7065 = vst [vmem:[#allocation196_spill] sm:$0xff] %v5731_v35 }
 0x295   :  { %7067 = vst [vmem:[#allocation198_spill] sm:$0xff] %v5737_v26 }
 0x296   :  { %7072 = vst [vmem:[#allocation203_spill] sm:$0xff] %v5762_v27 }
 0x297   :  { %v5743_v8 = vpop.permute.xlu1 %2549 }
 0x298   :  { %v5725_v13 = vpop.f32.mrf.mxu0  ;;  %v5729_v14 = vpop.f32.mrf.mxu2  ;;  %7068 = vst [vmem:[#allocation199_spill] sm:$0xff] %v5743_v8 }
 0x299   :  { %7062 = vst [vmem:[#allocation193_spill] sm:$0xff] %v5725_v13  ;;  %v2315_v48 = vmax.f32 %v5729_v14, %v5731_v35 }
 0x29a   :  { %7064 = vst [vmem:[#allocation195_spill] sm:$0xff] %v5729_v14  ;;  %v1450_v14 = vmax.f32 %v5725_v13, %v5727_v52  ;;  %v5771_v13 = vpop.permute.xlu2 %2559 }
 0x29b   :  { %7075 = vst [vmem:[#allocation206_spill] sm:$0xff] %v5771_v13  ;;  %v1820_v13 = vsub.f32 %v4751_v56, %v5570_v15 }
 0x29f   :  { %v5749_v35 = vpop.permute.xlu1 %1689 }
 0x2a0   :  { %v5735_v62 = vpop.f32.mrf.mxu0  ;;  %7069 = vst [vmem:[#allocation200_spill] sm:$0xff] %v5749_v35 }
 0x2a1   :  { %7066 = vst [vmem:[#allocation197_spill] sm:$0xff] %v5735_v62  ;;  %v1453_v44 = vmax.f32 %v5735_v62, %v5737_v26 }
 0x2a7   :  { %v5757_v60 = vpop.permute.xlu1 %1699 }
 0x2b0   :  { %2316 = vmax.xlane.f32.xlu0 %v2315_v48  ;;  %v1447_v48 = vmax.f32 %v5717_v63, %v5719_v9 }
 0x2b2   :  { %2310 = vmax.xlane.f32.xlu1 %v2309_v51  ;;  %2313 = vmax.xlane.f32.xlu2 %v2312_v58  ;;  %v5753_v51 = vpop.permute.xlu0 %1704  ;;  %v5764_v58 = vld [vmem:[#allocation4 + $0xc0] sm:$0xff] }
 0x2b3   :  { %7070 = vst [vmem:[#allocation201_spill] sm:$0xff] %v5753_v51 }
 0x2b4   :  { %7073 = vst [vmem:[#allocation204_spill] sm:$0xff] %v5764_v58 }
 0x2b8   :  { %1454 = vmax.xlane.f32.xlu0 %v1453_v44 }
 0x2ba   :  { %1448 = vmax.xlane.f32.xlu1 %v1447_v48  ;;  %1451 = vmax.xlane.f32.xlu2 %v1450_v14  ;;  %v5760_v44 = vpop.permute.xlu0 %2569 }
 0x2bb   :  { %7071 = vst [vmem:[#allocation202_spill] sm:$0xff] %v5760_v44 }
 0x2cc   :  { %1734 = vperm.xlu0 %4077, %v5499_v24   ;;  %v5780_v24 = vld [vmem:[#allocation2 + $0xb8] sm:$0xff] }
 0x2cd   :  { %7077 = vst [vmem:[#allocation208_spill] sm:$0xff] %v5780_v24 }
 0x2d2   :  { %v2302_v48 = vpop.xlane.xlu1 %2301  ;;  %1724 = vperm.xlu2 %4076, %v5447_v61  }
 0x2d3   :  { %v5768_v52 = vmax.f32 %v5762_v27, %v2302_v48  ;;  %2579 = vperm.xlu1 %4075, %v5383_v6   ;;  %v5785_v27 = vld [vmem:[#allocation4 + $0xb8] sm:$0xff] }
 0x2d4   :  { %2599 = vperm.xlu0 %4077, %v5502_v22   ;;  %v5782_v22 = vld [vmem:[#allocation2 + $0xc8] sm:$0xff]  ;;  %7079 = vst [vmem:[#allocation210_spill] sm:$0xff] %v5785_v27 }
 0x2d5   :  { %7074 = vst [vmem:[#allocation205_spill] sm:$0xff] %v5768_v52  ;;  %v2308_v14 = vpop.xlane.xlu0 %2307 }
 0x2d6   :  { %v5774_v20 = vmax.f32 %v5764_v58, %v2308_v14  ;;  %3056 = vst.msk [vmem:[#allocation4 + $0xb0] sm:$0xff] %vm84_vm0, %v5768_v52  ;;  %v2305_v58 = vpop.xlane.xlu2 %2304 }
 0x2d7   :  { %7078 = vst [vmem:[#allocation209_spill] sm:$0xff] %v5782_v22  ;;  %v5797_v62 = vmax.f32 %v5785_v27, %v2305_v58  ;;  %v5815_v58 = vpop.f32.mrf.mxu0  ;;  %v5817_v27 = vpop.f32.mrf.mxu1 }
 0x2d8   :  { %7076 = vst [vmem:[#allocation207_spill] sm:$0xff] %v5774_v20 }
 0x2d9   :  { %3058 = vst.msk [vmem:[#allocation4 + $0xc0] sm:$0xff] %vm84_vm0, %v5774_v20 }
 0x2da   :  { %v1440_v48 = vpop.xlane.xlu1 %1439  ;;  %7082 = vst [vmem:[#allocation213_spill] sm:$0xff] %v5797_v62  ;;  %2589 = vperm.xlu2 %4076, %v5444_v16  }
 0x2db   :  { %v5788_v6 = vmax.f32 %v5780_v24, %v1440_v48  ;;  %1729 = vperm.xlu1 %4075, %v5474_v21   ;;  %3057 = vst.msk [vmem:[#allocation4 + $0xb8] sm:$0xff] %vm84_vm0, %v5797_v62  ;;  %v5803_v48 = vpop.f32.mrf.mxu2  ;;  %v5805_v24 = vpop.f32.mrf.mxu3  ;;  %v1887_v62 = vmul.f32 1.442695, %v1820_v13  ;;  %v1456_v13 = vmax.f32 %v5815_v58, %v5817_v27 }
 0x2dc   :  { %7083 = vst [vmem:[#allocation214_spill] sm:$0xff] %v5803_v48 }
 0x2dd   :  { %7080 = vst [vmem:[#allocation211_spill] sm:$0xff] %v5788_v6  ;;  %v1446_v14 = vpop.xlane.xlu0 %1445 }
 0x2de   :  { %v5792_v26 = vmax.f32 %v5782_v22, %v1446_v14  ;;  %2193 = vst.msk [vmem:[#allocation2 + $0xb8] sm:$0xff] %vm84_vm0, %v5788_v6  ;;  %v5808_v14 = vld [vmem:[#allocation2 + $0xc0] sm:$0xff]  ;;  %v1443_v22 = vpop.xlane.xlu2 %1442 }
 0x2df   :  { %7084 = vst [vmem:[#allocation215_spill] sm:$0xff] %v5805_v24  ;;  %v5811_v44 = vmax.f32 %v5808_v14, %v1443_v22  ;;  %v5823_v61 = vpop.f32.mrf.mxu0  ;;  %v5825_v16 = vpop.f32.mrf.mxu1  ;;  %v1819_v22 = vsub.f32 %v4749_v55, %v5570_v15  ;;  %v2318_v55 = vmax.f32 %v5803_v48, %v5805_v24  ;;  %v5888_v24 = vld [vmem:[#allocation2 + $0xd0] sm:$0xff] }
 0x2e0   :  { %7081 = vst [vmem:[#allocation212_spill] sm:$0xff] %v5792_v26 }
 0x2e1   :  { %2195 = vst.msk [vmem:[#allocation2 + $0xc8] sm:$0xff] %vm84_vm0, %v5792_v26  ;;  %v1885_v51 = vmul.f32 1.442695, %v1819_v22 }
 0x2e2   :  { %7085 = vst [vmem:[#allocation216_spill] sm:$0xff] %v5808_v14 }
 0x2e3   :  { %7086 = vst [vmem:[#allocation217_spill] sm:$0xff] %v5811_v44  ;;  %v5819_v9 = vpop.f32.mrf.mxu2  ;;  %v5821_v63 = vpop.f32.mrf.mxu3  ;;  %4078 = vpow2.f32 %v1885_v51 }
 0x2e4   :  { %2194 = vst.msk [vmem:[#allocation2 + $0xc0] sm:$0xff] %vm84_vm0, %v5811_v44  ;;  %4080 = vpow2.f32 %v1887_v62  ;;  %v2321_v56 = vmax.f32 %v5819_v9, %v5821_v63  ;;  %v1459_v62 = vmax.f32 %v5823_v61, %v5825_v16 }
 0x2e5   :  { %7087 = vst [vmem:[#allocation218_spill] sm:$0xff] %v5817_v27 }
 0x2e6   :  { %7088 = vst [vmem:[#allocation219_spill] sm:$0xff] %v5819_v9  ;;  %v5857_v22 = vpop.permute.xlu2 %1709 }
 0x2e7   :  { %7089 = vst [vmem:[#allocation220_spill] sm:$0xff] %v5821_v63  ;;  %v5837_v6 = vpop.f32.mrf.mxu0  ;;  %v5839_v35 = vpop.f32.mrf.mxu1  ;;  %v1822_v63 = vsub.f32 %v4764_v1, %v5574_v12 }
 0x2e8   :  { %7090 = vst [vmem:[#allocation221_spill] sm:$0xff] %v5823_v61  ;;  %v1462_v26 = vmax.f32 %v5837_v6, %v5839_v35  ;;  %v5877_v61 = vld [vmem:[#allocation2 + $0xe0] sm:$0xff] }
 0x2e9   :  { %7091 = vst [vmem:[#allocation222_spill] sm:$0xff] %v5825_v16 }
 0x2ea   :  { %7098 = vst [vmem:[#allocation229_spill] sm:$0xff] %v5877_v61 }
 0x2eb   :  { %v5827_v8 = vpop.f32.mrf.mxu2  ;;  %v5829_v21 = vpop.f32.mrf.mxu3  ;;  %7101 = vst [vmem:[#allocation232_spill] sm:$0xff] %v5888_v24 }
 0x2ec   :  { %7092 = vst [vmem:[#allocation223_spill] sm:$0xff] %v5827_v8  ;;  %v2324_v14 = vmax.f32 %v5827_v8, %v5829_v21 }
 0x2ed   :  { %7093 = vst [vmem:[#allocation224_spill] sm:$0xff] %v5829_v21  ;;  %v4079_v21 = vpop.eup %4078 }
 0x2ee   :  { %v4081_v8 = vpop.eup %4080 }
 0x2ef   :  { %v2012_v15 = vadd.f32 %v4081_v8, %v4079_v21  ;;  %v5861_v8 = vld [vmem:[#allocation4 + $0xd8] sm:$0xff] }
 0x2f0   :  { %v5849_v51 = vpop.permute.xlu0 %1719  ;;  %7094 = vst [vmem:[#allocation225_spill] sm:$0xff] %v5861_v8 }
 0x2fe   :  { %2325 = vmax.xlane.f32.xlu0 %v2324_v14  ;;  %v5853_v14 = vpop.permute.xlu1 %2564 }
 0x303   :  { %2322 = vmax.xlane.f32.xlu2 %v2321_v56 }
 0x305   :  { %2319 = vmax.xlane.f32.xlu1 %v2318_v55 }
 0x306   :  { %1463 = vmax.xlane.f32.xlu0 %v1462_v26  ;;  %v5855_v26 = vpop.permute.xlu0 %2584  ;;  %v5859_v55 = vpop.permute.xlu1 %1714 }
 0x30b   :  { %1460 = vmax.xlane.f32.xlu2 %v1459_v62 }
 0x30d   :  { %1457 = vmax.xlane.f32.xlu1 %v1456_v13  ;;  %v5871_v13 = vpop.permute.xlu2 %2574 }
 0x30e   :  { %2013 = vadd.xlane.f32.xlu0 %v2012_v15  ;;  %v5867_v15 = vld [vmem:[#allocation4 + $0xc8] sm:$0xff] }
 0x30f   :  { %7096 = vst [vmem:[#allocation227_spill] sm:$0xff] %v5867_v15 }
 0x322   :  { %1749 = vperm.xlu0 %4077, %v5608_v36   ;;  %v5886_v36 = vld [vmem:[#allocation4 + $0xd0] sm:$0xff] }
 0x323   :  { %v2317_v21 = vpop.xlane.xlu0 %2316  ;;  %1739 = vperm.xlu2 %4076, %v5516_v30   ;;  %7100 = vst [vmem:[#allocation231_spill] sm:$0xff] %v5886_v36 }
 0x324   :  { %v5865_v56 = vmax.f32 %v5861_v8, %v2317_v21 }
 0x325   :  { %v2311_v62 = vpop.xlane.xlu1 %2310 }
 0x326   :  { %7095 = vst [vmem:[#allocation226_spill] sm:$0xff] %v5865_v56  ;;  %v5874_v16 = vmax.f32 %v5867_v15, %v2311_v62  ;;  %2594 = vperm.xlu1 %4075, %v5471_v25   ;;  %v2314_v62 = vpop.xlane.xlu2 %2313 }
 0x327   :  { %3061 = vst.msk [vmem:[#allocation4 + $0xd8] sm:$0xff] %vm84_vm0, %v5865_v56  ;;  %v5893_v25 = vmax.f32 %v5886_v36, %v2314_v62  ;;  %v1818_v62 = vsub.f32 %v4740_v50, %v5554_v39 }
 0x328   :  { %7097 = vst [vmem:[#allocation228_spill] sm:$0xff] %v5874_v16 }
 0x329   :  { %3059 = vst.msk [vmem:[#allocation4 + $0xc8] sm:$0xff] %vm84_vm0, %v5874_v16 }
 0x32a   :  { %2614 = vperm.xlu0 %4077, %v5603_v38   ;;  %7102 = vst [vmem:[#allocation233_spill] sm:$0xff] %v5893_v25 }
 0x32b   :  { %v1455_v21 = vpop.xlane.xlu0 %1454  ;;  %3060 = vst.msk [vmem:[#allocation4 + $0xd0] sm:$0xff] %vm84_vm0, %v5893_v25  ;;  %2604 = vperm.xlu2 %4076, %v5565_v5  }
 0x32c   :  { %v5883_v8 = vmax.f32 %v5877_v61, %v1455_v21  ;;  %v5904_v21 = vld [vmem:[#allocation2 + $0xd8] sm:$0xff] }
 0x32d   :  { %v1449_v15 = vpop.xlane.xlu1 %1448  ;;  %7103 = vst [vmem:[#allocation234_spill] sm:$0xff] %v5904_v21 }
 0x32e   :  { %7099 = vst [vmem:[#allocation230_spill] sm:$0xff] %v5883_v8  ;;  %v5896_v38 = vmax.f32 %v5888_v24, %v1449_v15  ;;  %v1452_v61 = vpop.xlane.xlu2 %1451  ;;  %v1817_v15 = vsub.f32 %v4738_v49, %v5554_v39  ;;  %v1827_v24 = vsub.f32 %v4809_v28, %v5679_v31 }
 0x32f   :  { %2198 = vst.msk [vmem:[#allocation2 + $0xe0] sm:$0xff] %vm84_vm0, %v5883_v8  ;;  %v5907_v48 = vmax.f32 %v5904_v21, %v1452_v61  ;;  %v1828_v61 = vsub.f32 %v4811_v29, %v5679_v31  ;;  %v1821_v21 = vsub.f32 %v4762_v0, %v5574_v12 }
 0x330   :  { %2196 = vst.msk [vmem:[#allocation2 + $0xd0] sm:$0xff] %vm84_vm0, %v5896_v38  ;;  %v1881_v36 = vmul.f32 1.442695, %v1817_v15  ;;  %v1901_v9 = vmul.f32 1.442695, %v1827_v24 }
 0x331   :  { %7104 = vst [vmem:[#allocation235_spill] sm:$0xff] %v5907_v48  ;;  %v1903_v50 = vmul.f32 1.442695, %v1828_v61  ;;  %v1889_v39 = vmul.f32 1.442695, %v1821_v21 }
 0x332   :  { %1764 = vperm.xlu0 %4077, %v5713_v7   ;;  %2197 = vst.msk [vmem:[#allocation2 + $0xd8] sm:$0xff] %vm84_vm0, %v5907_v48  ;;  %v1883_v7 = vmul.f32 1.442695, %v1818_v62  ;;  %4082 = vpow2.f32 %v1881_v36  ;;  %v1891_v15 = vmul.f32 1.442695, %v1822_v63 }
 0x334   :  { %4084 = vpow2.f32 %v1883_v7 }
 0x335   :  { %4086 = vpow2.f32 %v1901_v9  ;;  %v5932_v9 = vld [vmem:[#allocation4 + $0xf0] sm:$0xff] }
 0x336   :  { %4088 = vpow2.f32 %v1903_v50  ;;  %7105 = vst [vmem:[#allocation236_spill] sm:$0xff] %v5932_v9 }
 0x337   :  { %4090 = vpow2.f32 %v1889_v39  ;;  %v5946_v39 = vld [vmem:[#allocation2 + $0xf8] sm:$0xff] }
 0x338   :  { %v4083_v49 = vpop.eup %4082  ;;  %4092 = vpow2.f32 %v1891_v15  ;;  %7108 = vst [vmem:[#allocation238_spill] sm:$0xff] %v5946_v39 }
 0x33a   :  { %v4085_v27 = vpop.eup %4084 }
 0x33b   :  { %v2009_v36 = vadd.f32 %v4085_v27, %v4083_v49  ;;  %v4087_v28 = vpop.eup %4086  ;;  %v5930_v27 = vpop.permute.xlu2 %1724  ;;  %v7107_v49 = vsub.f32 %v5065_v57, %v5081_v47 }
 0x33c   :  { %v4089_v29 = vpop.eup %4088 }
 0x33d   :  { %v4091_v31 = vpop.eup %4090  ;;  %v2024_v0 = vadd.f32 %v4089_v29, %v4087_v28  ;;  %v1563_v50 = vmul.f32 1.442695, %v7107_v49  ;;  %v5966_v49 = vld [vmem:[#allocation2 + $0xe8] sm:$0xff] }
 0x33e   :  { %v4093_v7 = vpop.eup %4092  ;;  %v5923_v1 = vpop.permute.xlu0 %1734  ;;  %7113 = vst [vmem:[#allocation243_spill] sm:$0xff] %v5966_v49 }
 0x33f   :  { %v2015_v62 = vadd.f32 %v4093_v7, %v4091_v31  ;;  %4094 = vpow2.f32 %v1563_v50  ;;  %v1498_v7 = vld [vmem:[#allocation3 + $0x8] sm:$0xff] }
 0x343   :  { %v5948_v15 = vpop.permute.xlu2 %2589 }
 0x345   :  { %v5925_v12 = vpop.permute.xlu1 %2579  ;;  %v4095_v31 = vpop.eup %4094 }
 0x346   :  { %v5927_v24 = vpop.permute.xlu0 %2599 }
 0x34d   :  { %v5935_v21 = vpop.permute.xlu1 %1729 }
 0x350   :  { %2010 = vadd.xlane.f32.xlu1 %v2009_v36  ;;  %v5951_v36 = vld [vmem:[#allocation4 + $0xe0] sm:$0xff] }
 0x351   :  { %7109 = vst [vmem:[#allocation239_spill] sm:$0xff] %v5951_v36 }
 0x354   :  { %2016 = vadd.xlane.f32.xlu2 %v2015_v62 }
 0x35c   :  { %2025 = vadd.xlane.f32.xlu0 %v2024_v0  ;;  %v5964_v0 = vld [vmem:[#allocation4 + $0xe8] sm:$0xff] }
 0x35d   :  { %7112 = vst [vmem:[#allocation242_spill] sm:$0xff] %v5964_v0 }
 0x369   :  { %1744 = vperm.xlu1 %4075, %v5577_v43  }
 0x36c   :  { %1754 = vperm.xlu2 %4076, %v5619_v59  }
 0x370   :  { %2629 = vperm.xlu0 %4077, %v5685_v41   ;;  %v1825_v41 = vsub.f32 %v4792_v18, %v5657_v54 }
 0x371   :  { %v2326_v63 = vpop.xlane.xlu0 %2325 }
 0x372   :  { %v5938_v61 = vmax.f32 %v5932_v9, %v2326_v63  ;;  %v1626_v63 = vmul.f32 %v4095_v31, %v1498_v7  ;;  %v5979_v31 = vld [vmem:[#allocation2 + $0xf0] sm:$0xff] }
 0x373   :  { %7116 = vst [vmem:[#allocation246_spill] sm:$0xff] %v5979_v31 }
 0x374   :  { %7106 = vst [vmem:[#allocation237_spill] sm:$0xff] %v5938_v61  ;;  %2619 = vperm.xlu2 %4076, %v5662_v37  }
 0x375   :  { %3064 = vst.msk [vmem:[#allocation4 + $0xf0] sm:$0xff] %vm84_vm0, %v5938_v61 }
 0x376   :  { %v2323_v62 = vpop.xlane.xlu2 %2322 }
 0x377   :  { %v5969_v50 = vmax.f32 %v5964_v0, %v2323_v62 }
 0x378   :  { %1779 = vperm.xlu0 %4077, %v5811_v44   ;;  %v2320_v47 = vpop.xlane.xlu1 %2319 }
 0x379   :  { %v1464_v28 = vpop.xlane.xlu0 %1463  ;;  %v5957_v57 = vmax.f32 %v5951_v36, %v2320_v47  ;;  %7114 = vst [vmem:[#allocation244_spill] sm:$0xff] %v5969_v50 }
 0x37a   :  { %v5954_v29 = vmax.f32 %v5946_v39, %v1464_v28  ;;  %3063 = vst.msk [vmem:[#allocation4 + $0xe8] sm:$0xff] %vm84_vm0, %v5969_v50 }
 0x37b   :  { %7111 = vst [vmem:[#allocation241_spill] sm:$0xff] %v5957_v57 }
 0x37c   :  { %7110 = vst [vmem:[#allocation240_spill] sm:$0xff] %v5954_v29 }
 0x37d   :  { %2201 = vst.msk [vmem:[#allocation2 + $0xf8] sm:$0xff] %vm84_vm0, %v5954_v29 }
 0x37e   :  { %3062 = vst.msk [vmem:[#allocation4 + $0xe0] sm:$0xff] %vm84_vm0, %v5957_v57  ;;  %v1461_v7 = vpop.xlane.xlu2 %1460 }
 0x37f   :  { %v5982_v62 = vmax.f32 %v5979_v31, %v1461_v7  ;;  %v1826_v31 = vsub.f32 %v4794_v19, %v5657_v54  ;;  %v7118_v19 = vsub.f32 %v5007_v42, %v5018_v23  ;;  %v1534_v54 = vsub.f32 %v5189_v34, %v5199_v46 }
 0x380   :  { %v1458_v9 = vpop.xlane.xlu1 %1457  ;;  %v7119_v23 = vsub.f32 %v5099_v4, %v5108_v53  ;;  %v1823_v34 = vsub.f32 %v4779_v10, %v5583_v33  ;;  %v1502_v10 = vld [vmem:[#allocation3 + $0x28] sm:$0xff] }
 0x381   :  { %v2014_v28 = vpop.xlane.xlu0 %2013  ;;  %v5974_v36 = vmax.f32 %v5966_v49, %v1458_v9  ;;  %7117 = vst [vmem:[#allocation247_spill] sm:$0xff] %v5982_v62  ;;  %v1834_v9 = vsub.f32 %v4854_v3, %v5757_v60  ;;  %v1899_v3 = vmul.f32 1.442695, %v1826_v31  ;;  %v1497_v31 = vld [vmem:[#allocation3] sm:$0xff] }
 0x382   :  { %v2106_v47 = vadd.f32 %v2014_v28, %v1626_v63  ;;  %2200 = vst.msk [vmem:[#allocation2 + $0xf0] sm:$0xff] %vm84_vm0, %v5982_v62  ;;  %v1833_v63 = vsub.f32 %v4852_v2, %v5757_v60  ;;  %v5990_v28 = vpop.f32.mrf.mxu2  ;;  %v1897_v2 = vmul.f32 1.442695, %v1825_v41  ;;  %v1561_v41 = vmul.f32 1.442695, %v7118_v19 }
 0x383   :  { %7115 = vst [vmem:[#allocation245_spill] sm:$0xff] %v5974_v36  ;;  %v1915_v49 = vmul.f32 1.442695, %v1834_v9  ;;  %v1565_v42 = vmul.f32 1.442695, %v7119_v23 }
 0x384   :  { %2139 = vst.msk [vmem:[#allocation3 + $0x8] sm:$0xff] %vm84_vm0, %v2106_v47  ;;  %v5992_v47 = vpop.f32.mrf.mxu3  ;;  %v1913_v0 = vmul.f32 1.442695, %v1833_v63 }
 0x385   :  { %2199 = vst.msk [vmem:[#allocation2 + $0xe8] sm:$0xff] %vm84_vm0, %v5974_v36  ;;  %v2327_v7 = vmax.f32 %v5990_v28, %v5992_v47 }
 0x386   :  { %4096 = vpow2.f32 %v1913_v0 }
 0x387   :  { %4098 = vpow2.f32 %v1915_v49  ;;  %v1571_v49 = vmul.f32 1.442695, %v1534_v54 }
 0x388   :  { %4100 = vpow2.f32 %v1897_v2 }
 0x389   :  { %4102 = vpow2.f32 %v1899_v3 }
 0x38a   :  { %4104 = vpow2.f32 %v1561_v41  ;;  %v1499_v41 = vld [vmem:[#allocation3 + $0x10] sm:$0xff] }
 0x38b   :  { %4106 = vpow2.f32 %v1571_v49 }
 0x38c   :  { %v4097_v60 = vpop.eup %4096  ;;  %4108 = vpow2.f32 %v1565_v42 }
 0x38d   :  { %v4099_v44 = vpop.eup %4098 }
 0x38e   :  { %v2033_v63 = vadd.f32 %v4099_v44, %v4097_v60  ;;  %v4101_v39 = vpop.eup %4100 }
 0x38f   :  { %v4103_v37 = vpop.eup %4102 }
 0x390   :  { %v2021_v18 = vadd.f32 %v4103_v37, %v4101_v39  ;;  %v6014_v37 = vpop.permute.xlu2 %1739  ;;  %v4105_v39 = vpop.eup %4104 }
 0x391   :  { %v1625_v46 = vmul.f32 %v4105_v39, %v1497_v31 }
 0x393   :  { %2328 = vmax.xlane.f32.xlu1 %v2327_v7  ;;  %v1824_v7 = vsub.f32 %v4781_v11, %v5583_v33 }
 0x394   :  { %v6001_v9 = vpop.permute.xlu0 %1749 }
 0x395   :  { %v1895_v4 = vmul.f32 1.442695, %v1824_v7 }
 0x398   :  { %v6009_v44 = vpop.permute.xlu1 %2594  ;;  %v6028_v53 = vpop.permute.xlu2 %2604 }
 0x39c   :  { %v6011_v0 = vpop.permute.xlu0 %2614 }
 0x39d   :  { %2022 = vadd.xlane.f32.xlu2 %v2021_v18  ;;  %v4107_v18 = vpop.eup %4106 }
 0x39e   :  { %v4109_v19 = vpop.eup %4108  ;;  %v1630_v11 = vmul.f32 %v4107_v18, %v1502_v10  ;;  %v7122_v10 = vld [vmem:[#allocation34_spill] sm:$0xff] }
 0x39f   :  { %v1627_v39 = vmul.f32 %v4109_v19, %v1499_v41  ;;  %v1832_v19 = vsub.f32 %v7122_v10, %v5755_v40 }
 0x3a2   :  { %2034 = vadd.xlane.f32.xlu0 %v2033_v63  ;;  %v1893_v63 = vmul.f32 1.442695, %v1823_v34  ;;  %v1839_v34 = vsub.f32 %v4898_v45, %v5859_v55 }
 0x3a4   :  { %v6024_v60 = vpop.permute.xlu0 %1764  ;;  %4110 = vpow2.f32 %v1893_v63 }
 0x3a5   :  { %4112 = vpow2.f32 %v1895_v4  ;;  %v7121_v4 = vld [vmem:[#allocation33_spill] sm:$0xff] }
 0x3a6   :  { %v1831_v18 = vsub.f32 %v7121_v4, %v5755_v40  ;;  %v7129_v4 = vld [vmem:[#allocation79_spill] sm:$0xff] }
 0x3a8   :  { %v1909_v41 = vmul.f32 1.442695, %v1831_v18 }
 0x3aa   :  { %v4111_v31 = vpop.eup %4110 }
 0x3ab   :  { %v4113_v42 = vpop.eup %4112 }
 0x3ac   :  { %2609 = vperm.xlu1 %4075, %v5593_v32  }
 0x3b5   :  { %1769 = vperm.xlu2 %4076, %v5701_v17  }
 0x3b6   :  { %2644 = vperm.xlu0 %4077, %v5774_v20   ;;  %v7136_v20 = vld [vmem:[#allocation59_spill] sm:$0xff] }
 0x3bd   :  { %2634 = vperm.xlu2 %4076, %v5768_v52   ;;  %v7154_v52 = vld [vmem:[#allocation19_spill] sm:$0xff] }
 0x3be   :  { %1794 = vperm.xlu0 %4077, %v5907_v48   ;;  %v1846_v48 = vsub.f32 %v7136_v20, %v5935_v21 }
 0x3c3   :  { %v2011_v2 = vpop.xlane.xlu1 %2010 }
 0x3c4   :  { %v2105_v3 = vadd.f32 %v2011_v2, %v1625_v46  ;;  %v7120_v46 = vld [vmem:[#allocation47_spill] sm:$0xff]  ;;  %v2018_v2 = vadd.f32 %v4113_v42, %v4111_v31  ;;  %v7125_v42 = vld [vmem:[#allocation97_spill] sm:$0xff] }
 0x3c5   :  { %v1840_v7 = vsub.f32 %v7120_v46, %v5859_v55  ;;  %v7123_v31 = vld [vmem:[#allocation179_spill] sm:$0xff] }
 0x3c6   :  { %2138 = vst.msk [vmem:[#allocation3] sm:$0xff] %vm84_vm0, %v2105_v3  ;;  %v1925_v3 = vmul.f32 1.442695, %v1839_v34  ;;  %v7126_v34 = vld [vmem:[#allocation95_spill] sm:$0xff] }
 0x3c7   :  { %v2017_v49 = vpop.xlane.xlu2 %2016  ;;  %v1927_v63 = vmul.f32 1.442695, %v1840_v7  ;;  %v1537_v46 = vsub.f32 %v7126_v34, %v7125_v42 }
 0x3c8   :  { %v2107_v23 = vadd.f32 %v2017_v49, %v1627_v39  ;;  %4114 = vpow2.f32 %v1925_v3 }
 0x3c9   :  { %4116 = vpow2.f32 %v1927_v63  ;;  %v1577_v3 = vmul.f32 1.442695, %v1537_v46  ;;  %v7128_v63 = vld [vmem:[#allocation81_spill] sm:$0xff] }
 0x3ca   :  { %2140 = vst.msk [vmem:[#allocation3 + $0x10] sm:$0xff] %vm84_vm0, %v2107_v23  ;;  %4118 = vpow2.f32 %v1909_v41  ;;  %v7124_v23 = vld [vmem:[#allocation184_spill] sm:$0xff]  ;;  %v1533_v18 = vsub.f32 %v7129_v4, %v7128_v63  ;;  %v1505_v46 = vld [vmem:[#allocation3 + $0x40] sm:$0xff] }
 0x3ce   :  { %v4115_v45 = vpop.eup %4114 }
 0x3cf   :  { %v2026_v33 = vpop.xlane.xlu0 %2025  ;;  %v6054_v10 = vpop.permute.xlu2 %1754 }
 0x3d0   :  { %v2110_v54 = vadd.f32 %v2026_v33, %v1630_v11  ;;  %v1911_v11 = vmul.f32 1.442695, %v1832_v19  ;;  %v4117_v33 = vpop.eup %4116  ;;  %v7130_v19 = vld [vmem:[#allocation212_spill] sm:$0xff] }
 0x3d1   :  { %v4119_v55 = vpop.eup %4118 }
 0x3d2   :  { %2143 = vst.msk [vmem:[#allocation3 + $0x28] sm:$0xff] %vm84_vm0, %v2110_v54  ;;  %4120 = vpow2.f32 %v1911_v11  ;;  %v2042_v54 = vadd.f32 %v4117_v33, %v4115_v45  ;;  %v1569_v45 = vmul.f32 1.442695, %v1533_v18 }
 0x3d3   :  { %4122 = vpow2.f32 %v1577_v3 }
 0x3d4   :  { %4124 = vpow2.f32 %v1569_v45 }
 0x3d6   :  { %2019 = vadd.xlane.f32.xlu1 %v2018_v2  ;;  %v6050_v2 = vld [vmem:[#allocation4 + $0xf8] sm:$0xff] }
 0x3d7   :  { %7127 = vst [vmem:[#allocation47_spill] sm:$0xff] %v6050_v2  ;;  %v6069_v63 = vpop.permute.xlu2 %2619 }
 0x3d8   :  { %v4121_v39 = vpop.eup %4120 }
 0x3d9   :  { %v2030_v49 = vadd.f32 %v4121_v39, %v4119_v55  ;;  %v7133_v55 = vld [vmem:[#allocation29_spill] sm:$0xff]  ;;  %v4123_v34 = vpop.eup %4122 }
 0x3da   :  { %v4125_v18 = vpop.eup %4124 }
 0x3db   :  { %v6043_v40 = vpop.permute.xlu1 %1744 }
 0x3e2   :  { %v6047_v7 = vpop.permute.xlu0 %2629 }
 0x3e6   :  { %2031 = vadd.xlane.f32.xlu2 %v2030_v49  ;;  %v7134_v49 = vld [vmem:[#allocation30_spill] sm:$0xff] }
 0x3e8   :  { %2043 = vadd.xlane.f32.xlu0 %v2042_v54  ;;  %v7132_v54 = vld [vmem:[#allocation200_spill] sm:$0xff] }
 0x3e9   :  { %v1829_v39 = vsub.f32 %v7133_v55, %v7132_v54  ;;  %v1830_v42 = vsub.f32 %v7134_v49, %v7132_v54  ;;  %v7135_v54 = vld [vmem:[#allocation58_spill] sm:$0xff] }
 0x3ea   :  { %v6062_v33 = vpop.permute.xlu0 %1779  ;;  %v1845_v55 = vsub.f32 %v7135_v54, %v5935_v21 }
 0x3eb   :  { %v1905_v3 = vmul.f32 1.442695, %v1829_v39  ;;  %v1907_v4 = vmul.f32 1.442695, %v1830_v42 }
 0x3ed   :  { %4126 = vpow2.f32 %v1905_v3  ;;  %v7138_v3 = vld [vmem:[#allocation44_spill] sm:$0xff] }
 0x3ee   :  { %4128 = vpow2.f32 %v1907_v4  ;;  %v1838_v4 = vsub.f32 %v7138_v3, %v5857_v22  ;;  %v7145_v3 = vld [vmem:[#allocation115_spill] sm:$0xff] }
 0x3ef   :  { %1759 = vperm.xlu1 %4075, %v7123_v31  }
 0x3f0   :  { %v1923_v21 = vmul.f32 1.442695, %v1838_v4 }
 0x3f3   :  { %v4127_v39 = vpop.eup %4126 }
 0x3f4   :  { %v4129_v42 = vpop.eup %4128 }
 0x3f7   :  { %2624 = vperm.xlu1 %4075, %v7124_v23  }
 0x3fc   :  { %2659 = vperm.xlu0 %4077, %v5865_v56  }
 0x3fe   :  { %1784 = vperm.xlu2 %4076, %v7130_v19  }
 0x404   :  { %1809 = vperm.xlu0 %4077, %v5982_v62  }
 0x406   :  { %v2329_v41 = vpop.xlane.xlu1 %2328  ;;  %2649 = vperm.xlu2 %4076, %v5874_v16  }
 0x407   :  { %v6058_v11 = vmax.f32 %v6050_v2, %v2329_v41  ;;  %v1633_v41 = vmul.f32 %v4123_v34, %v1505_v46  ;;  %v1501_v2 = vld [vmem:[#allocation3 + $0x20] sm:$0xff]  ;;  %v1937_v34 = vmul.f32 1.442695, %v1845_v55  ;;  %v2027_v46 = vadd.f32 %v4129_v42, %v4127_v39  ;;  %v7139_v55 = vld [vmem:[#allocation211_spill] sm:$0xff]  ;;  %v7141_v39 = vld [vmem:[#allocation74_spill] sm:$0xff] }
 0x408   :  { %v1629_v45 = vmul.f32 %v4125_v18, %v1501_v2 }
 0x409   :  { %7131 = vst [vmem:[#allocation33_spill] sm:$0xff] %v6058_v11  ;;  %4130 = vpow2.f32 %v1937_v34 }
 0x40a   :  { %3065 = vst.msk [vmem:[#allocation4 + $0xf8] sm:$0xff] %vm84_vm0, %v6058_v11 }
 0x410   :  { %v2023_v49 = vpop.xlane.xlu2 %2022 }
 0x411   :  { %v2109_v16 = vadd.f32 %v2023_v49, %v1629_v45  ;;  %v7140_v49 = vld [vmem:[#allocation72_spill] sm:$0xff] }
 0x412   :  { %v7142_v42 = vsub.f32 %v7140_v49, %v7141_v39 }
 0x413   :  { %2142 = vst.msk [vmem:[#allocation3 + $0x20] sm:$0xff] %vm84_vm0, %v2109_v16 }
 0x414   :  { %v1567_v34 = vmul.f32 1.442695, %v7142_v42 }
 0x415   :  { %v2035_v62 = vpop.xlane.xlu0 %2034 }
 0x416   :  { %v2113_v56 = vadd.f32 %v2035_v62, %v1633_v41  ;;  %v1939_v62 = vmul.f32 1.442695, %v1846_v48  ;;  %v4131_v41 = vpop.eup %4130 }
 0x418   :  { %2146 = vst.msk [vmem:[#allocation3 + $0x40] sm:$0xff] %vm84_vm0, %v2113_v56  ;;  %4132 = vpow2.f32 %v1939_v62  ;;  %v7137_v56 = vld [vmem:[#allocation43_spill] sm:$0xff]  ;;  %v7143_v62 = vld [vmem:[#allocation213_spill] sm:$0xff]  ;;  %v6096_v49 = vpop.permute.xlu2 %1769 }
 0x419   :  { %v1837_v2 = vsub.f32 %v7137_v56, %v5857_v22  ;;  %v1500_v56 = vld [vmem:[#allocation3 + $0x18] sm:$0xff] }
 0x41b   :  { %v1921_v20 = vmul.f32 1.442695, %v1837_v2  ;;  %v7144_v2 = vld [vmem:[#allocation117_spill] sm:$0xff] }
 0x41c   :  { %v1540_v4 = vsub.f32 %v7145_v3, %v7144_v2  ;;  %v1508_v2 = vld [vmem:[#allocation3 + $0x58] sm:$0xff]  ;;  %v7149_v3 = vld [vmem:[#allocation99_spill] sm:$0xff] }
 0x41d   :  { %4134 = vpow2.f32 %v1921_v20 }
 0x41e   :  { %v4133_v18 = vpop.eup %4132  ;;  %4136 = vpow2.f32 %v1923_v21  ;;  %v6086_v22 = vpop.permute.xlu1 %2609 }
 0x41f   :  { %v2051_v45 = vadd.f32 %v4133_v18, %v4131_v41  ;;  %4138 = vpow2.f32 %v1567_v34 }
 0x421   :  { %2028 = vadd.xlane.f32.xlu1 %v2027_v46 }
 0x423   :  { %v4135_v16 = vpop.eup %4134 }
 0x424   :  { %v4137_v48 = vpop.eup %4136 }
 0x425   :  { %v2039_v54 = vadd.f32 %v4137_v48, %v4135_v16  ;;  %v4139_v46 = vpop.eup %4138  ;;  %v7146_v16 = vld [vmem:[#allocation91_spill] sm:$0xff]  ;;  %v7147_v48 = vld [vmem:[#allocation89_spill] sm:$0xff] }
 0x426   :  { %v1628_v18 = vmul.f32 %v4139_v46, %v1500_v56  ;;  %v7148_v46 = vld [vmem:[#allocation98_spill] sm:$0xff] }
 0x427   :  { %v1851_v56 = vsub.f32 %v7148_v46, %v6043_v40 }
 0x428   :  { %v6091_v41 = vpop.permute.xlu0 %2644 }
 0x42e   :  { %2052 = vadd.xlane.f32.xlu0 %v2051_v45  ;;  %v1583_v45 = vmul.f32 1.442695, %v1540_v4  ;;  %v1852_v4 = vsub.f32 %v7149_v3, %v6043_v40  ;;  %v1504_v3 = vld [vmem:[#allocation3 + $0x38] sm:$0xff] }
 0x42f   :  { %2040 = vadd.xlane.f32.xlu2 %v2039_v54  ;;  %v1536_v54 = vsub.f32 %v7147_v48, %v7146_v16  ;;  %v7152_v16 = vld [vmem:[#allocation40_spill] sm:$0xff] }
 0x430   :  { %4140 = vpow2.f32 %v1583_v45  ;;  %v6099_v39 = vpop.permute.xlu0 %1794  ;;  %v1951_v23 = vmul.f32 1.442695, %v1852_v4 }
 0x431   :  { %v1575_v42 = vmul.f32 1.442695, %v1536_v54 }
 0x433   :  { %4142 = vpow2.f32 %v1575_v42 }
 0x436   :  { %v4141_v34 = vpop.eup %4140 }
 0x437   :  { %v1636_v45 = vmul.f32 %v4141_v34, %v1508_v2  ;;  %v7155_v34 = vld [vmem:[#allocation20_spill] sm:$0xff] }
 0x439   :  { %v4143_v42 = vpop.eup %4142 }
 0x43a   :  { %1774 = vperm.xlu1 %4075, %v7139_v55  }
 0x442   :  { %2674 = vperm.xlu0 %4077, %v5938_v61   ;;  %2639 = vperm.xlu1 %4075, %v7143_v62   ;;  %v6110_v61 = vpop.permute.xlu2 %2634 }
 0x447   :  { %1799 = vperm.xlu2 %4076, %v5883_v8   ;;  %v1949_v8 = vmul.f32 1.442695, %v1851_v56 }
 0x449   :  { %v2020_v20 = vpop.xlane.xlu1 %2019  ;;  %4144 = vpow2.f32 %v1949_v8 }
 0x44a   :  { %v2108_v21 = vadd.f32 %v2020_v20, %v1628_v18  ;;  %v7150_v18 = vld [vmem:[#allocation201_spill] sm:$0xff]  ;;  %v7151_v20 = vld [vmem:[#allocation39_spill] sm:$0xff]  ;;  %4146 = vpow2.f32 %v1951_v23 }
 0x44b   :  { %v1836_v48 = vsub.f32 %v7152_v16, %v7150_v18 }
 0x44c   :  { %2141 = vst.msk [vmem:[#allocation3 + $0x18] sm:$0xff] %vm84_vm0, %v2108_v21  ;;  %v1835_v21 = vsub.f32 %v7151_v20, %v7150_v18  ;;  %v1632_v18 = vmul.f32 %v4143_v42, %v1504_v3 }
 0x44d   :  { %v1919_v40 = vmul.f32 1.442695, %v1836_v48  ;;  %v7156_v48 = vld [vmem:[#allocation176_spill] sm:$0xff] }
 0x44e   :  { %v1917_v46 = vmul.f32 1.442695, %v1835_v21 }
 0x44f   :  { %2664 = vperm.xlu2 %4076, %v5957_v57   ;;  %v7153_v57 = vld [vmem:[#allocation151_spill] sm:$0xff] }
 0x450   :  { %v2684_v19 = vsub.f32 %v7154_v52, %v7153_v57  ;;  %v2685_v2 = vsub.f32 %v7155_v34, %v7153_v57  ;;  %4148 = vpow2.f32 %v1917_v46  ;;  %v7157_v52 = vld [vmem:[#allocation25_spill] sm:$0xff]  ;;  %v7158_v57 = vld [vmem:[#allocation26_spill] sm:$0xff] }
 0x451   :  { %4150 = vpow2.f32 %v1919_v40  ;;  %v2690_v8 = vsub.f32 %v7157_v52, %v7156_v48  ;;  %v2691_v23 = vsub.f32 %v7158_v57, %v7156_v48  ;;  %v7162_v48 = vld [vmem:[#allocation140_spill] sm:$0xff] }
 0x452   :  { %v2750_v20 = vmul.f32 1.442695, %v2684_v19  ;;  %v2752_v21 = vmul.f32 1.442695, %v2685_v2  ;;  %v7159_v2 = vld [vmem:[#allocation54_spill] sm:$0xff] }
 0x453   :  { %v2762_v42 = vmul.f32 1.442695, %v2690_v8  ;;  %v2764_v40 = vmul.f32 1.442695, %v2691_v23 }
 0x454   :  { %4152 = vpow2.f32 %v2750_v20  ;;  %v7160_v20 = vld [vmem:[#allocation55_spill] sm:$0xff] }
 0x455   :  { %4154 = vpow2.f32 %v2752_v21  ;;  %v7161_v21 = vld [vmem:[#allocation139_spill] sm:$0xff] }
 0x456   :  { %4156 = vpow2.f32 %v2762_v42 }
 0x457   :  { %4158 = vpow2.f32 %v2764_v40 }
 0x459   :  { %v2032_v56 = vpop.xlane.xlu2 %2031 }
 0x45a   :  { %v2112_v4 = vadd.f32 %v2032_v56, %v1632_v18  ;;  %v1843_v18 = vsub.f32 %v7159_v2, %v5930_v27  ;;  %v7164_v2 = vld [vmem:[#allocation35_spill] sm:$0xff] }
 0x45b   :  { %v2044_v54 = vpop.xlane.xlu0 %2043 }
 0x45c   :  { %v2116_v62 = vadd.f32 %v2044_v54, %v1636_v45  ;;  %v4145_v45 = vpop.eup %4144  ;;  %2145 = vst.msk [vmem:[#allocation3 + $0x38] sm:$0xff] %vm84_vm0, %v2112_v4  ;;  %v1844_v4 = vsub.f32 %v7160_v20, %v5930_v27  ;;  %v7165_v27 = vld [vmem:[#allocation36_spill] sm:$0xff] }
 0x45e   :  { %2149 = vst.msk [vmem:[#allocation3 + $0x58] sm:$0xff] %vm84_vm0, %v2116_v62  ;;  %v4147_v62 = vpop.eup %4146 }
 0x45f   :  { %v4149_v16 = vpop.eup %4148  ;;  %v2060_v46 = vadd.f32 %v4147_v62, %v4145_v45  ;;  %v1933_v62 = vmul.f32 1.442695, %v1843_v18 }
 0x460   :  { %v4151_v54 = vpop.eup %4150 }
 0x461   :  { %v2036_v19 = vadd.f32 %v4151_v54, %v4149_v16  ;;  %v1760_v3 = vpop.permute.xlu1 %1759  ;;  %v4153_v34 = vpop.eup %4152  ;;  %v1935_v16 = vmul.f32 1.442695, %v1844_v4  ;;  %4160 = vpow2.f32 %v1933_v62 }
 0x462   :  { %v4155_v56 = vpop.eup %4154  ;;  %v1857_v52 = vsub.f32 %v7161_v21, %v1760_v3  ;;  %v1858_v45 = vsub.f32 %v7162_v48, %v1760_v3  ;;  %v7166_v21 = vld [vmem:[#allocation45_spill] sm:$0xff] }
 0x463   :  { %v2877_v8 = vadd.f32 %v4155_v56, %v4153_v34  ;;  %v4157_v23 = vpop.eup %4156  ;;  %4162 = vpow2.f32 %v1935_v16  ;;  %v7168_v16 = vld [vmem:[#allocation86_spill] sm:$0xff] }
 0x464   :  { %v1961_v54 = vmul.f32 1.442695, %v1857_v52  ;;  %v1963_v57 = vmul.f32 1.442695, %v1858_v45  ;;  %v2702_v52 = vsub.f32 %v7166_v21, %v5871_v13  ;;  %v7167_v45 = vld [vmem:[#allocation46_spill] sm:$0xff]  ;;  %v1503_v21 = vld [vmem:[#allocation3 + $0x30] sm:$0xff] }
 0x465   :  { %v2703_v62 = vsub.f32 %v7167_v45, %v5871_v13 }
 0x466   :  { %4164 = vpow2.f32 %v1961_v54  ;;  %v7169_v54 = vld [vmem:[#allocation84_spill] sm:$0xff] }
 0x467   :  { %4166 = vpow2.f32 %v1963_v57  ;;  %v1535_v57 = vsub.f32 %v7169_v54, %v7168_v16  ;;  %v7172_v16 = vld [vmem:[#allocation109_spill] sm:$0xff]  ;;  %v7173_v54 = vld [vmem:[#allocation107_spill] sm:$0xff] }
 0x469   :  { %v6139_v13 = vpop.permute.xlu1 %2624 }
 0x46c   :  { %2061 = vadd.xlane.f32.xlu0 %v2060_v46  ;;  %2037 = vadd.xlane.f32.xlu1 %v2036_v19  ;;  %v4159_v46 = vpop.eup %4158  ;;  %v7163_v19 = vld [vmem:[#allocation206_spill] sm:$0xff] }
 0x46d   :  { %v2696_v32 = vsub.f32 %v7164_v2, %v7163_v19  ;;  %v2697_v42 = vsub.f32 %v7165_v27, %v7163_v19  ;;  %v2886_v40 = vadd.f32 %v4159_v46, %v4157_v23  ;;  %v4161_v3 = vpop.eup %4160  ;;  %v2788_v23 = vmul.f32 1.442695, %v2703_v62 }
 0x46e   :  { %v4163_v34 = vpop.eup %4162  ;;  %v1573_v2 = vmul.f32 1.442695, %v1535_v57  ;;  %v1539_v57 = vsub.f32 %v7173_v54, %v7172_v16 }
 0x46f   :  { %v2774_v18 = vmul.f32 1.442695, %v2696_v32  ;;  %v2776_v56 = vmul.f32 1.442695, %v2697_v42  ;;  %v4165_v20 = vpop.eup %4164  ;;  %v2048_v48 = vadd.f32 %v4163_v34, %v4161_v3  ;;  %v2786_v32 = vmul.f32 1.442695, %v2702_v52 }
 0x470   :  { %v4167_v4 = vpop.eup %4166  ;;  %v7170_v3 = vld [vmem:[#allocation131_spill] sm:$0xff] }
 0x471   :  { %4168 = vpow2.f32 %v2774_v18  ;;  %v7171_v18 = vld [vmem:[#allocation129_spill] sm:$0xff] }
 0x472   :  { %4170 = vpow2.f32 %v2776_v56  ;;  %v1543_v34 = vsub.f32 %v7171_v18, %v7170_v3  ;;  %v6143_v56 = vpop.permute.xlu0 %2659  ;;  %v7174_v3 = vld [vmem:[#allocation50_spill] sm:$0xff] }
 0x473   :  { %4172 = vpow2.f32 %v2786_v32  ;;  %v6151_v32 = vpop.permute.xlu2 %1784  ;;  %v1841_v18 = vsub.f32 %v7174_v3, %v5849_v51  ;;  %v7179_v3 = vld [vmem:[#allocation57_spill] sm:$0xff] }
 0x474   :  { %2878 = vadd.xlane.f32.xlu0 %v2877_v8  ;;  %v2069_v8 = vadd.f32 %v4167_v4, %v4165_v20  ;;  %4174 = vpow2.f32 %v2788_v23  ;;  %v1589_v52 = vmul.f32 1.442695, %v1543_v34  ;;  %v7175_v34 = vld [vmem:[#allocation51_spill] sm:$0xff] }
 0x475   :  { %4176 = vpow2.f32 %v1573_v2 }
 0x476   :  { %4178 = vpow2.f32 %v1589_v52  ;;  %v1929_v52 = vmul.f32 1.442695, %v1841_v18  ;;  %v2709_v18 = vsub.f32 %v7179_v3, %v5948_v15 }
 0x477   :  { %v4169_v46 = vpop.eup %4168 }
 0x478   :  { %2049 = vadd.xlane.f32.xlu2 %v2048_v48  ;;  %v4171_v19 = vpop.eup %4170 }
 0x479   :  { %v2895_v27 = vadd.f32 %v4171_v19, %v4169_v46  ;;  %v4173_v42 = vpop.eup %4172  ;;  %v1511_v46 = vld [vmem:[#allocation3 + $0x70] sm:$0xff]  ;;  %v1581_v19 = vmul.f32 1.442695, %v1539_v57 }
 0x47a   :  { %v7176_v57 = vld [vmem:[#allocation163_spill] sm:$0xff] }
 0x47b   :  { %4180 = vpow2.f32 %v1581_v19 }
 0x47c   :  { %2887 = vadd.xlane.f32.xlu0 %v2886_v40  ;;  %v4175_v40 = vpop.eup %4174  ;;  %4182 = vpow2.f32 %v1929_v52  ;;  %v7180_v52 = vld [vmem:[#allocation69_spill] sm:$0xff] }
 0x47d   :  { %v4177_v20 = vpop.eup %4176  ;;  %v2904_v4 = vadd.f32 %v4175_v40, %v4173_v42  ;;  %v6155_v40 = vpop.permute.xlu2 %2649 }
 0x47e   :  { %v1631_v48 = vmul.f32 %v4177_v20, %v1503_v21  ;;  %v4179_v23 = vpop.eup %4178  ;;  %v1842_v20 = vsub.f32 %v7175_v34, %v5849_v51  ;;  %v1507_v21 = vld [vmem:[#allocation3 + $0x50] sm:$0xff] }
 0x47f   :  { %v1639_v2 = vmul.f32 %v4179_v23, %v1511_v46  ;;  %v7177_v46 = vld [vmem:[#allocation164_spill] sm:$0xff] }
 0x484   :  { %2070 = vadd.xlane.f32.xlu0 %v2069_v8  ;;  %v6146_v8 = vpop.permute.xlu0 %1809 }
 0x485   :  { %1789 = vperm.xlu1 %4075, %v5896_v38  }
 0x48c   :  { %2896 = vadd.xlane.f32.xlu0 %v2895_v27 }
 0x48d   :  { %2654 = vperm.xlu1 %4075, %v5893_v25  }
 0x490   :  { %1814 = vperm.xlu2 %4076, %v5954_v29  }
 0x494   :  { %2905 = vadd.xlane.f32.xlu0 %v2904_v4  ;;  %v2029_v45 = vpop.xlane.xlu1 %2028  ;;  %v4181_v4 = vpop.eup %4180 }
 0x495   :  { %v2111_v62 = vadd.f32 %v2029_v45, %v1631_v48  ;;  %v1931_v48 = vmul.f32 1.442695, %v1842_v20  ;;  %v1635_v45 = vmul.f32 %v4181_v4, %v1507_v21  ;;  %v4183_v34 = vpop.eup %4182  ;;  %v2800_v21 = vmul.f32 1.442695, %v2709_v18 }
 0x497   :  { %2144 = vst.msk [vmem:[#allocation3 + $0x30] sm:$0xff] %vm84_vm0, %v2111_v62  ;;  %4184 = vpow2.f32 %v1931_v48  ;;  %v1849_v48 = vsub.f32 %v7180_v52, %v6014_v37  ;;  %v7186_v52 = vld [vmem:[#allocation22_spill] sm:$0xff] }
 0x498   :  { %2679 = vperm.xlu2 %4076, %v6058_v11  }
 0x49d   :  { %v4185_v20 = vpop.eup %4184 }
 0x4a1   :  { %v2053_v27 = vpop.xlane.xlu0 %2052 }
 0x4a2   :  { %v2119_v42 = vadd.f32 %v2053_v27, %v1639_v2  ;;  %v2041_v62 = vpop.xlane.xlu2 %2040  ;;  %v7178_v2 = vld [vmem:[#allocation56_spill] sm:$0xff] }
 0x4a3   :  { %v2115_v16 = vadd.f32 %v2041_v62, %v1635_v45  ;;  %v2708_v27 = vsub.f32 %v7178_v2, %v5948_v15  ;;  %v2045_v45 = vadd.f32 %v4185_v20, %v4183_v34  ;;  %v7181_v62 = vld [vmem:[#allocation70_spill] sm:$0xff]  ;;  %v1945_v2 = vmul.f32 1.442695, %v1849_v48  ;;  %v7184_v34 = vld [vmem:[#allocation173_spill] sm:$0xff] }
 0x4a4   :  { %2152 = vst.msk [vmem:[#allocation3 + $0x70] sm:$0xff] %vm84_vm0, %v2119_v42 }
 0x4a5   :  { %2148 = vst.msk [vmem:[#allocation3 + $0x50] sm:$0xff] %vm84_vm0, %v2115_v16  ;;  %v2798_v4 = vmul.f32 1.442695, %v2708_v27  ;;  %v1850_v16 = vsub.f32 %v7181_v62, %v6014_v37  ;;  %v7185_v37 = vld [vmem:[#allocation21_spill] sm:$0xff] }
 0x4a6   :  { %v2686_v20 = vsub.f32 %v7185_v37, %v7184_v34 }
 0x4ac   :  { %v1775_v54 = vpop.permute.xlu1 %1774 }
 0x4ad   :  { %v1863_v23 = vsub.f32 %v7176_v57, %v1775_v54  ;;  %v1864_v19 = vsub.f32 %v7177_v46, %v1775_v54  ;;  %v7182_v57 = vld [vmem:[#allocation92_spill] sm:$0xff]  ;;  %v7183_v46 = vld [vmem:[#allocation93_spill] sm:$0xff] }
 0x4af   :  { %v1973_v51 = vmul.f32 1.442695, %v1863_v23  ;;  %v1975_v42 = vmul.f32 1.442695, %v1864_v19  ;;  %v2714_v23 = vsub.f32 %v7182_v57, %v6028_v53  ;;  %v2715_v19 = vsub.f32 %v7183_v46, %v6028_v53  ;;  %v7187_v57 = vld [vmem:[#allocation199_spill] sm:$0xff] }
 0x4b1   :  { %4186 = vpow2.f32 %v1973_v51  ;;  %v1947_v51 = vmul.f32 1.442695, %v1850_v16  ;;  %v2812_v3 = vmul.f32 1.442695, %v2715_v19  ;;  %v7189_v19 = vld [vmem:[#allocation28_spill] sm:$0xff] }
 0x4b2   :  { %4188 = vpow2.f32 %v1975_v42  ;;  %v2810_v42 = vmul.f32 1.442695, %v2714_v23  ;;  %v7188_v23 = vld [vmem:[#allocation27_spill] sm:$0xff] }
 0x4b3   :  { %4190 = vpow2.f32 %v2798_v4 }
 0x4b4   :  { %4192 = vpow2.f32 %v2800_v21  ;;  %v2754_v21 = vmul.f32 1.442695, %v2686_v20 }
 0x4b5   :  { %4194 = vpow2.f32 %v1945_v2  ;;  %v2693_v2 = vsub.f32 %v7189_v19, %v7187_v57  ;;  %v7195_v19 = vld [vmem:[#allocation37_spill] sm:$0xff] }
 0x4b6   :  { %4196 = vpow2.f32 %v1947_v51 }
 0x4b7   :  { %v4187_v54 = vpop.eup %4186  ;;  %2046 = vadd.xlane.f32.xlu1 %v2045_v45  ;;  %v2687_v45 = vsub.f32 %v7186_v52, %v7184_v34  ;;  %4198 = vpow2.f32 %v2810_v42  ;;  %v7190_v34 = vld [vmem:[#allocation152_spill] sm:$0xff] }
 0x4b8   :  { %v4189_v15 = vpop.eup %4188  ;;  %4200 = vpow2.f32 %v2812_v3  ;;  %v2768_v3 = vmul.f32 1.442695, %v2693_v2  ;;  %v1546_v37 = vsub.f32 %v7190_v34, %v5577_v43  ;;  %v7192_v52 = vld [vmem:[#allocation100_spill] sm:$0xff]  ;;  %v2698_v2 = vsub.f32 %v7195_v19, %v5853_v14  ;;  %v7203_v19 = vld [vmem:[#allocation49_spill] sm:$0xff] }
 0x4b9   :  { %v2078_v27 = vadd.f32 %v4189_v15, %v4187_v54  ;;  %v4191_v18 = vpop.eup %4190  ;;  %v2756_v48 = vmul.f32 1.442695, %v2687_v45  ;;  %4202 = vpow2.f32 %v2754_v21  ;;  %v2692_v15 = vsub.f32 %v7188_v23, %v7187_v57  ;;  %v7193_v21 = vld [vmem:[#allocation118_spill] sm:$0xff] }
 0x4ba   :  { %v4193_v4 = vpop.eup %4192 }
 0x4bb   :  { %2079 = vadd.xlane.f32.xlu0 %v2078_v27  ;;  %v2913_v53 = vadd.f32 %v4193_v4, %v4191_v18  ;;  %v4195_v62 = vpop.eup %4194  ;;  %4204 = vpow2.f32 %v2756_v48  ;;  %v2766_v51 = vmul.f32 1.442695, %v2692_v15  ;;  %v7191_v4 = vld [vmem:[#allocation102_spill] sm:$0xff]  ;;  %v7194_v48 = vld [vmem:[#allocation119_spill] sm:$0xff] }
 0x4bc   :  { %v4197_v16 = vpop.eup %4196  ;;  %v1538_v45 = vsub.f32 %v7192_v52, %v7191_v4  ;;  %v2778_v52 = vmul.f32 1.442695, %v2698_v2  ;;  %v2705_v2 = vsub.f32 %v7203_v19, %v5925_v12  ;;  %v3102_v19 = vld [vmem:[#allocation3 + $0x8] sm:$0xff] }
 0x4bd   :  { %v4199_v54 = vpop.eup %4198  ;;  %v2057_v27 = vadd.f32 %v4197_v16, %v4195_v62  ;;  %4206 = vpow2.f32 %v2766_v51  ;;  %v1856_v62 = vsub.f32 %v7194_v48, %v6054_v10  ;;  %v1595_v16 = vmul.f32 1.442695, %v1546_v37  ;;  %v6203_v37 = vpop.permute.xlu1 %2639 }
 0x4be   :  { %v4201_v46 = vpop.eup %4200  ;;  %4208 = vpow2.f32 %v2768_v3  ;;  %v1579_v57 = vmul.f32 1.442695, %v1538_v45  ;;  %v7198_v3 = vld [vmem:[#allocation71_spill] sm:$0xff]  ;;  %v1514_v45 = vld [vmem:[#allocation3 + $0x88] sm:$0xff] }
 0x4bf   :  { %v2922_v42 = vadd.f32 %v4201_v46, %v4199_v54  ;;  %v4203_v18 = vpop.eup %4202  ;;  %v1959_v43 = vmul.f32 1.442695, %v1856_v62  ;;  %4210 = vpow2.f32 %v1595_v16  ;;  %v7200_v62 = vld [vmem:[#allocation80_spill] sm:$0xff] }
 0x4c0   :  { %4212 = vpow2.f32 %v1579_v57 }
 0x4c1   :  { %2058 = vadd.xlane.f32.xlu2 %v2057_v27  ;;  %v4205_v20 = vpop.eup %4204  ;;  %v6196_v27 = vpop.permute.xlu0 %2674 }
 0x4c2   :  { %v2880_v54 = vadd.f32 %v4205_v20, %v4203_v18 }
 0x4c3   :  { %2914 = vadd.xlane.f32.xlu0 %v2913_v53  ;;  %v1855_v53 = vsub.f32 %v7193_v21, %v6054_v10  ;;  %v4207_v15 = vpop.eup %4206  ;;  %v7196_v10 = vld [vmem:[#allocation38_spill] sm:$0xff] }
 0x4c4   :  { %v4209_v46 = vpop.eup %4208  ;;  %v2699_v51 = vsub.f32 %v7196_v10, %v5853_v14  ;;  %v7201_v14 = vld [vmem:[#allocation78_spill] sm:$0xff] }
 0x4c5   :  { %v1957_v23 = vmul.f32 1.442695, %v1855_v53  ;;  %v2889_v20 = vadd.f32 %v4209_v46, %v4207_v15  ;;  %v4211_v4 = vpop.eup %4210  ;;  %v2398_v16 = vsub.f32 %v7201_v14, %v7200_v62  ;;  %v6215_v14 = vpop.permute.xlu2 %1799 }
 0x4c6   :  { %v4213_v21 = vpop.eup %4212  ;;  %v2780_v53 = vmul.f32 1.442695, %v2699_v51 }
 0x4c7   :  { %4214 = vpow2.f32 %v1957_v23  ;;  %v1642_v23 = vmul.f32 %v4211_v4, %v1514_v45  ;;  %v2434_v51 = vmul.f32 1.442695, %v2398_v16 }
 0x4c8   :  { %4216 = vpow2.f32 %v1959_v43  ;;  %v7202_v43 = vld [vmem:[#allocation48_spill] sm:$0xff] }
 0x4c9   :  { %2881 = vadd.xlane.f32.xlu2 %v2880_v54  ;;  %v1506_v54 = vld [vmem:[#allocation3 + $0x48] sm:$0xff]  ;;  %v2704_v15 = vsub.f32 %v7202_v43, %v5925_v12  ;;  %v2792_v43 = vmul.f32 1.442695, %v2705_v2 }
 0x4cb   :  { %2923 = vadd.xlane.f32.xlu0 %v2922_v42  ;;  %v7197_v42 = vld [vmem:[#allocation68_spill] sm:$0xff]  ;;  %v2790_v45 = vmul.f32 1.442695, %v2704_v15 }
 0x4cc   :  { %v7199_v18 = vsub.f32 %v7197_v42, %v7198_v3  ;;  %v1634_v42 = vmul.f32 %v4213_v21, %v1506_v54  ;;  %v7206_v21 = vld [vmem:[#allocation178_spill] sm:$0xff] }
 0x4cd   :  { %v4215_v48 = vpop.eup %4214 }
 0x4ce   :  { %v2428_v34 = vmul.f32 1.442695, %v7199_v18  ;;  %v4217_v57 = vpop.eup %4216 }
 0x4cf   :  { %v2066_v18 = vadd.f32 %v4217_v57, %v4215_v48  ;;  %v1549_v48 = vsub.f32 %v7206_v21, %v7123_v31 }
 0x4d0   :  { %1804 = vperm.xlu1 %4075, %v5974_v36   ;;  %4218 = vpow2.f32 %v2428_v34  ;;  %v7204_v34 = vld [vmem:[#allocation127_spill] sm:$0xff] }
 0x4d1   :  { %2890 = vadd.xlane.f32.xlu2 %v2889_v20  ;;  %4220 = vpow2.f32 %v2778_v52  ;;  %v7205_v20 = vld [vmem:[#allocation125_spill] sm:$0xff] }
 0x4d2   :  { %4222 = vpow2.f32 %v2780_v53  ;;  %v1542_v62 = vsub.f32 %v7205_v20, %v7204_v34  ;;  %v2363_v53 = vld [vmem:[#allocation5 + $0x8] sm:$0xff]  ;;  %v1601_v34 = vmul.f32 1.442695, %v1549_v48  ;;  %v6231_v48 = vpop.permute.xlu2 %2664 }
 0x4d3   :  { %4224 = vpow2.f32 %v2434_v51 }
 0x4d4   :  { %v1587_v54 = vmul.f32 1.442695, %v1542_v62  ;;  %4226 = vpow2.f32 %v2790_v45  ;;  %v7211_v62 = vld [vmem:[#allocation108_spill] sm:$0xff] }
 0x4d5   :  { %4228 = vpow2.f32 %v2792_v43 }
 0x4d6   :  { %v4219_v52 = vpop.eup %4218  ;;  %4230 = vpow2.f32 %v1587_v54 }
 0x4d7   :  { %v4221_v12 = vpop.eup %4220  ;;  %v2491_v57 = vmul.f32 %v4219_v52, %v2363_v53  ;;  %4232 = vlog2.f32 %v3102_v19  ;;  %v2366_v53 = vld [vmem:[#allocation5 + $0x20] sm:$0xff] }
 0x4d8   :  { %2669 = vperm.xlu1 %4075, %v5969_v50   ;;  %v4223_v16 = vpop.eup %4222  ;;  %4234 = vpow2.f32 %v1601_v34  ;;  %v7216_v19 = vld [vmem:[#allocation61_spill] sm:$0xff] }
 0x4d9   :  { %2067 = vadd.xlane.f32.xlu2 %v2066_v18  ;;  %v7210_v18 = vld [vmem:[#allocation88_spill] sm:$0xff]  ;;  %v2898_v20 = vadd.f32 %v4223_v16, %v4221_v12  ;;  %v4225_v31 = vpop.eup %4224 }
 0x4da   :  { %v4227_v21 = vpop.eup %4226  ;;  %v7215_v16 = vld [vmem:[#allocation60_spill] sm:$0xff] }
 0x4db   :  { %v4229_v12 = vpop.eup %4228  ;;  %v2710_v54 = vsub.f32 %v7215_v16, %v6009_v44  ;;  %v3105_v16 = vld [vmem:[#allocation3 + $0x20] sm:$0xff] }
 0x4dd   :  { %v2802_v11 = vmul.f32 1.442695, %v2710_v54 }
 0x4df   :  { %v2062_v46 = vpop.xlane.xlu0 %2061  ;;  %v2038_v3 = vpop.xlane.xlu1 %2037 }
 0x4e0   :  { %v2122_v10 = vadd.f32 %v2062_v46, %v1642_v23  ;;  %v2114_v4 = vadd.f32 %v2038_v3, %v1634_v42  ;;  %v7207_v23 = vld [vmem:[#allocation147_spill] sm:$0xff]  ;;  %v7209_v3 = vld [vmem:[#allocation90_spill] sm:$0xff] }
 0x4e1   :  { %v1861_v46 = vsub.f32 %v7207_v23, %v6096_v49  ;;  %v2401_v51 = vsub.f32 %v7210_v18, %v7209_v3  ;;  %2899 = vadd.xlane.f32.xlu2 %v2898_v20  ;;  %v7214_v23 = vld [vmem:[#allocation17_spill] sm:$0xff]  ;;  %v7217_v18 = vld [vmem:[#allocation62_spill] sm:$0xff] }
 0x4e2   :  { %2155 = vst.msk [vmem:[#allocation3 + $0x88] sm:$0xff] %vm84_vm0, %v2122_v10  ;;  %v7208_v10 = vld [vmem:[#allocation148_spill] sm:$0xff] }
 0x4e3   :  { %2147 = vst.msk [vmem:[#allocation3 + $0x48] sm:$0xff] %vm84_vm0, %v2114_v4  ;;  %v1862_v2 = vsub.f32 %v7208_v10, %v6096_v49  ;;  %v7212_v4 = vld [vmem:[#allocation106_spill] sm:$0xff]  ;;  %v1969_v45 = vmul.f32 1.442695, %v1861_v46  ;;  %v2440_v49 = vmul.f32 1.442695, %v2401_v51  ;;  %v2494_v10 = vmul.f32 %v4225_v31, %v2366_v53 }
 0x4e4   :  { %v2404_v52 = vsub.f32 %v7212_v4, %v7211_v62  ;;  %v2711_v46 = vsub.f32 %v7216_v19, %v6009_v44  ;;  %v1847_v51 = vsub.f32 %v7217_v18, %v5923_v1  ;;  %v7218_v4 = vld [vmem:[#allocation63_spill] sm:$0xff]  ;;  %v1510_v53 = vld [vmem:[#allocation3 + $0x68] sm:$0xff] }
 0x4e5   :  { %v1971_v43 = vmul.f32 1.442695, %v1862_v2  ;;  %4236 = vpow2.f32 %v1969_v45  ;;  %v4231_v2 = vpop.eup %4230  ;;  %v7219_v45 = vld [vmem:[#allocation18_spill] sm:$0xff] }
 0x4e6   :  { %v4233_v34 = vpop.eup %4232 }
 0x4e7   :  { %v2879_v15 = vpop.xlane.xlu0 %2878  ;;  %4238 = vpow2.f32 %v1971_v43  ;;  %v4235_v44 = vpop.eup %4234  ;;  %v3136_v19 = vmul.f32 0.6931472, %v4233_v34 }
 0x4e8   :  { %v2971_v42 = vadd.f32 %v2879_v15, %v2491_v57  ;;  %v7213_v57 = vld [vmem:[#allocation149_spill] sm:$0xff]  ;;  %4240 = vpow2.f32 %v2440_v49 }
 0x4e9   :  { %v2682_v15 = vsub.f32 %v7214_v23, %v7213_v57  ;;  %v1848_v23 = vsub.f32 %v7218_v4, %v5923_v1  ;;  %v2683_v43 = vsub.f32 %v7219_v45, %v7213_v57  ;;  %v1517_v49 = vld [vmem:[#allocation3 + $0xa0] sm:$0xff]  ;;  %v1638_v1 = vmul.f32 %v4231_v2, %v1510_v53  ;;  %v3070_v57 = vld [vmem:[#allocation2 + $0x8] sm:$0xff] }
 0x4ea   :  { %3003 = vst.msk [vmem:[#allocation5 + $0x8] sm:$0xff] %vm84_vm0, %v2971_v42  ;;  %v2446_v42 = vmul.f32 1.442695, %v2404_v52  ;;  %v2907_v52 = vadd.f32 %v4229_v12, %v4227_v21  ;;  %v7220_v12 = vld [vmem:[#allocation104_spill] sm:$0xff]  ;;  %v1645_v4 = vmul.f32 %v4235_v44, %v1517_v49  ;;  %v3198_v34 = vadd.f32 %v3136_v19, %v3070_v57  ;;  %v7221_v2 = vld [vmem:[#allocation105_spill] sm:$0xff] }
 0x4eb   :  { %v2746_v62 = vmul.f32 1.442695, %v2682_v15  ;;  %v1941_v15 = vmul.f32 1.442695, %v1847_v51  ;;  %v1943_v21 = vmul.f32 1.442695, %v1848_v23  ;;  %v2716_v54 = vsub.f32 %v7220_v12, %v6086_v22  ;;  %v2050_v18 = vpop.xlane.xlu2 %2049 }
 0x4ec   :  { %2908 = vadd.xlane.f32.xlu2 %v2907_v52  ;;  %v7223_v12 = vld [vmem:[#allocation23_spill] sm:$0xff] }
 0x4ef   :  { %v2888_v3 = vpop.xlane.xlu0 %2887 }
 0x4f0   :  { %v2974_v20 = vadd.f32 %v2888_v3, %v2494_v10  ;;  %v2804_v10 = vmul.f32 1.442695, %v2711_v46  ;;  %v4237_v3 = vpop.eup %4236  ;;  %v2748_v46 = vmul.f32 1.442695, %v2683_v43 }
 0x4f1   :  { %v3262_v31 = vld [vmem:[#allocation5 + $0x8] sm:$0xff] }
 0x4f2   :  { %4242 = vlog2.f32 %v3262_v31  ;;  %3006 = vst.msk [vmem:[#allocation5 + $0x20] sm:$0xff] %vm84_vm0, %v2974_v20  ;;  %v4239_v20 = vpop.eup %4238 }
 0x4f3   :  { %4244 = vpow2.f32 %v2446_v42  ;;  %v2118_v42 = vadd.f32 %v2050_v18, %v1638_v1  ;;  %v4241_v31 = vpop.eup %4240  ;;  %v2075_v49 = vadd.f32 %v4239_v20, %v4237_v3  ;;  %v7222_v1 = vld [vmem:[#allocation153_spill] sm:$0xff]  ;;  %v7225_v18 = vld [vmem:[#allocation190_spill] sm:$0xff]  ;;  %v2369_v20 = vld [vmem:[#allocation5 + $0x38] sm:$0xff] }
 0x4f4   :  { %4246 = vlog2.f32 %v3105_v16 }
 0x4f5   :  { %4248 = vpow2.f32 %v2746_v62  ;;  %v2717_v62 = vsub.f32 %v7221_v2, %v6086_v22  ;;  %2151 = vst.msk [vmem:[#allocation3 + $0x68] sm:$0xff] %vm84_vm0, %v2118_v42  ;;  %v7224_v22 = vld [vmem:[#allocation189_spill] sm:$0xff]  ;;  %2076 = vadd.xlane.f32.xlu2 %v2075_v49 }
 0x4f6   :  { %4250 = vpow2.f32 %v2802_v11  ;;  %v2814_v11 = vmul.f32 1.442695, %v2716_v54  ;;  %v7226_v54 = vld [vmem:[#allocation137_spill] sm:$0xff] }
 0x4f7   :  { %4252 = vpow2.f32 %v2804_v10  ;;  %v2071_v52 = vpop.xlane.xlu0 %2070  ;;  %v1790_v45 = vpop.permute.xlu1 %1789  ;;  %v3230_v10 = vld [vmem:[#allocation4 + $0x8] sm:$0xff]  ;;  %v2720_v57 = vsub.f32 %v7226_v54, %v6069_v63  ;;  %v2816_v2 = vmul.f32 1.442695, %v2717_v62 }
 0x4f8   :  { %v4243_v51 = vpop.eup %4242  ;;  %4254 = vpow2.f32 %v1941_v15  ;;  %v2125_v23 = vadd.f32 %v2071_v52, %v1645_v4  ;;  %v2688_v15 = vsub.f32 %v7223_v12, %v7222_v1  ;;  %v1869_v19 = vsub.f32 %v7224_v22, %v1790_v45  ;;  %v7227_v22 = vld [vmem:[#allocation138_spill] sm:$0xff] }
 0x4f9   :  { %v6249_v16 = vpop.eup %4244  ;;  %4256 = vpow2.f32 %v1943_v21  ;;  %v3296_v53 = vmul.f32 0.6931472, %v4243_v51  ;;  %v3265_v44 = vld [vmem:[#allocation5 + $0x20] sm:$0xff]  ;;  %v1870_v42 = vsub.f32 %v7225_v18, %v1790_v45  ;;  %v3390_v21 = vld [vmem:[#allocation6 + $0x8] sm:$0xff]  ;;  %v2721_v50 = vsub.f32 %v7227_v22, %v6069_v63 }
 0x4fa   :  { %v4247_v43 = vpop.eup %4246  ;;  %4258 = vlog2.f32 %v3265_v44  ;;  %2158 = vst.msk [vmem:[#allocation3 + $0xa0] sm:$0xff] %vm84_vm0, %v2125_v23  ;;  %v3422_v51 = vsub.f32 %v3198_v34, %v3390_v21  ;;  %v1985_v44 = vmul.f32 1.442695, %v1869_v19  ;;  %v2758_v54 = vmul.f32 1.442695, %v2688_v15  ;;  %v7229_v34 = vld [vmem:[#allocation171_spill] sm:$0xff] }
 0x4fb   :  { %v6256_v4 = vpop.eup %4248  ;;  %4260 = vpow2.f32 %v2748_v46  ;;  %v3358_v3 = vadd.f32 %v3296_v53, %v3230_v10  ;;  %v1987_v12 = vmul.f32 1.442695, %v1870_v42  ;;  %v3142_v45 = vmul.f32 0.6931472, %v4247_v43  ;;  %v7228_v46 = vld [vmem:[#allocation24_spill] sm:$0xff]  ;;  %v3073_v63 = vld [vmem:[#allocation2 + $0x20] sm:$0xff] }
 0x4fc   :  { %v4251_v52 = vpop.eup %4250  ;;  %4262 = vpow2.f32 %v2814_v11  ;;  %v2689_v29 = vsub.f32 %v7228_v46, %v7222_v1  ;;  %v2497_v53 = vmul.f32 %v4241_v31, %v2369_v20  ;;  %v2822_v10 = vmul.f32 1.442695, %v2720_v57  ;;  %v7230_v11 = vld [vmem:[#allocation172_spill] sm:$0xff]  ;;  %v3233_v22 = vld [vmem:[#allocation4 + $0x20] sm:$0xff] }
 0x4fd   :  { %v4253_v23 = vpop.eup %4252  ;;  %v3454_v18 = vsub.f32 %v3358_v3, %v3390_v21  ;;  %4264 = vpow2.f32 %v1985_v44  ;;  %v1867_v62 = vsub.f32 %v7229_v34, %v6151_v32  ;;  %v1868_v43 = vsub.f32 %v7230_v11, %v6151_v32  ;;  %v3108_v31 = vld [vmem:[#allocation3 + $0x38] sm:$0xff]  ;;  %v7233_v34 = vld [vmem:[#allocation110_spill] sm:$0xff]  ;;  %v7234_v11 = vld [vmem:[#allocation141_spill] sm:$0xff] }
 0x4fe   :  { %v4255_v36 = vpop.eup %4254  ;;  %4266 = vpow2.f32 %v1987_v12  ;;  %v2916_v3 = vadd.f32 %v4253_v23, %v4251_v52  ;;  %v2824_v15 = vmul.f32 1.442695, %v2721_v50  ;;  %v3201_v44 = vadd.f32 %v3142_v45, %v3073_v63  ;;  %v3393_v23 = vld [vmem:[#allocation6 + $0x20] sm:$0xff] }
 0x4ff   :  { %v4257_v49 = vpop.eup %4256  ;;  %v3486_v19 = vadd.f32 %v3454_v18, %v3422_v51  ;;  %v2897_v42 = vpop.xlane.xlu0 %2896  ;;  %4268 = vpow2.f32 %v2816_v2  ;;  %v2760_v46 = vmul.f32 1.442695, %v2689_v29  ;;  %v7231_v2 = vld [vmem:[#allocation160_spill] sm:$0xff]  ;;  %v1981_v32 = vmul.f32 1.442695, %v1867_v62 }
 0x500   :  { %v4259_v25 = vpop.eup %4258  ;;  %v2977_v21 = vadd.f32 %v2897_v42, %v2497_v53  ;;  %4270 = vpow2.f32 %v2758_v54  ;;  %v2054_v51 = vadd.f32 %v4257_v49, %v4255_v36  ;;  %v2726_v18 = vsub.f32 %v7231_v2, %v6110_v61  ;;  %2917 = vadd.xlane.f32.xlu2 %v2916_v3  ;;  %v7232_v54 = vld [vmem:[#allocation161_spill] sm:$0xff] }
 0x501   :  { %v4261_v1 = vpop.eup %4260  ;;  %v3518_v20 = vmul.f32 0.5, %v3486_v19  ;;  %v3302_v57 = vmul.f32 0.6931472, %v4259_v25  ;;  %4272 = vpow2.f32 %v2822_v10  ;;  %v2372_v25 = vld [vmem:[#allocation5 + $0x50] sm:$0xff]  ;;  %v1983_v29 = vmul.f32 1.442695, %v1868_v43 }
 0x502   :  { %3009 = vst.msk [vmem:[#allocation5 + $0x38] sm:$0xff] %vm84_vm0, %v2977_v21  ;;  %v4263_v12 = vpop.eup %4262  ;;  %4274 = vlog2.f32 %v3108_v31  ;;  %2055 = vadd.xlane.f32.xlu1 %v2054_v51  ;;  %v3425_v45 = vsub.f32 %v3201_v44, %v3393_v23  ;;  %v2727_v53 = vsub.f32 %v7232_v54, %v6110_v61  ;;  %v1853_v62 = vsub.f32 %v7233_v34, %v6001_v9  ;;  %v7235_v61 = vld [vmem:[#allocation142_spill] sm:$0xff]  ;;  %v7240_v34 = vld [vmem:[#allocation165_spill] sm:$0xff] }
 0x503   :  { %3550 = vst.msk [vmem:[%s6647_s4 + $0x8] sm:$0xff] %vm84_vm0, %v3518_v20  ;;  %v3361_v50 = vadd.f32 %v3302_v57, %v3233_v22  ;;  %v4265_v52 = vpop.eup %4264  ;;  %4276 = vpow2.f32 %v2824_v15  ;;  %v2500_v19 = vmul.f32 %v6249_v16, %v2372_v25  ;;  %v2834_v63 = vmul.f32 1.442695, %v2726_v18  ;;  %v7236_v57 = vld [vmem:[#allocation111_spill] sm:$0xff] }
 0x504   :  { %v4267_v36 = vpop.eup %4266  ;;  %4278 = vpow2.f32 %v2760_v46  ;;  %v2722_v43 = vsub.f32 %v7234_v11, %v6139_v13  ;;  %v2723_v44 = vsub.f32 %v7235_v61, %v6139_v13  ;;  %v1854_v22 = vsub.f32 %v7236_v57, %v6001_v9  ;;  %v3111_v46 = vld [vmem:[#allocation3 + $0x50] sm:$0xff]  ;;  %v7241_v11 = vld [vmem:[#allocation166_spill] sm:$0xff] }
 0x505   :  { %v3457_v49 = vsub.f32 %v3361_v50, %v3393_v23  ;;  %v4269_v10 = vpop.eup %4268  ;;  %v2087_v42 = vadd.f32 %v4267_v36, %v4265_v52  ;;  %4280 = vpow2.f32 %v1981_v32  ;;  %v2836_v16 = vmul.f32 1.442695, %v2727_v53  ;;  %v7237_v23 = vld [vmem:[#allocation177_spill] sm:$0xff]  ;;  %v7239_v53 = vld [vmem:[#allocation32_spill] sm:$0xff] }
 0x506   :  { %v4271_v15 = vpop.eup %4270  ;;  %4282 = vpow2.f32 %v1983_v29  ;;  %v2925_v18 = vadd.f32 %v4269_v10, %v4263_v12  ;;  %v1953_v50 = vmul.f32 1.442695, %v1853_v62  ;;  %v2874_v25 = vadd.f32 %v4261_v1, %v6256_v4  ;;  %v7238_v29 = vld [vmem:[#allocation31_spill] sm:$0xff] }
 0x507   :  { %v3489_v21 = vadd.f32 %v3457_v49, %v3425_v45  ;;  %v2906_v3 = vpop.xlane.xlu0 %2905  ;;  %2088 = vadd.xlane.f32.xlu0 %v2087_v42  ;;  %v4273_v20 = vpop.eup %4272  ;;  %v2826_v13 = vmul.f32 1.442695, %v2722_v43  ;;  %v2694_v12 = vsub.f32 %v7238_v29, %v7237_v23  ;;  %v2828_v36 = vmul.f32 1.442695, %v2723_v44  ;;  %v3076_v42 = vld [vmem:[#allocation2 + $0x38] sm:$0xff] }
 0x508   :  { %v2980_v31 = vadd.f32 %v2906_v3, %v2500_v19  ;;  %v4275_v32 = vpop.eup %4274  ;;  %2926 = vadd.xlane.f32.xlu2 %v2925_v18  ;;  %v1955_v54 = vmul.f32 1.442695, %v1854_v22  ;;  %v2695_v49 = vsub.f32 %v7239_v53, %v7237_v23  ;;  %v2728_v62 = vsub.f32 %v7240_v34, %v6203_v37 }
 0x509   :  { %v3521_v51 = vmul.f32 0.5, %v3489_v21  ;;  %v3268_v2 = vld [vmem:[#allocation5 + $0x38] sm:$0xff]  ;;  %v4277_v52 = vpop.eup %4276  ;;  %v3148_v4 = vmul.f32 0.6931472, %v4275_v32  ;;  %v2729_v43 = vsub.f32 %v7241_v11, %v6203_v37  ;;  %v7243_v37 = vld [vmem:[#allocation41_spill] sm:$0xff] }
 0x50a   :  { %4284 = vlog2.f32 %v3268_v2  ;;  %3012 = vst.msk [vmem:[#allocation5 + $0x50] sm:$0xff] %vm84_vm0, %v2980_v31  ;;  %v4279_v9 = vpop.eup %4278  ;;  %2875 = vadd.xlane.f32.xlu1 %v2874_v25  ;;  %v2931_v10 = vadd.f32 %v4277_v52, %v4273_v20  ;;  %v3236_v20 = vld [vmem:[#allocation4 + $0x38] sm:$0xff]  ;;  %v2772_v22 = vmul.f32 1.442695, %v2695_v49 }
 0x50b   :  { %4286 = vpow2.f32 %v2834_v63  ;;  %3553 = vst.msk [vmem:[%s6647_s4 + $0x20] sm:$0xff] %vm84_vm0, %v3521_v51  ;;  %v4281_v45 = vpop.eup %4280  ;;  %v2770_v63 = vmul.f32 1.442695, %v2694_v12  ;;  %v3204_v3 = vadd.f32 %v3148_v4, %v3076_v42  ;;  %v2838_v51 = vmul.f32 1.442695, %v2728_v62  ;;  %v3396_v32 = vld [vmem:[#allocation6 + $0x38] sm:$0xff] }
 0x50c   :  { %4288 = vlog2.f32 %v3111_v46  ;;  %v4283_v1 = vpop.eup %4282  ;;  %v2840_v52 = vmul.f32 1.442695, %v2729_v43  ;;  %v7245_v4 = vld [vmem:[#allocation197_spill] sm:$0xff]  ;;  %v7246_v62 = vld [vmem:[#allocation198_spill] sm:$0xff] }
 0x50d   :  { %4290 = vpow2.f32 %v2836_v16  ;;  %v2084_v31 = vadd.f32 %v4283_v1, %v4281_v45  ;;  %v2883_v16 = vadd.f32 %v4279_v9, %v4271_v15  ;;  %v3428_v23 = vsub.f32 %v3204_v3, %v3396_v32  ;;  %v7244_v15 = vld [vmem:[#allocation42_spill] sm:$0xff]  ;;  %v3239_v3 = vld [vmem:[#allocation4 + $0x50] sm:$0xff] }
 0x50e   :  { %4292 = vpow2.f32 %v1953_v50  ;;  %v7242_v50 = vld [vmem:[#allocation202_spill] sm:$0xff]  ;;  %v1873_v1 = vsub.f32 %v7245_v4, %v6215_v14  ;;  %v7253_v4 = vld [vmem:[#allocation144_spill] sm:$0xff] }
 0x50f   :  { %4294 = vpow2.f32 %v2826_v13  ;;  %2932 = vadd.xlane.f32.xlu0 %v2931_v10  ;;  %v2700_v25 = vsub.f32 %v7243_v37, %v7242_v50  ;;  %v2701_v9 = vsub.f32 %v7244_v15, %v7242_v50  ;;  %v3079_v10 = vld [vmem:[#allocation2 + $0x50] sm:$0xff]  ;;  %v7249_v50 = vld [vmem:[#allocation208_spill] sm:$0xff] }
 0x510   :  { %v4285_v19 = vpop.eup %4284  ;;  %4296 = vpow2.f32 %v2828_v36  ;;  %2085 = vadd.xlane.f32.xlu2 %v2084_v31  ;;  %v1552_v37 = vsub.f32 %v7249_v50, %v7139_v55 }
 0x511   :  { %v4287_v21 = vpop.eup %4286  ;;  %4298 = vpow2.f32 %v1955_v54  ;;  %v3308_v61 = vmul.f32 0.6931472, %v4285_v19  ;;  %v3271_v44 = vld [vmem:[#allocation5 + $0x50] sm:$0xff]  ;;  %v2782_v34 = vmul.f32 1.442695, %v2700_v25  ;;  %v1874_v19 = vsub.f32 %v7246_v62, %v6215_v14 }
 0x512   :  { %v4289_v57 = vpop.eup %4288  ;;  %4300 = vlog2.f32 %v3271_v44  ;;  %2884 = vadd.xlane.f32.xlu1 %v2883_v16  ;;  %v2784_v31 = vmul.f32 1.442695, %v2701_v9  ;;  %v7252_v9 = vld [vmem:[#allocation192_spill] sm:$0xff] }
 0x513   :  { %v4291_v46 = vpop.eup %4290  ;;  %v3364_v2 = vadd.f32 %v3308_v61, %v3236_v20  ;;  %4302 = vpow2.f32 %v2770_v63  ;;  %v3154_v29 = vmul.f32 0.6931472, %v4289_v57  ;;  %v7248_v61 = vld [vmem:[#allocation120_spill] sm:$0xff] }
 0x514   :  { %v4293_v18 = vpop.eup %4292  ;;  %4304 = vpow2.f32 %v2772_v22  ;;  %v2940_v45 = vadd.f32 %v4291_v46, %v4287_v21  ;;  %v7247_v21 = vld [vmem:[#allocation122_spill] sm:$0xff]  ;;  %v1993_v22 = vmul.f32 1.442695, %v1873_v1  ;;  %v3399_v46 = vld [vmem:[#allocation6 + $0x50] sm:$0xff]  ;;  %v1860_v1 = vsub.f32 %v7253_v4, %v6024_v60 }
 0x515   :  { %v4295_v13 = vpop.eup %4294  ;;  %v3460_v12 = vsub.f32 %v3364_v2, %v3396_v32  ;;  %4306 = vpow2.f32 %v2838_v51  ;;  %v3207_v42 = vadd.f32 %v3154_v29, %v3079_v10  ;;  %v1541_v44 = vsub.f32 %v7248_v61, %v7247_v21  ;;  %v2655_v2 = vpop.permute.xlu1 %2654 }
 0x516   :  { %v4297_v36 = vpop.eup %4296  ;;  %4308 = vpow2.f32 %v2840_v52  ;;  %v1995_v51 = vmul.f32 1.442695, %v1874_v19  ;;  %v1967_v21 = vmul.f32 1.442695, %v1860_v1 }
 0x517   :  { %v4299_v54 = vpop.eup %4298  ;;  %v3492_v53 = vadd.f32 %v3460_v12, %v3428_v23  ;;  %2941 = vadd.xlane.f32.xlu0 %v2940_v45  ;;  %v2934_v43 = vadd.f32 %v4297_v36, %v4295_v13  ;;  %4310 = vpow2.f32 %v2782_v34  ;;  %v1585_v13 = vmul.f32 1.442695, %v1541_v44  ;;  %v7250_v23 = vld [vmem:[#allocation143_spill] sm:$0xff]  ;;  %v7256_v44 = vld [vmem:[#allocation52_spill] sm:$0xff] }
 0x518   :  { %v4301_v49 = vpop.eup %4300  ;;  %v2063_v57 = vadd.f32 %v4299_v54, %v4293_v18  ;;  %v3431_v18 = vsub.f32 %v3207_v42, %v3399_v46  ;;  %4312 = vpow2.f32 %v2784_v31  ;;  %v1859_v29 = vsub.f32 %v7250_v23, %v6024_v60  ;;  %v7251_v12 = vld [vmem:[#allocation191_spill] sm:$0xff]  ;;  %v1815_v42 = vpop.permute.xlu2 %1814  ;;  %v7255_v60 = vld [vmem:[#allocation124_spill] sm:$0xff] }
 0x519   :  { %v3524_v63 = vmul.f32 0.5, %v3492_v53  ;;  %v3314_v11 = vmul.f32 0.6931472, %v4301_v49  ;;  %v4303_v20 = vpop.eup %4302  ;;  %2935 = vadd.xlane.f32.xlu2 %v2934_v43  ;;  %4314 = vpow2.f32 %v1993_v22  ;;  %v2734_v36 = vsub.f32 %v7251_v12, %v2655_v2  ;;  %v7254_v43 = vld [vmem:[#allocation126_spill] sm:$0xff] }
 0x51a   :  { %v4305_v16 = vpop.eup %4304  ;;  %2064 = vadd.xlane.f32.xlu1 %v2063_v57  ;;  %4316 = vpow2.f32 %v1995_v51  ;;  %v2735_v45 = vsub.f32 %v7252_v9, %v2655_v2  ;;  %v1607_v54 = vmul.f32 1.442695, %v1552_v37  ;;  %v1965_v49 = vmul.f32 1.442695, %v1859_v29  ;;  %v1520_v29 = vld [vmem:[#allocation3 + $0xb8] sm:$0xff]  ;;  %v7259_v9 = vld [vmem:[#allocation150_spill] sm:$0xff] }
 0x51b   :  { %3556 = vst.msk [vmem:[%s6647_s4 + $0x38] sm:$0xff] %vm84_vm0, %v3524_v63  ;;  %v3367_v14 = vadd.f32 %v3314_v11, %v3239_v3  ;;  %v4307_v32 = vpop.eup %4306  ;;  %4318 = vpow2.f32 %v1585_v13  ;;  %v2892_v10 = vadd.f32 %v4305_v16, %v4303_v20  ;;  %v2850_v62 = vmul.f32 1.442695, %v2734_v36 }
 0x51c   :  { %v4309_v52 = vpop.eup %4308  ;;  %v2852_v63 = vmul.f32 1.442695, %v2735_v45  ;;  %v2407_v3 = vsub.f32 %v7255_v60, %v7254_v43  ;;  %4320 = vpow2.f32 %v1607_v54  ;;  %v2706_v31 = vsub.f32 %v7256_v44, %v5855_v26  ;;  %v7263_v43 = vld [vmem:[#allocation76_spill] sm:$0xff] }
 0x51d   :  { %v3463_v25 = vsub.f32 %v3367_v14, %v3399_v46  ;;  %v2943_v53 = vadd.f32 %v4309_v52, %v4307_v32  ;;  %v4311_v34 = vpop.eup %4310  ;;  %4322 = vpow2.f32 %v1965_v49  ;;  %v1879_v57 = vsub.f32 %v5837_v6, %v1815_v42  ;;  %v1509_v14 = vld [vmem:[#allocation3 + $0x60] sm:$0xff]  ;;  %v7258_v6 = vld [vmem:[#allocation136_spill] sm:$0xff] }
 0x51e   :  { %v4313_v19 = vpop.eup %4312  ;;  %4324 = vpow2.f32 %v2850_v62  ;;  %v1880_v22 = vsub.f32 %v5839_v35, %v1815_v42  ;;  %v2452_v16 = vmul.f32 1.442695, %v2407_v3  ;;  %v7257_v46 = vld [vmem:[#allocation53_spill] sm:$0xff]  ;;  %v2794_v32 = vmul.f32 1.442695, %v2706_v31 }
 0x51f   :  { %v3495_v15 = vadd.f32 %v3463_v25, %v3431_v18  ;;  %v4315_v11 = vpop.eup %4314  ;;  %4326 = vpow2.f32 %v2852_v63  ;;  %v2707_v51 = vsub.f32 %v7257_v46, %v5855_v26  ;;  %v2901_v50 = vadd.f32 %v4313_v19, %v4311_v34  ;;  %v7261_v49 = vld [vmem:[#allocation65_spill] sm:$0xff] }
 0x520   :  { %v4317_v61 = vpop.eup %4316  ;;  %4328 = vpow2.f32 %v1967_v21  ;;  %v2005_v18 = vmul.f32 1.442695, %v1879_v57  ;;  %v1545_v13 = vsub.f32 %v7258_v6, %v5516_v30  ;;  %v2007_v23 = vmul.f32 1.442695, %v1880_v22  ;;  %v7260_v30 = vld [vmem:[#allocation64_spill] sm:$0xff]  ;;  %v2375_v21 = vld [vmem:[#allocation5 + $0x68] sm:$0xff]  ;;  %v6348_v22 = vpop.permute.xlu2 %2679 }
 0x521   :  { %v3527_v55 = vmul.f32 0.5, %v3495_v15  ;;  %2944 = vadd.xlane.f32.xlu2 %v2943_v53  ;;  %v4319_v20 = vpop.eup %4318  ;;  %v2093_v2 = vadd.f32 %v4317_v61, %v4315_v11  ;;  %4330 = vpow2.f32 %v2452_v16  ;;  %v2796_v36 = vmul.f32 1.442695, %v2707_v51  ;;  %v7262_v11 = vld [vmem:[#allocation77_spill] sm:$0xff]  ;;  %v7265_v57 = vld [vmem:[#allocation82_spill] sm:$0xff]  ;;  %v7266_v16 = vld [vmem:[#allocation167_spill] sm:$0xff] }
 0x522   :  { %2893 = vadd.xlane.f32.xlu1 %v2892_v10  ;;  %v4321_v37 = vpop.eup %4320  ;;  %v1637_v25 = vmul.f32 %v4319_v20, %v1509_v14  ;;  %v2410_v45 = vsub.f32 %v7259_v9, %v5565_v5  ;;  %4332 = vpow2.f32 %v2794_v32  ;;  %v1593_v1 = vmul.f32 1.442695, %v1545_v13  ;;  %v7267_v32 = vld [vmem:[#allocation168_spill] sm:$0xff]  ;;  %v7270_v9 = vld [vmem:[#allocation113_spill] sm:$0xff] }
 0x523   :  { %3559 = vst.msk [vmem:[%s6647_s4 + $0x50] sm:$0xff] %vm84_vm0, %v3527_v55  ;;  %v4323_v52 = vpop.eup %4322  ;;  %4334 = vpow2.f32 %v2005_v18  ;;  %v1648_v4 = vmul.f32 %v4321_v37, %v1520_v29  ;;  %v2712_v55 = vsub.f32 %v7260_v30, %v5927_v24  ;;  %v2713_v10 = vsub.f32 %v7261_v49, %v5927_v24  ;;  %v7264_v24 = vld [vmem:[#allocation83_spill] sm:$0xff]  ;;  %v7268_v18 = vld [vmem:[#allocation162_spill] sm:$0xff] }
 0x524   :  { %v4325_v12 = vpop.eup %4324  ;;  %4336 = vpow2.f32 %v2007_v23  ;;  %v2458_v19 = vmul.f32 1.442695, %v2410_v45  ;;  %v2396_v60 = vsub.f32 %v7263_v43, %v7262_v11  ;;  %v2399_v20 = vsub.f32 %v7265_v57, %v7264_v24 }
 0x525   :  { %v4327_v15 = vpop.eup %4326  ;;  %4338 = vpow2.f32 %v2796_v36  ;;  %v2806_v3 = vmul.f32 1.442695, %v2712_v55  ;;  %v2808_v44 = vmul.f32 1.442695, %v2713_v10  ;;  %v1865_v46 = vsub.f32 %v7266_v16, %v6062_v33  ;;  %v7271_v10 = vld [vmem:[#allocation145_spill] sm:$0xff] }
 0x526   :  { %v4329_v54 = vpop.eup %4328  ;;  %v2952_v62 = vadd.f32 %v4327_v15, %v4325_v12  ;;  %4340 = vpow2.f32 %v1593_v1  ;;  %v2436_v23 = vmul.f32 1.442695, %v2399_v20  ;;  %v3114_v12 = vld [vmem:[#allocation3 + $0x68] sm:$0xff] }
 0x527   :  { %v2072_v5 = vadd.f32 %v4329_v54, %v4323_v52  ;;  %v4331_v42 = vpop.eup %4330  ;;  %4342 = vpow2.f32 %v2458_v19  ;;  %v1977_v15 = vmul.f32 1.442695, %v1865_v46  ;;  %v2378_v54 = vld [vmem:[#allocation5 + $0x80] sm:$0xff]  ;;  %v7273_v46 = vld [vmem:[#allocation218_spill] sm:$0xff] }
 0x528   :  { %v4333_v63 = vpop.eup %4332  ;;  %v2503_v51 = vmul.f32 %v4331_v42, %v2375_v21  ;;  %4344 = vpow2.f32 %v2806_v3 }
 0x529   :  { %2094 = vadd.xlane.f32.xlu2 %v2093_v2  ;;  %v4335_v61 = vpop.eup %4334  ;;  %v2430_v2 = vmul.f32 1.442695, %v2396_v60  ;;  %4346 = vpow2.f32 %v2808_v44  ;;  %v3106_v60 = vld [vmem:[#allocation3 + $0x28] sm:$0xff] }
 0x52a   :  { %2902 = vadd.xlane.f32.xlu1 %v2901_v50  ;;  %v2047_v35 = vpop.xlane.xlu1 %2046  ;;  %v4337_v31 = vpop.eup %4336  ;;  %v1866_v50 = vsub.f32 %v7267_v32, %v6062_v33 }
 0x52b   :  { %v2117_v26 = vadd.f32 %v2047_v35, %v1637_v25  ;;  %v4339_v14 = vpop.eup %4338  ;;  %v1548_v25 = vsub.f32 %v7268_v18, %v5619_v59  ;;  %v2102_v6 = vadd.f32 %v4337_v31, %v4335_v61  ;;  %v7269_v35 = vld [vmem:[#allocation112_spill] sm:$0xff]  ;;  %4348 = vpow2.f32 %v2430_v2  ;;  %v2364_v61 = vld [vmem:[#allocation5 + $0x10] sm:$0xff] }
 0x52c   :  { %v4341_v13 = vpop.eup %4340  ;;  %v2718_v29 = vsub.f32 %v7269_v35, %v6011_v0  ;;  %v2910_v36 = vadd.f32 %v4339_v14, %v4333_v63  ;;  %v2719_v59 = vsub.f32 %v7270_v9, %v6011_v0  ;;  %v1979_v45 = vmul.f32 1.442695, %v1866_v50  ;;  %v7272_v0 = vld [vmem:[#allocation146_spill] sm:$0xff]  ;;  %v3103_v31 = vld [vmem:[#allocation3 + $0x10] sm:$0xff] }
 0x52d   :  { %2150 = vst.msk [vmem:[#allocation3 + $0x60] sm:$0xff] %vm84_vm0, %v2117_v26  ;;  %v1513_v26 = vld [vmem:[#allocation3 + $0x80] sm:$0xff]  ;;  %v4343_v33 = vpop.eup %4342  ;;  %4350 = vlog2.f32 %v3114_v12  ;;  %v2725_v42 = vsub.f32 %v7272_v0, %v6047_v7  ;;  %v7274_v50 = vld [vmem:[#allocation186_spill] sm:$0xff] }
 0x52e   :  { %v2080_v53 = vpop.xlane.xlu0 %2079  ;;  %v1641_v1 = vmul.f32 %v4341_v13, %v1513_v26  ;;  %v4345_v30 = vpop.eup %4344  ;;  %4352 = vpow2.f32 %v2436_v23  ;;  %v2818_v55 = vmul.f32 1.442695, %v2718_v29  ;;  %v2506_v19 = vmul.f32 %v4343_v33, %v2378_v54  ;;  %v7276_v13 = vld [vmem:[#allocation94_spill] sm:$0xff] }
 0x52f   :  { %v2128_v34 = vadd.f32 %v2080_v53, %v1648_v4  ;;  %v1599_v4 = vmul.f32 1.442695, %v1548_v25  ;;  %v4347_v49 = vpop.eup %4346  ;;  %4354 = vpow2.f32 %v1977_v15  ;;  %v3082_v9 = vld [vmem:[#allocation2 + $0x68] sm:$0xff] }
 0x530   :  { %4356 = vpow2.f32 %v1979_v45  ;;  %v2919_v21 = vadd.f32 %v4347_v49, %v4345_v30  ;;  %v2367_v45 = vld [vmem:[#allocation5 + $0x28] sm:$0xff] }
 0x531   :  { %2161 = vst.msk [vmem:[#allocation3 + $0xb8] sm:$0xff] %vm84_vm0, %v2128_v34  ;;  %2953 = vadd.xlane.f32.xlu2 %v2952_v62  ;;  %v2724_v34 = vsub.f32 %v7271_v10, %v6047_v7  ;;  %4358 = vpow2.f32 %v1599_v4  ;;  %v4349_v43 = vpop.eup %4348  ;;  %v2832_v7 = vmul.f32 1.442695, %v2725_v42  ;;  %v3242_v10 = vld [vmem:[#allocation4 + $0x68] sm:$0xff] }
 0x532   :  { %2073 = vadd.xlane.f32.xlu1 %v2072_v5  ;;  %v2820_v5 = vmul.f32 1.442695, %v2719_v59  ;;  %4360 = vpow2.f32 %v2818_v55  ;;  %v2492_v2 = vmul.f32 %v4349_v43, %v2364_v61  ;;  %v3402_v42 = vld [vmem:[#allocation6 + $0x68] sm:$0xff]  ;;  %v7281_v61 = vld [vmem:[#allocation220_spill] sm:$0xff] }
 0x533   :  { %v4351_v44 = vpop.eup %4350  ;;  %v2830_v24 = vmul.f32 1.442695, %v2724_v34  ;;  %v7279_v43 = vld [vmem:[#allocation194_spill] sm:$0xff] }
 0x534   :  { %v2059_v53 = vpop.xlane.xlu2 %2058  ;;  %v4353_v57 = vpop.eup %4352  ;;  %v3160_v18 = vmul.f32 0.6931472, %v4351_v44 }
 0x535   :  { %v2121_v62 = vadd.f32 %v2059_v53, %v1641_v1  ;;  %v4355_v14 = vpop.eup %4354 }
 0x536   :  { %v2915_v37 = vpop.xlane.xlu0 %2914  ;;  %v4357_v32 = vpop.eup %4356  ;;  %v3210_v1 = vadd.f32 %v3160_v18, %v3082_v9  ;;  %v7285_v18 = vld [vmem:[#allocation215_spill] sm:$0xff] }
 0x537   :  { %v2983_v52 = vadd.f32 %v2915_v37, %v2503_v51  ;;  %2154 = vst.msk [vmem:[#allocation3 + $0x80] sm:$0xff] %vm84_vm0, %v2121_v62  ;;  %v2732_v37 = vsub.f32 %v7274_v50, %v6155_v40  ;;  %v2081_v59 = vadd.f32 %v4357_v32, %v4355_v14 }
 0x539   :  { %3015 = vst.msk [vmem:[#allocation5 + $0x68] sm:$0xff] %vm84_vm0, %v2983_v52  ;;  %2103 = vadd.xlane.f32.xlu2 %v2102_v6  ;;  %v6371_v52 = vpop.eup %4358  ;;  %v7275_v6 = vld [vmem:[#allocation96_spill] sm:$0xff]  ;;  %v2846_v4 = vmul.f32 1.442695, %v2732_v37 }
 0x53a   :  { %2911 = vadd.xlane.f32.xlu1 %v2910_v36  ;;  %v2402_v23 = vsub.f32 %v7276_v13, %v7275_v6  ;;  %v4361_v12 = vpop.eup %4360 }
 0x53c   :  { %v2882_v25 = vpop.xlane.xlu2 %2881  ;;  %v2442_v49 = vmul.f32 1.442695, %v2402_v23 }
 0x53d   :  { %v2972_v29 = vadd.f32 %v2882_v25, %v2492_v2  ;;  %v2739_v25 = vsub.f32 %v7285_v18, %v6231_v48 }
 0x53e   :  { %v2924_v63 = vpop.xlane.xlu0 %2923  ;;  %v3117_v26 = vld [vmem:[#allocation3 + $0x80] sm:$0xff] }
 0x53f   :  { %v2986_v11 = vadd.f32 %v2924_v63, %v2506_v19  ;;  %3004 = vst.msk [vmem:[#allocation5 + $0x10] sm:$0xff] %vm84_vm0, %v2972_v29  ;;  %v7278_v63 = vld [vmem:[#allocation193_spill] sm:$0xff] }
 0x540   :  { %v3274_v3 = vld [vmem:[#allocation5 + $0x68] sm:$0xff]  ;;  %v3085_v29 = vld [vmem:[#allocation2 + $0x80] sm:$0xff] }
 0x541   :  { %4362 = vlog2.f32 %v3274_v3  ;;  %3018 = vst.msk [vmem:[#allocation5 + $0x80] sm:$0xff] %vm84_vm0, %v2986_v11  ;;  %v1871_v11 = vsub.f32 %v7278_v63, %v6099_v39  ;;  %v7280_v3 = vld [vmem:[#allocation219_spill] sm:$0xff] }
 0x542   :  { %4364 = vpow2.f32 %v2820_v5  ;;  %2920 = vadd.xlane.f32.xlu1 %v2919_v21  ;;  %v1805_v20 = vpop.permute.xlu1 %1804  ;;  %v2495_v5 = vmul.f32 %v4353_v57, %v2367_v45  ;;  %v3434_v57 = vsub.f32 %v3210_v1, %v3402_v42  ;;  %v1516_v45 = vld [vmem:[#allocation3 + $0x98] sm:$0xff]  ;;  %v3245_v1 = vld [vmem:[#allocation4 + $0x80] sm:$0xff] }
 0x543   :  { %4366 = vlog2.f32 %v3106_v60  ;;  %v1875_v16 = vsub.f32 %v5815_v58, %v1805_v20  ;;  %v1876_v51 = vsub.f32 %v7273_v46, %v1805_v20  ;;  %v7277_v58 = vld [vmem:[#allocation187_spill] sm:$0xff]  ;;  %v1872_v60 = vsub.f32 %v7279_v43, %v6099_v39  ;;  %v7286_v43 = vld [vmem:[#allocation169_spill] sm:$0xff] }
 0x544   :  { %4368 = vlog2.f32 %v3103_v31  ;;  %v2733_v36 = vsub.f32 %v7277_v58, %v6155_v40  ;;  %v1989_v58 = vmul.f32 1.442695, %v1871_v11 }
 0x545   :  { %4370 = vpow2.f32 %v2830_v24  ;;  %v1997_v35 = vmul.f32 1.442695, %v1875_v16  ;;  %v1999_v15 = vmul.f32 1.442695, %v1876_v51  ;;  %v7282_v24 = vld [vmem:[#allocation116_spill] sm:$0xff]  ;;  %v2891_v16 = vpop.xlane.xlu2 %2890  ;;  %v7284_v51 = vld [vmem:[#allocation214_spill] sm:$0xff] }
 0x546   :  { %4372 = vpow2.f32 %v2832_v7  ;;  %v2848_v34 = vmul.f32 1.442695, %v2733_v36  ;;  %v7283_v7 = vld [vmem:[#allocation114_spill] sm:$0xff]  ;;  %v2738_v2 = vsub.f32 %v7284_v51, %v6231_v48  ;;  %v2975_v39 = vadd.f32 %v2891_v16, %v2495_v5  ;;  %v3263_v23 = vld [vmem:[#allocation5 + $0x10] sm:$0xff] }
 0x547   :  { %v4363_v33 = vpop.eup %4362  ;;  %4374 = vlog2.f32 %v3117_v26  ;;  %v2405_v20 = vsub.f32 %v7283_v7, %v7282_v24  ;;  %v1991_v36 = vmul.f32 1.442695, %v1872_v60  ;;  %v2730_v60 = vsub.f32 %v7286_v43, %v6091_v41 }
 0x548   :  { %v4365_v54 = vpop.eup %4364  ;;  %v3320_v30 = vmul.f32 0.6931472, %v4363_v33  ;;  %v3277_v55 = vld [vmem:[#allocation5 + $0x80] sm:$0xff]  ;;  %4376 = vpow2.f32 %v1997_v35  ;;  %3007 = vst.msk [vmem:[#allocation5 + $0x28] sm:$0xff] %vm84_vm0, %v2975_v39 }
 0x549   :  { %v6378_v53 = vpop.eup %4366  ;;  %4378 = vlog2.f32 %v3277_v55  ;;  %v2928_v26 = vadd.f32 %v4365_v54, %v4361_v12  ;;  %v2448_v5 = vmul.f32 1.442695, %v2405_v20  ;;  %v3231_v20 = vld [vmem:[#allocation4 + $0x10] sm:$0xff] }
 0x54a   :  { %v4369_v40 = vpop.eup %4368  ;;  %v3370_v62 = vadd.f32 %v3320_v30, %v3242_v10  ;;  %4380 = vpow2.f32 %v1999_v15  ;;  %2082 = vadd.xlane.f32.xlu1 %v2081_v59  ;;  %v2670_v19 = vpop.permute.xlu1 %2669  ;;  %v2858_v30 = vmul.f32 1.442695, %v2738_v2 }
 0x54b   :  { %v6380_v0 = vpop.eup %4370  ;;  %v2740_v21 = vsub.f32 %v7280_v3, %v2670_v19  ;;  %v2741_v44 = vsub.f32 %v7281_v61, %v2670_v19  ;;  %4382 = vpow2.f32 %v2846_v4  ;;  %v3405_v4 = vld [vmem:[#allocation6 + $0x80] sm:$0xff]  ;;  %v3138_v48 = vmul.f32 0.6931472, %v4369_v40  ;;  %v3071_v40 = vld [vmem:[#allocation2 + $0x10] sm:$0xff]  ;;  %v7287_v61 = vld [vmem:[#allocation170_spill] sm:$0xff] }
 0x54c   :  { %v6388_v31 = vpop.eup %4372  ;;  %v3466_v14 = vsub.f32 %v3370_v62, %v3402_v42  ;;  %4384 = vpow2.f32 %v2848_v34  ;;  %v2860_v34 = vmul.f32 1.442695, %v2739_v25  ;;  %v1644_v62 = vmul.f32 %v6371_v52, %v1516_v45  ;;  %v3391_v25 = vld [vmem:[#allocation6 + $0x10] sm:$0xff] }
 0x54d   :  { %v4375_v46 = vpop.eup %4374  ;;  %v2862_v32 = vmul.f32 1.442695, %v2740_v21  ;;  %v2864_v50 = vmul.f32 1.442695, %v2741_v44  ;;  %4386 = vlog2.f32 %v3263_v23  ;;  %v2068_v63 = vpop.xlane.xlu2 %2067  ;;  %v3199_v11 = vadd.f32 %v3138_v48, %v3071_v40  ;;  %v7290_v48 = vld [vmem:[#allocation196_spill] sm:$0xff]  ;;  %v3394_v40 = vld [vmem:[#allocation6 + $0x28] sm:$0xff] }
 0x54e   :  { %v4377_v37 = vpop.eup %4376  ;;  %v3498_v6 = vadd.f32 %v3466_v14, %v3434_v57  ;;  %v3166_v13 = vmul.f32 0.6931472, %v4375_v46  ;;  %v2124_v3 = vadd.f32 %v2068_v63, %v1644_v62  ;;  %v2731_v44 = vsub.f32 %v7287_v61, %v6091_v41  ;;  %v7288_v14 = vld [vmem:[#allocation183_spill] sm:$0xff]  ;;  %v7294_v61 = vld [vmem:[#allocation132_spill] sm:$0xff] }
 0x54f   :  { %v4379_v35 = vpop.eup %4378  ;;  %4388 = vpow2.f32 %v2862_v32  ;;  %v3266_v7 = vld [vmem:[#allocation5 + $0x28] sm:$0xff]  ;;  %v1551_v16 = vsub.f32 %v7288_v14, %v5701_v17  ;;  %v2744_v46 = vsub.f32 %v5990_v28, %v6348_v22  ;;  %v2937_v51 = vadd.f32 %v6388_v31, %v6380_v0 }
 0x550   :  { %v4381_v15 = vpop.eup %4380  ;;  %v3530_v33 = vmul.f32 0.5, %v3498_v6  ;;  %v3213_v9 = vadd.f32 %v3166_v13, %v3085_v29  ;;  %v3326_v59 = vmul.f32 0.6931472, %v4379_v35  ;;  %4390 = vpow2.f32 %v2864_v50  ;;  %2157 = vst.msk [vmem:[#allocation3 + $0x98] sm:$0xff] %vm84_vm0, %v2124_v3 }
 0x551   :  { %v2096_v55 = vadd.f32 %v4381_v15, %v4377_v37  ;;  %v4383_v10 = vpop.eup %4382  ;;  %4392 = vpow2.f32 %v2442_v49  ;;  %v2745_v41 = vsub.f32 %v5992_v47, %v6348_v22  ;;  %v2370_v37 = vld [vmem:[#allocation5 + $0x40] sm:$0xff]  ;;  %v3144_v17 = vmul.f32 0.6931472, %v6378_v53  ;;  %v3074_v53 = vld [vmem:[#allocation2 + $0x28] sm:$0xff] }
 0x552   :  { %3562 = vst.msk [vmem:[%s6647_s4 + $0x68] sm:$0xff] %vm84_vm0, %v3530_v33  ;;  %v3437_v12 = vsub.f32 %v3213_v9, %v3405_v4  ;;  %v3373_v54 = vadd.f32 %v3326_v59, %v3245_v1  ;;  %2929 = vadd.xlane.f32.xlu1 %v2928_v26  ;;  %4394 = vpow2.f32 %v1989_v58  ;;  %v4385_v19 = vpop.eup %4384  ;;  %v2842_v6 = vmul.f32 1.442695, %v2730_v60  ;;  %v7289_v59 = vld [vmem:[#allocation195_spill] sm:$0xff]  ;;  %v3109_v1 = vld [vmem:[#allocation3 + $0x40] sm:$0xff] }
 0x553   :  { %2097 = vadd.xlane.f32.xlu0 %v2096_v55  ;;  %4396 = vpow2.f32 %v1991_v36  ;;  %v4387_v49 = vpop.eup %4386  ;;  %v2949_v28 = vadd.f32 %v4385_v19, %v4383_v10  ;;  %v3423_v23 = vsub.f32 %v3199_v11, %v3391_v25  ;;  %v2844_v35 = vmul.f32 1.442695, %v2731_v44  ;;  %v2373_v19 = vld [vmem:[#allocation5 + $0x58] sm:$0xff] }
 0x554   :  { %v3469_v42 = vsub.f32 %v3373_v54, %v3405_v4  ;;  %4398 = vpow2.f32 %v2858_v30  ;;  %v3298_v52 = vmul.f32 0.6931472, %v4387_v49  ;;  %v2870_v0 = vmul.f32 1.442695, %v2744_v46  ;;  %v3112_v46 = vld [vmem:[#allocation3 + $0x58] sm:$0xff] }
 0x555   :  { %v4389_v21 = vpop.eup %4388  ;;  %4400 = vpow2.f32 %v2860_v34  ;;  %v1605_v58 = vmul.f32 1.442695, %v1551_v16  ;;  %v2872_v36 = vmul.f32 1.442695, %v2745_v41  ;;  %v2900_v15 = vpop.xlane.xlu2 %2899  ;;  %v3202_v9 = vadd.f32 %v3144_v17, %v3074_v53  ;;  %v3234_v34 = vld [vmem:[#allocation4 + $0x28] sm:$0xff] }
 0x556   :  { %v3501_v24 = vadd.f32 %v3469_v42, %v3437_v12  ;;  %v4391_v57 = vpop.eup %4390  ;;  %4402 = vlog2.f32 %v3266_v7  ;;  %v3359_v50 = vadd.f32 %v3298_v52, %v3231_v20  ;;  %v2736_v45 = vsub.f32 %v7289_v59, %v6143_v56  ;;  %v7292_v42 = vld [vmem:[#allocation128_spill] sm:$0xff] }
 0x557   :  { %v4393_v2 = vpop.eup %4392  ;;  %v2961_v39 = vadd.f32 %v4391_v57, %v4389_v21  ;;  %4404 = vpow2.f32 %v2448_v5  ;;  %v2737_v30 = vsub.f32 %v7290_v48, %v6143_v56  ;;  %v7291_v5 = vld [vmem:[#allocation130_spill] sm:$0xff]  ;;  %v3426_v11 = vsub.f32 %v3202_v9, %v3394_v40  ;;  %v7295_v7 = vld [vmem:[#allocation232_spill] sm:$0xff] }
 0x558   :  { %v3533_v32 = vmul.f32 0.5, %v3501_v24  ;;  %v4395_v18 = vpop.eup %4394  ;;  %v3455_v47 = vsub.f32 %v3359_v50, %v3391_v25  ;;  %v2498_v31 = vmul.f32 %v4393_v2, %v2370_v37  ;;  %4406 = vpow2.f32 %v2842_v6  ;;  %v7293_v21 = vld [vmem:[#allocation134_spill] sm:$0xff] }
 0x559   :  { %v4397_v13 = vpop.eup %4396  ;;  %2962 = vadd.xlane.f32.xlu2 %v2961_v39  ;;  %4408 = vpow2.f32 %v2844_v35  ;;  %v2408_v56 = vsub.f32 %v7292_v42, %v7291_v5  ;;  %v2854_v63 = vmul.f32 1.442695, %v2736_v45  ;;  %v2856_v43 = vmul.f32 1.442695, %v2737_v30  ;;  %v7297_v39 = vld [vmem:[#allocation222_spill] sm:$0xff]  ;;  %v7298_v35 = vld [vmem:[#allocation155_spill] sm:$0xff] }
 0x55a   :  { %3565 = vst.msk [vmem:[%s6647_s4 + $0x80] sm:$0xff] %vm84_vm0, %v3533_v32  ;;  %2938 = vadd.xlane.f32.xlu1 %v2937_v51  ;;  %v4399_v22 = vpop.eup %4398  ;;  %v3487_v26 = vadd.f32 %v3455_v47, %v3423_v23  ;;  %v2978_v4 = vadd.f32 %v2900_v15, %v2498_v31  ;;  %4410 = vpow2.f32 %v2870_v0  ;;  %v2090_v62 = vadd.f32 %v4397_v13, %v4395_v18  ;;  %v7296_v51 = vld [vmem:[#allocation221_spill] sm:$0xff]  ;;  %v1519_v23 = vld [vmem:[#allocation3 + $0xb0] sm:$0xff]  ;;  %v7299_v47 = vld [vmem:[#allocation154_spill] sm:$0xff] }
 0x55b   :  { %2950 = vadd.xlane.f32.xlu0 %v2949_v28  ;;  %v4401_v29 = vpop.eup %4400  ;;  %4412 = vpow2.f32 %v2872_v36  ;;  %v1544_v44 = vsub.f32 %v7294_v61, %v7293_v21  ;;  %v1555_v57 = vsub.f32 %v7295_v7, %v5896_v38  ;;  %v1877_v2 = vsub.f32 %v7296_v51, %v6146_v8  ;;  %v7301_v15 = vld [vmem:[#allocation174_spill] sm:$0xff]  ;;  %v3077_v45 = vld [vmem:[#allocation2 + $0x40] sm:$0xff]  ;;  %v7306_v42 = vld [vmem:[#allocation224_spill] sm:$0xff] }
 0x55c   :  { %v4403_v33 = vpop.eup %4402  ;;  %v3519_v55 = vmul.f32 0.5, %v3487_v26  ;;  %3010 = vst.msk [vmem:[#allocation5 + $0x40] sm:$0xff] %vm84_vm0, %v2978_v4  ;;  %4414 = vlog2.f32 %v3109_v1  ;;  %v2958_v49 = vadd.f32 %v4401_v29, %v4399_v22  ;;  %v2454_v50 = vmul.f32 1.442695, %v2408_v56  ;;  %v7300_v26 = vld [vmem:[#allocation175_spill] sm:$0xff]  ;;  %v3237_v5 = vld [vmem:[#allocation4 + $0x40] sm:$0xff] }
 0x55d   :  { %v3304_v10 = vmul.f32 0.6931472, %v4403_v33  ;;  %v4405_v12 = vpop.eup %4404  ;;  %4416 = vpow2.f32 %v1605_v58  ;;  %v1878_v37 = vsub.f32 %v7297_v39, %v6146_v8  ;;  %v1591_v6 = vmul.f32 1.442695, %v1544_v44  ;;  %v3397_v21 = vld [vmem:[#allocation6 + $0x40] sm:$0xff]  ;;  %v7307_v61 = vld [vmem:[#allocation212_spill] sm:$0xff] }
 0x55e   :  { %3551 = vst.msk [vmem:[%s6647_s4 + $0x10] sm:$0xff] %vm84_vm0, %v3519_v55  ;;  %v4407_v3 = vpop.eup %4406  ;;  %v2501_v24 = vmul.f32 %v4405_v12, %v2373_v19  ;;  %4418 = vpow2.f32 %v2854_v63  ;;  %v1613_v28 = vmul.f32 1.442695, %v1555_v57  ;;  %v2411_v8 = vsub.f32 %v7299_v47, %v7298_v35  ;;  %v7302_v55 = vld [vmem:[#allocation223_spill] sm:$0xff]  ;;  %v7308_v44 = vld [vmem:[#allocation209_spill] sm:$0xff]  ;;  %v1512_v7 = vld [vmem:[#allocation3 + $0x78] sm:$0xff] }
 0x55f   :  { %v3362_v54 = vadd.f32 %v3304_v10, %v3234_v34  ;;  %v4409_v52 = vpop.eup %4408  ;;  %v2909_v14 = vpop.xlane.xlu2 %2908  ;;  %4420 = vpow2.f32 %v2856_v43  ;;  %v2001_v22 = vmul.f32 1.442695, %v1877_v2  ;;  %v2003_v29 = vmul.f32 1.442695, %v1878_v37  ;;  %v3115_v35 = vld [vmem:[#allocation3 + $0x70] sm:$0xff] }
 0x560   :  { %v4411_v16 = vpop.eup %4410  ;;  %v2981_v41 = vadd.f32 %v2909_v14, %v2501_v24  ;;  %v2946_v13 = vadd.f32 %v4409_v52, %v4407_v3  ;;  %v2413_v33 = vsub.f32 %v7301_v15, %v7300_v26  ;;  %v2460_v4 = vmul.f32 1.442695, %v2411_v8 }
 0x561   :  { %v3458_v60 = vsub.f32 %v3362_v54, %v3394_v40  ;;  %v4413_v32 = vpop.eup %4412  ;;  %v2742_v10 = vsub.f32 %v7302_v55, %v6196_v27  ;;  %v7303_v54 = vld [vmem:[#allocation66_spill] sm:$0xff]  ;;  %v2743_v56 = vsub.f32 %v7306_v42, %v6196_v27  ;;  %v1554_v24 = vsub.f32 %v7308_v44, %v7307_v61 }
 0x562   :  { %2091 = vadd.xlane.f32.xlu1 %v2090_v62  ;;  %v4415_v17 = vpop.eup %4414  ;;  %3013 = vst.msk [vmem:[#allocation5 + $0x58] sm:$0xff] %vm84_vm0, %v2981_v41  ;;  %v2967_v0 = vadd.f32 %v4413_v32, %v4411_v16  ;;  %v7304_v62 = vld [vmem:[#allocation67_spill] sm:$0xff]  ;;  %v3080_v41 = vld [vmem:[#allocation2 + $0x58] sm:$0xff]  ;;  %v7317_v55 = vld [vmem:[#allocation182_spill] sm:$0xff] }
 0x563   :  { %2959 = vadd.xlane.f32.xlu0 %v2958_v49  ;;  %v3490_v20 = vadd.f32 %v3458_v60, %v3426_v11  ;;  %v3269_v25 = vld [vmem:[#allocation5 + $0x40] sm:$0xff]  ;;  %v4417_v38 = vpop.eup %4416  ;;  %v3150_v31 = vmul.f32 0.6931472, %v4415_v17  ;;  %v7305_v19 = vsub.f32 %v7303_v54, %v7304_v62  ;;  %v2464_v49 = vmul.f32 1.442695, %v2413_v33  ;;  %v2376_v60 = vld [vmem:[#allocation5 + $0x70] sm:$0xff] }
 0x564   :  { %4422 = vlog2.f32 %v3269_v25  ;;  %v4419_v53 = vpop.eup %4418  ;;  %v1647_v58 = vmul.f32 %v4417_v38, %v1519_v23  ;;  %v2866_v14 = vmul.f32 1.442695, %v2742_v10  ;;  %v7310_v25 = vld [vmem:[#allocation203_spill] sm:$0xff]  ;;  %v2362_v54 = vld [vmem:[#allocation5] sm:$0xff]  ;;  %v3118_v44 = vld [vmem:[#allocation3 + $0x88] sm:$0xff] }
 0x565   :  { %v3522_v18 = vmul.f32 0.5, %v3490_v20  ;;  %4424 = vlog2.f32 %v3112_v46  ;;  %v4421_v36 = vpop.eup %4420  ;;  %v3205_v30 = vadd.f32 %v3150_v31, %v3077_v45  ;;  %v2426_v40 = vmul.f32 1.442695, %v7305_v19  ;;  %v1523_v23 = vld [vmem:[#allocation3 + $0xd0] sm:$0xff]  ;;  %v3400_v45 = vld [vmem:[#allocation6 + $0x58] sm:$0xff] }
 0x566   :  { %4426 = vpow2.f32 %v2454_v50  ;;  %v2955_v43 = vadd.f32 %v4421_v36, %v4419_v53  ;;  %v2868_v46 = vmul.f32 1.442695, %v2743_v56  ;;  %v7312_v31 = vld [vmem:[#allocation75_spill] sm:$0xff] }
 0x567   :  { %3554 = vst.msk [vmem:[%s6647_s4 + $0x28] sm:$0xff] %vm84_vm0, %v3522_v18  ;;  %4428 = vpow2.f32 %v1591_v6  ;;  %v3429_v20 = vsub.f32 %v3205_v30, %v3397_v21  ;;  %v7309_v18 = vld [vmem:[#allocation205_spill] sm:$0xff]  ;;  %v1611_v6 = vmul.f32 1.442695, %v1554_v24  ;;  %v7316_v30 = vld [vmem:[#allocation184_spill] sm:$0xff] }
 0x568   :  { %4430 = vpow2.f32 %v1613_v28  ;;  %v2077_v9 = vpop.xlane.xlu2 %2076  ;;  %v2416_v17 = vsub.f32 %v7310_v25, %v7309_v18  ;;  %v2414_v10 = vsub.f32 %v7317_v55, %v7316_v30  ;;  %v2365_v25 = vld [vmem:[#allocation5 + $0x18] sm:$0xff]  ;;  %v3243_v55 = vld [vmem:[#allocation4 + $0x70] sm:$0xff] }
 0x569   :  { %4432 = vpow2.f32 %v2001_v22  ;;  %v2127_v1 = vadd.f32 %v2077_v9, %v1647_v58  ;;  %v3272_v12 = vld [vmem:[#allocation5 + $0x58] sm:$0xff]  ;;  %v2379_v9 = vld [vmem:[#allocation5 + $0x88] sm:$0xff] }
 0x56a   :  { %2947 = vadd.xlane.f32.xlu1 %v2946_v13  ;;  %v4423_v59 = vpop.eup %4422  ;;  %4434 = vpow2.f32 %v2003_v29  ;;  %v3240_v58 = vld [vmem:[#allocation4 + $0x58] sm:$0xff] }
 0x56b   :  { %2968 = vadd.xlane.f32.xlu0 %v2967_v0  ;;  %v4425_v48 = vpop.eup %4424  ;;  %v3310_v34 = vmul.f32 0.6931472, %v4423_v59  ;;  %4436 = vlog2.f32 %v3272_v12  ;;  %2160 = vst.msk [vmem:[#allocation3 + $0xb0] sm:$0xff] %vm84_vm0, %v2127_v1  ;;  %v7311_v0 = vld [vmem:[#allocation73_spill] sm:$0xff] }
 0x56c   :  { %v4427_v63 = vpop.eup %4426  ;;  %v3156_v52 = vmul.f32 0.6931472, %v4425_v48  ;;  %4438 = vpow2.f32 %v2460_v4  ;;  %v7313_v29 = vsub.f32 %v7311_v0, %v7312_v31  ;;  %v7314_v4 = vld [vmem:[#allocation159_spill] sm:$0xff]  ;;  %v7315_v1 = vld [vmem:[#allocation157_spill] sm:$0xff] }
 0x56d   :  { %v3365_v11 = vadd.f32 %v3310_v34, %v3237_v5  ;;  %v4429_v3 = vpop.eup %4428  ;;  %4440 = vpow2.f32 %v2426_v40  ;;  %v2504_v51 = vmul.f32 %v4427_v63, %v2376_v60  ;;  %v1547_v48 = vsub.f32 %v7315_v1, %v7314_v4  ;;  %v7318_v60 = vld [vmem:[#allocation87_spill] sm:$0xff] }
 0x56e   :  { %v4431_v57 = vpop.eup %4430  ;;  %4442 = vpow2.f32 %v2464_v49  ;;  %v1640_v39 = vmul.f32 %v4429_v3, %v1512_v7  ;;  %v3208_v38 = vadd.f32 %v3156_v52, %v3080_v41  ;;  %v2432_v53 = vmul.f32 1.442695, %v7313_v29  ;;  %v7319_v3 = vld [vmem:[#allocation85_spill] sm:$0xff]  ;;  %v2381_v7 = vld [vmem:[#allocation5 + $0x98] sm:$0xff] }
 0x56f   :  { %v3461_v27 = vsub.f32 %v3365_v11, %v3397_v21  ;;  %v4433_v16 = vpop.eup %4432  ;;  %4444 = vpow2.f32 %v2866_v14  ;;  %v1651_v15 = vmul.f32 %v4431_v57, %v1523_v23  ;;  %v2470_v34 = vmul.f32 1.442695, %v2416_v17  ;;  %v7320_v17 = vld [vmem:[#allocation213_spill] sm:$0xff]  ;;  %v7322_v23 = vld [vmem:[#allocation103_spill] sm:$0xff] }
 0x570   :  { %v4435_v2 = vpop.eup %4434  ;;  %4446 = vpow2.f32 %v2868_v46  ;;  %v3432_v19 = vsub.f32 %v3208_v38, %v3400_v45  ;;  %v2400_v21 = vsub.f32 %v7319_v3, %v7318_v60  ;;  %v1597_v61 = vmul.f32 1.442695, %v1547_v48 }
 0x571   :  { %v3493_v32 = vadd.f32 %v3461_v27, %v3429_v20  ;;  %v4437_v37 = vpop.eup %4436  ;;  %v2099_v33 = vadd.f32 %v4435_v2, %v4433_v16  ;;  %4448 = vlog2.f32 %v3115_v35  ;;  %v2466_v57 = vmul.f32 1.442695, %v2414_v10  ;;  %v7323_v35 = vld [vmem:[#allocation101_spill] sm:$0xff]  ;;  %v7324_v10 = vld [vmem:[#allocation230_spill] sm:$0xff] }
 0x572   :  { %2956 = vadd.xlane.f32.xlu1 %v2955_v43  ;;  %v3316_v8 = vmul.f32 0.6931472, %v4437_v37  ;;  %v4439_v36 = vpop.eup %4438  ;;  %4450 = vpow2.f32 %v1611_v6  ;;  %v3120_v37 = vld [vmem:[#allocation3 + $0x98] sm:$0xff]  ;;  %v7321_v6 = vld [vmem:[#allocation210_spill] sm:$0xff] }
 0x573   :  { %v2918_v50 = vpop.xlane.xlu2 %2917  ;;  %v3525_v47 = vmul.f32 0.5, %v3493_v32  ;;  %v4441_v59 = vpop.eup %4440  ;;  %4452 = vpow2.f32 %v2432_v53  ;;  %v2507_v42 = vmul.f32 %v4439_v36, %v2379_v9  ;;  %v1522_v32 = vld [vmem:[#allocation3 + $0xc8] sm:$0xff]  ;;  %v2417_v38 = vsub.f32 %v7321_v6, %v7320_v17  ;;  %v3083_v53 = vld [vmem:[#allocation2 + $0x70] sm:$0xff] }
 0x574   :  { %v2984_v28 = vadd.f32 %v2918_v50, %v2504_v51  ;;  %v3368_v26 = vadd.f32 %v3316_v8, %v3240_v58  ;;  %v4443_v62 = vpop.eup %4442  ;;  %v2490_v11 = vmul.f32 %v4441_v59, %v2362_v54  ;;  %4454 = vpow2.f32 %v2470_v34  ;;  %v3101_v51 = vld [vmem:[#allocation3] sm:$0xff]  ;;  %v3104_v58 = vld [vmem:[#allocation3 + $0x18] sm:$0xff] }
 0x575   :  { %v2056_v13 = vpop.xlane.xlu1 %2055  ;;  %3557 = vst.msk [vmem:[%s6647_s4 + $0x40] sm:$0xff] %vm84_vm0, %v3525_v47  ;;  %v4445_v56 = vpop.eup %4444  ;;  %v2509_v2 = vmul.f32 %v4443_v62, %v2381_v7  ;;  %v2403_v47 = vsub.f32 %v7323_v35, %v7322_v23  ;;  %v2472_v9 = vmul.f32 1.442695, %v2417_v38  ;;  %v7325_v34 = vld [vmem:[#allocation229_spill] sm:$0xff]  ;;  %v3246_v35 = vld [vmem:[#allocation4 + $0x88] sm:$0xff] }
 0x576   :  { %v2120_v22 = vadd.f32 %v2056_v13, %v1640_v39  ;;  %3016 = vst.msk [vmem:[#allocation5 + $0x70] sm:$0xff] %vm84_vm0, %v2984_v28  ;;  %v3464_v40 = vsub.f32 %v3368_v26, %v3400_v45  ;;  %v4447_v43 = vpop.eup %4446  ;;  %v2438_v39 = vmul.f32 1.442695, %v2400_v21  ;;  %v3069_v23 = vld [vmem:[#allocation2] sm:$0xff] }
 0x577   :  { %v4449_v16 = vpop.eup %4448  ;;  %v2964_v41 = vadd.f32 %v4447_v43, %v4445_v56  ;;  %v2444_v30 = vmul.f32 1.442695, %v2403_v47  ;;  %v3403_v56 = vld [vmem:[#allocation6 + $0x70] sm:$0xff]  ;;  %v7328_v47 = vld [vmem:[#allocation233_spill] sm:$0xff] }
 0x578   :  { %2153 = vst.msk [vmem:[#allocation3 + $0x78] sm:$0xff] %vm84_vm0, %v2120_v22  ;;  %v3496_v63 = vadd.f32 %v3464_v40, %v3432_v19  ;;  %v4451_v46 = vpop.eup %4450  ;;  %v3162_v28 = vmul.f32 0.6931472, %v4449_v16 }
 0x579   :  { %v4453_v50 = vpop.eup %4452  ;;  %v1650_v8 = vmul.f32 %v4451_v46, %v1522_v32 }
 0x57a   :  { %v2089_v12 = vpop.xlane.xlu0 %2088  ;;  %2100 = vadd.xlane.f32.xlu1 %v2099_v33  ;;  %v3528_v20 = vmul.f32 0.5, %v3496_v63  ;;  %v4455_v22 = vpop.eup %4454  ;;  %v2493_v31 = vmul.f32 %v4453_v50, %v2365_v25  ;;  %v3211_v59 = vadd.f32 %v3162_v28, %v3083_v53  ;;  %v3121_v25 = vld [vmem:[#allocation3 + $0xa0] sm:$0xff] }
 0x57b   :  { %v2131_v5 = vadd.f32 %v2089_v12, %v1651_v15  ;;  %v2927_v49 = vpop.xlane.xlu2 %2926  ;;  %v2384_v15 = vld [vmem:[#allocation5 + $0xb0] sm:$0xff]  ;;  %v1557_v12 = vsub.f32 %v7325_v34, %v7324_v10  ;;  %v3389_v10 = vld [vmem:[#allocation6] sm:$0xff] }
 0x57c   :  { %v2987_v24 = vadd.f32 %v2927_v49, %v2507_v42  ;;  %3560 = vst.msk [vmem:[%s6647_s4 + $0x58] sm:$0xff] %vm84_vm0, %v3528_v20  ;;  %v2512_v40 = vmul.f32 %v4455_v22, %v2384_v15  ;;  %v3435_v60 = vsub.f32 %v3211_v59, %v3403_v56  ;;  %v2368_v15 = vld [vmem:[#allocation5 + $0x30] sm:$0xff] }
 0x57d   :  { %2164 = vst.msk [vmem:[#allocation3 + $0xd0] sm:$0xff] %vm84_vm0, %v2131_v5  ;;  %v2876_v52 = vpop.xlane.xlu1 %2875  ;;  %v3275_v14 = vld [vmem:[#allocation5 + $0x70] sm:$0xff]  ;;  %v2382_v5 = vld [vmem:[#allocation5 + $0xa0] sm:$0xff] }
 0x57e   :  { %v2970_v27 = vadd.f32 %v2876_v52, %v2490_v11  ;;  %4456 = vlog2.f32 %v3275_v14  ;;  %3019 = vst.msk [vmem:[#allocation5 + $0x88] sm:$0xff] %vm84_vm0, %v2987_v24  ;;  %v1515_v11 = vld [vmem:[#allocation3 + $0x90] sm:$0xff] }
 0x57f   :  { %4458 = vlog2.f32 %v3118_v44  ;;  %v1617_v44 = vmul.f32 1.442695, %v1557_v12  ;;  %v3123_v24 = vld [vmem:[#allocation3 + $0xb0] sm:$0xff] }
 0x580   :  { %4460 = vpow2.f32 %v1597_v61  ;;  %3002 = vst.msk [vmem:[#allocation5] sm:$0xff] %vm84_vm0, %v2970_v27 }
 0x581   :  { %4462 = vpow2.f32 %v2466_v57  ;;  %v3086_v57 = vld [vmem:[#allocation2 + $0x88] sm:$0xff] }
 0x582   :  { %v2933_v18 = vpop.xlane.xlu0 %2932  ;;  %2965 = vadd.xlane.f32.xlu1 %v2964_v41  ;;  %4464 = vlog2.f32 %v3101_v51  ;;  %v7326_v51 = vld [vmem:[#allocation188_spill] sm:$0xff] }
 0x583   :  { %v2989_v13 = vadd.f32 %v2933_v18, %v2509_v2  ;;  %4466 = vlog2.f32 %v3120_v37  ;;  %v2086_v0 = vpop.xlane.xlu2 %2085  ;;  %v7327_v2 = vld [vmem:[#allocation185_spill] sm:$0xff] }
 0x584   :  { %v4457_v29 = vpop.eup %4456  ;;  %4468 = vpow2.f32 %v2438_v39  ;;  %v2130_v36 = vadd.f32 %v2086_v0, %v1650_v8  ;;  %v1550_v41 = vsub.f32 %v7327_v2, %v7326_v51  ;;  %v7329_v8 = vld [vmem:[#allocation231_spill] sm:$0xff] }
 0x585   :  { %3021 = vst.msk [vmem:[#allocation5 + $0x98] sm:$0xff] %vm84_vm0, %v2989_v13  ;;  %v2885_v26 = vpop.xlane.xlu1 %2884  ;;  %v4459_v33 = vpop.eup %4458  ;;  %v3322_v45 = vmul.f32 0.6931472, %v4457_v29  ;;  %v3278_v4 = vld [vmem:[#allocation5 + $0x88] sm:$0xff]  ;;  %v2420_v22 = vsub.f32 %v7329_v8, %v7328_v47  ;;  %v3229_v29 = vld [vmem:[#allocation4] sm:$0xff]  ;;  %v3107_v51 = vld [vmem:[#allocation3 + $0x30] sm:$0xff] }
 0x586   :  { %v2973_v1 = vadd.f32 %v2885_v26, %v2493_v31  ;;  %v4461_v48 = vpop.eup %4460  ;;  %4470 = vlog2.f32 %v3278_v4  ;;  %2163 = vst.msk [vmem:[#allocation3 + $0xc8] sm:$0xff] %vm84_vm0, %v2130_v36  ;;  %v3168_v63 = vmul.f32 0.6931472, %v4459_v33  ;;  %v3406_v13 = vld [vmem:[#allocation6 + $0x88] sm:$0xff]  ;;  %v2385_v26 = vld [vmem:[#allocation5 + $0xb8] sm:$0xff]  ;;  %v3091_v8 = vld [vmem:[#allocation2 + $0xb0] sm:$0xff] }
 0x587   :  { %v4463_v54 = vpop.eup %4462  ;;  %4472 = vlog2.f32 %v3104_v58  ;;  %v3371_v62 = vadd.f32 %v3322_v45, %v3243_v55  ;;  %v3261_v19 = vld [vmem:[#allocation5] sm:$0xff]  ;;  %v1643_v16 = vmul.f32 %v4461_v48, %v1515_v11  ;;  %v1603_v59 = vmul.f32 1.442695, %v1550_v41 }
 0x588   :  { %3005 = vst.msk [vmem:[#allocation5 + $0x18] sm:$0xff] %vm84_vm0, %v2973_v1  ;;  %v4465_v42 = vpop.eup %4464  ;;  %4474 = vlog2.f32 %v3261_v19  ;;  %v2510_v7 = vmul.f32 %v4463_v54, %v2382_v5  ;;  %v3214_v32 = vadd.f32 %v3168_v63, %v3086_v57  ;;  %v2478_v34 = vmul.f32 1.442695, %v2420_v22  ;;  %v3072_v5 = vld [vmem:[#allocation2 + $0x18] sm:$0xff] }
 0x589   :  { %v4467_v43 = vpop.eup %4466  ;;  %4476 = vpow2.f32 %v2472_v9  ;;  %v3467_v3 = vsub.f32 %v3371_v62, %v3403_v56  ;;  %v3134_v20 = vmul.f32 0.6931472, %v4465_v42  ;;  %v3088_v9 = vld [vmem:[#allocation2 + $0x98] sm:$0xff] }
 0x58a   :  { %v2942_v49 = vpop.xlane.xlu0 %2941  ;;  %v4469_v61 = vpop.eup %4468  ;;  %4478 = vpow2.f32 %v2444_v30  ;;  %v3172_v50 = vmul.f32 0.6931472, %v4467_v43  ;;  %v3438_v1 = vsub.f32 %v3214_v32, %v3406_v13  ;;  %v3248_v42 = vld [vmem:[#allocation4 + $0x98] sm:$0xff] }
 0x58b   :  { %v2992_v21 = vadd.f32 %v2942_v49, %v2512_v40  ;;  %v3499_v14 = vadd.f32 %v3467_v3, %v3435_v60  ;;  %v3197_v53 = vadd.f32 %v3134_v20, %v3069_v23  ;;  %v2496_v19 = vmul.f32 %v4469_v61, %v2368_v15  ;;  %v3408_v60 = vld [vmem:[#allocation6 + $0x98] sm:$0xff]  ;;  %v3251_v15 = vld [vmem:[#allocation4 + $0xb0] sm:$0xff] }
 0x58c   :  { %v3280_v52 = vld [vmem:[#allocation5 + $0x98] sm:$0xff]  ;;  %v2936_v27 = vpop.xlane.xlu2 %2935  ;;  %v4471_v46 = vpop.eup %4470  ;;  %v3216_v48 = vadd.f32 %v3172_v50, %v3088_v9 }
 0x58d   :  { %4480 = vlog2.f32 %v3280_v52  ;;  %3024 = vst.msk [vmem:[#allocation5 + $0xb0] sm:$0xff] %vm84_vm0, %v2992_v21  ;;  %v2990_v39 = vadd.f32 %v2936_v27, %v2510_v7  ;;  %v2065_v37 = vpop.xlane.xlu1 %2064  ;;  %v4473_v18 = vpop.eup %4472  ;;  %v3531_v17 = vmul.f32 0.5, %v3499_v14  ;;  %v3328_v6 = vmul.f32 0.6931472, %v4471_v46  ;;  %v3124_v7 = vld [vmem:[#allocation3 + $0xb8] sm:$0xff] }
 0x58e   :  { %4482 = vlog2.f32 %v3123_v24  ;;  %v2123_v38 = vadd.f32 %v2065_v37, %v1643_v16  ;;  %v4475_v28 = vpop.eup %4474  ;;  %v3140_v45 = vmul.f32 0.6931472, %v4473_v18  ;;  %v3421_v56 = vsub.f32 %v3197_v53, %v3389_v10  ;;  %v1525_v16 = vld [vmem:[#allocation3 + $0xe0] sm:$0xff]  ;;  %v3232_v50 = vld [vmem:[#allocation4 + $0x18] sm:$0xff]  ;;  %v7331_v37 = vld [vmem:[#allocation238_spill] sm:$0xff] }
 0x58f   :  { %4484 = vpow2.f32 %v1617_v44  ;;  %v3264_v0 = vld [vmem:[#allocation5 + $0x18] sm:$0xff]  ;;  %3022 = vst.msk [vmem:[#allocation5 + $0xa0] sm:$0xff] %vm84_vm0, %v2990_v39  ;;  %v4477_v31 = vpop.eup %4476  ;;  %v3374_v58 = vadd.f32 %v3328_v6, %v3246_v35  ;;  %v3294_v36 = vmul.f32 0.6931472, %v4475_v28  ;;  %v3440_v57 = vsub.f32 %v3216_v48, %v3408_v60  ;;  %v7332_v6 = vld [vmem:[#allocation123_spill] sm:$0xff]  ;;  %v2371_v35 = vld [vmem:[#allocation5 + $0x48] sm:$0xff] }
 0x590   :  { %3563 = vst.msk [vmem:[%s6647_s4 + $0x70] sm:$0xff] %vm84_vm0, %v3531_v17  ;;  %4486 = vlog2.f32 %v3264_v0  ;;  %v6501_v33 = vpop.eup %4478  ;;  %v2513_v62 = vmul.f32 %v4477_v31, %v2385_v26  ;;  %v3200_v3 = vadd.f32 %v3140_v45, %v3072_v5  ;;  %v7330_v39 = vld [vmem:[#allocation240_spill] sm:$0xff] }
 0x591   :  { %4488 = vlog2.f32 %v3121_v25  ;;  %2156 = vst.msk [vmem:[#allocation3 + $0x90] sm:$0xff] %vm84_vm0, %v2123_v38  ;;  %v3470_v30 = vsub.f32 %v3374_v58, %v3406_v13  ;;  %v3357_v55 = vadd.f32 %v3294_v36, %v3229_v29  ;;  %v1560_v18 = vsub.f32 %v7331_v37, %v7330_v39  ;;  %v3392_v17 = vld [vmem:[#allocation6 + $0x18] sm:$0xff]  ;;  %v7333_v38 = vld [vmem:[#allocation121_spill] sm:$0xff] }
 0x592   :  { %v2406_v28 = vsub.f32 %v7333_v38, %v7332_v6  ;;  %v3424_v22 = vsub.f32 %v3200_v3, %v3392_v17  ;;  %v2499_v45 = vmul.f32 %v6501_v33, %v2371_v35  ;;  %v3249_v33 = vld [vmem:[#allocation4 + $0xa0] sm:$0xff]  ;;  %v3092_v39 = vld [vmem:[#allocation2 + $0xb8] sm:$0xff]  ;;  %v3127_v6 = vld [vmem:[#allocation3 + $0xd0] sm:$0xff] }
 0x593   :  { %v4481_v4 = vpop.eup %4480  ;;  %v3502_v63 = vadd.f32 %v3470_v30, %v3438_v1  ;;  %v3453_v49 = vsub.f32 %v3357_v55, %v3389_v10  ;;  %v1623_v9 = vmul.f32 1.442695, %v1560_v18  ;;  %v3089_v1 = vld [vmem:[#allocation2 + $0xa0] sm:$0xff]  ;;  %v3075_v35 = vld [vmem:[#allocation2 + $0x30] sm:$0xff] }
 0x594   :  { %v3332_v12 = vmul.f32 0.6931472, %v4481_v4  ;;  %v3283_v54 = vld [vmem:[#allocation5 + $0xb0] sm:$0xff]  ;;  %v4483_v40 = vpop.eup %4482  ;;  %v2945_v11 = vpop.xlane.xlu2 %2944 }
 0x595   :  { %4490 = vlog2.f32 %v3283_v54  ;;  %v4485_v43 = vpop.eup %4484  ;;  %v2993_v44 = vadd.f32 %v2945_v11, %v2513_v62  ;;  %v2894_v24 = vpop.xlane.xlu1 %2893  ;;  %v3534_v20 = vmul.f32 0.5, %v3502_v63  ;;  %v3485_v61 = vadd.f32 %v3453_v49, %v3421_v56  ;;  %v3110_v56 = vld [vmem:[#allocation3 + $0x48] sm:$0xff] }
 0x596   :  { %4492 = vpow2.f32 %v1603_v59  ;;  %v3376_v21 = vadd.f32 %v3332_v12, %v3248_v42  ;;  %v4487_v52 = vpop.eup %4486  ;;  %v3281_v14 = vld [vmem:[#allocation5 + $0xa0] sm:$0xff]  ;;  %v2976_v27 = vadd.f32 %v2894_v24, %v2496_v19  ;;  %v3178_v2 = vmul.f32 0.6931472, %v4483_v40  ;;  %v3411_v12 = vld [vmem:[#allocation6 + $0xb0] sm:$0xff] }
 0x597   :  { %v4489_v46 = vpop.eup %4488  ;;  %v3300_v32 = vmul.f32 0.6931472, %v4487_v52  ;;  %4494 = vlog2.f32 %v3281_v14  ;;  %3025 = vst.msk [vmem:[#allocation5 + $0xb8] sm:$0xff] %vm84_vm0, %v2993_v44  ;;  %v3517_v25 = vmul.f32 0.5, %v3485_v61  ;;  %v1653_v31 = vmul.f32 %v4485_v43, %v1525_v16  ;;  %v3409_v44 = vld [vmem:[#allocation6 + $0xa0] sm:$0xff]  ;;  %v1518_v52 = vld [vmem:[#allocation3 + $0xa8] sm:$0xff] }
 0x598   :  { %v3472_v41 = vsub.f32 %v3376_v21, %v3408_v60  ;;  %4496 = vpow2.f32 %v2478_v34  ;;  %3566 = vst.msk [vmem:[%s6647_s4 + $0x88] sm:$0xff] %vm84_vm0, %v3534_v20  ;;  %v3174_v0 = vmul.f32 0.6931472, %v4489_v46  ;;  %v3219_v53 = vadd.f32 %v3178_v2, %v3091_v8  ;;  %v2388_v21 = vld [vmem:[#allocation5 + $0xd0] sm:$0xff]  ;;  %v7335_v14 = vld [vmem:[#allocation133_spill] sm:$0xff]  ;;  %v3252_v8 = vld [vmem:[#allocation4 + $0xb8] sm:$0xff] }
 0x599   :  { %4498 = vlog2.f32 %v3124_v7  ;;  %v3360_v23 = vadd.f32 %v3300_v32, %v3232_v50  ;;  %3008 = vst.msk [vmem:[#allocation5 + $0x30] sm:$0xff] %vm84_vm0, %v2976_v27  ;;  %v2450_v54 = vmul.f32 1.442695, %v2406_v28  ;;  %v7334_v61 = vld [vmem:[#allocation135_spill] sm:$0xff] }
 0x59a   :  { %v3504_v13 = vadd.f32 %v3472_v41, %v3440_v57  ;;  %4500 = vlog2.f32 %v3107_v51  ;;  %3549 = vst.msk [vmem:[%s6647_s4] sm:$0xff] %vm84_vm0, %v3517_v25  ;;  %v3217_v62 = vadd.f32 %v3174_v0, %v3089_v1  ;;  %v3443_v63 = vsub.f32 %v3219_v53, %v3411_v12 }
 0x59b   :  { %v4491_v47 = vpop.eup %4490  ;;  %v3456_v36 = vsub.f32 %v3360_v23, %v3392_v17  ;;  %v2409_v27 = vsub.f32 %v7335_v14, %v7334_v61 }
 0x59c   :  { %v4493_v29 = vpop.eup %4492  ;;  %v3536_v58 = vmul.f32 0.5, %v3504_v13  ;;  %v3338_v26 = vmul.f32 0.6931472, %v4491_v47  ;;  %v2095_v59 = vpop.xlane.xlu2 %2094  ;;  %v3441_v7 = vsub.f32 %v3217_v62, %v3409_v44 }
 0x59d   :  { %v4495_v4 = vpop.eup %4494  ;;  %v3488_v48 = vadd.f32 %v3456_v36, %v3424_v22  ;;  %v2133_v55 = vadd.f32 %v2095_v59, %v1653_v31  ;;  %v2903_v10 = vpop.xlane.xlu1 %2902  ;;  %v1646_v32 = vmul.f32 %v4493_v29, %v1518_v52  ;;  %v2456_v47 = vmul.f32 1.442695, %v2409_v27  ;;  %v7336_v59 = vld [vmem:[#allocation217_spill] sm:$0xff]  ;;  %v7338_v52 = vld [vmem:[#allocation158_spill] sm:$0xff] }
 0x59e   :  { %3568 = vst.msk [vmem:[%s6647_s4 + $0x98] sm:$0xff] %vm84_vm0, %v3536_v58  ;;  %v3379_v30 = vadd.f32 %v3338_v26, %v3251_v15  ;;  %v4497_v34 = vpop.eup %4496  ;;  %v3334_v19 = vmul.f32 0.6931472, %v4495_v4  ;;  %v3284_v40 = vld [vmem:[#allocation5 + $0xb8] sm:$0xff]  ;;  %v2979_v5 = vadd.f32 %v2903_v10, %v2499_v45  ;;  %v3235_v15 = vld [vmem:[#allocation4 + $0x30] sm:$0xff] }
 0x59f   :  { %v4499_v42 = vpop.eup %4498  ;;  %v3520_v49 = vmul.f32 0.5, %v3488_v48  ;;  %4502 = vlog2.f32 %v3284_v40  ;;  %2166 = vst.msk [vmem:[#allocation3 + $0xe0] sm:$0xff] %vm84_vm0, %v2133_v55  ;;  %v2516_v46 = vmul.f32 %v4497_v34, %v2388_v21  ;;  %v1528_v58 = vld [vmem:[#allocation3 + $0xf8] sm:$0xff]  ;;  %v3395_v55 = vld [vmem:[#allocation6 + $0x30] sm:$0xff] }
 0x5a0   :  { %v3475_v11 = vsub.f32 %v3379_v30, %v3411_v12  ;;  %v4501_v43 = vpop.eup %4500  ;;  %4504 = vpow2.f32 %v1623_v9  ;;  %v3377_v60 = vadd.f32 %v3334_v19, %v3249_v33  ;;  %v3267_v3 = vld [vmem:[#allocation5 + $0x30] sm:$0xff]  ;;  %3011 = vst.msk [vmem:[#allocation5 + $0x48] sm:$0xff] %vm84_vm0, %v2979_v5  ;;  %v3180_v57 = vmul.f32 0.6931472, %v4499_v42  ;;  %v3412_v26 = vld [vmem:[#allocation6 + $0xb8] sm:$0xff]  ;;  %v2374_v9 = vld [vmem:[#allocation5 + $0x60] sm:$0xff] }
 0x5a1   :  { %3552 = vst.msk [vmem:[%s6647_s4 + $0x18] sm:$0xff] %vm84_vm0, %v3520_v49  ;;  %4506 = vlog2.f32 %v3267_v3  ;;  %v3146_v51 = vmul.f32 0.6931472, %v4501_v43  ;;  %v7337_v45 = vld [vmem:[#allocation216_spill] sm:$0xff] }
 0x5a2   :  { %v3507_v24 = vadd.f32 %v3475_v11, %v3443_v63  ;;  %4508 = vlog2.f32 %v3110_v56  ;;  %v3473_v20 = vsub.f32 %v3377_v60, %v3409_v44  ;;  %v3220_v17 = vadd.f32 %v3180_v57, %v3092_v39  ;;  %v3078_v56 = vld [vmem:[#allocation2 + $0x48] sm:$0xff]  ;;  %v7341_v39 = vld [vmem:[#allocation243_spill] sm:$0xff] }
 0x5a3   :  { %4510 = vpow2.f32 %v2450_v54  ;;  %v3203_v31 = vadd.f32 %v3146_v51, %v3075_v35  ;;  %v1553_v4 = vsub.f32 %v7337_v45, %v7336_v59  ;;  %v3255_v35 = vld [vmem:[#allocation4 + $0xd0] sm:$0xff] }
 0x5a4   :  { %v3539_v16 = vmul.f32 0.5, %v3507_v24  ;;  %v3505_v2 = vadd.f32 %v3473_v20, %v3441_v7  ;;  %v2954_v41 = vpop.xlane.xlu2 %2953  ;;  %v3444_v1 = vsub.f32 %v3220_v17, %v3412_v26  ;;  %v3238_v24 = vld [vmem:[#allocation4 + $0x48] sm:$0xff]  ;;  %v7339_v7 = vld [vmem:[#allocation156_spill] sm:$0xff]  ;;  %v3113_v20 = vld [vmem:[#allocation3 + $0x60] sm:$0xff] }
 0x5a5   :  { %v4503_v50 = vpop.eup %4502  ;;  %v2996_v37 = vadd.f32 %v2954_v41, %v2516_v46  ;;  %v2074_v18 = vpop.xlane.xlu1 %2073  ;;  %v3427_v12 = vsub.f32 %v3203_v31, %v3395_v55  ;;  %v1609_v63 = vmul.f32 1.442695, %v1553_v4  ;;  %v2412_v57 = vsub.f32 %v7339_v7, %v7338_v52  ;;  %v3398_v46 = vld [vmem:[#allocation6 + $0x48] sm:$0xff]  ;;  %v3095_v17 = vld [vmem:[#allocation2 + $0xd0] sm:$0xff]  ;;  %v7344_v4 = vld [vmem:[#allocation228_spill] sm:$0xff] }
 0x5a6   :  { %3571 = vst.msk [vmem:[%s6647_s4 + $0xb0] sm:$0xff] %vm84_vm0, %v3539_v16  ;;  %v4505_v25 = vpop.eup %4504  ;;  %v3537_v38 = vmul.f32 0.5, %v3505_v2  ;;  %v3340_v28 = vmul.f32 0.6931472, %v4503_v50  ;;  %v2126_v13 = vadd.f32 %v2074_v18, %v1646_v32  ;;  %v2377_v16 = vld [vmem:[#allocation5 + $0x78] sm:$0xff]  ;;  %v7340_v50 = vld [vmem:[#allocation245_spill] sm:$0xff] }
 0x5a7   :  { %v4507_v23 = vpop.eup %4506  ;;  %v3270_v22 = vld [vmem:[#allocation5 + $0x48] sm:$0xff]  ;;  %3028 = vst.msk [vmem:[#allocation5 + $0xd0] sm:$0xff] %vm84_vm0, %v2996_v37  ;;  %v1656_v34 = vmul.f32 %v4505_v25, %v1528_v58  ;;  %v2462_v32 = vmul.f32 1.442695, %v2412_v57  ;;  %v1558_v37 = vsub.f32 %v7341_v39, %v7340_v50  ;;  %v3415_v58 = vld [vmem:[#allocation6 + $0xd0] sm:$0xff]  ;;  %v3401_v57 = vld [vmem:[#allocation6 + $0x60] sm:$0xff] }
 0x5a8   :  { %v4509_v0 = vpop.eup %4508  ;;  %3569 = vst.msk [vmem:[%s6647_s4 + $0xa0] sm:$0xff] %vm84_vm0, %v3537_v38  ;;  %v3380_v29 = vadd.f32 %v3340_v28, %v3252_v8  ;;  %v3306_v53 = vmul.f32 0.6931472, %v4507_v23  ;;  %4512 = vlog2.f32 %v3270_v22  ;;  %v1526_v7 = vld [vmem:[#allocation3 + $0xe8] sm:$0xff] }
 0x5a9   :  { %v4511_v36 = vpop.eup %4510  ;;  %4514 = vlog2.f32 %v3127_v6  ;;  %2159 = vst.msk [vmem:[#allocation3 + $0xa8] sm:$0xff] %vm84_vm0, %v2126_v13  ;;  %v3152_v10 = vmul.f32 0.6931472, %v4509_v0  ;;  %v1619_v0 = vmul.f32 1.442695, %v1558_v37 }
 0x5aa   :  { %v3476_v48 = vsub.f32 %v3380_v29, %v3412_v26  ;;  %v3363_v30 = vadd.f32 %v3306_v53, %v3235_v15  ;;  %4516 = vpow2.f32 %v2456_v47  ;;  %v2502_v40 = vmul.f32 %v4511_v36, %v2374_v9  ;;  %v3116_v47 = vld [vmem:[#allocation3 + $0x78] sm:$0xff]  ;;  %v1521_v36 = vld [vmem:[#allocation3 + $0xc0] sm:$0xff] }
 0x5ab   :  { %v3206_v21 = vadd.f32 %v3152_v10, %v3078_v56  ;;  %v7342_v26 = vld [vmem:[#allocation181_spill] sm:$0xff]  ;;  %v7343_v15 = vld [vmem:[#allocation180_spill] sm:$0xff] }
 0x5ac   :  { %v3508_v54 = vadd.f32 %v3476_v48, %v3444_v1  ;;  %v3459_v62 = vsub.f32 %v3363_v30, %v3395_v55  ;;  %v2104_v19 = vpop.xlane.xlu2 %2103  ;;  %v2415_v9 = vsub.f32 %v7343_v15, %v7342_v26  ;;  %v7345_v1 = vld [vmem:[#allocation227_spill] sm:$0xff]  ;;  %v7346_v30 = vld [vmem:[#allocation244_spill] sm:$0xff]  ;;  %v7347_v55 = vld [vmem:[#allocation242_spill] sm:$0xff] }
 0x5ad   :  { %v2136_v5 = vadd.f32 %v2104_v19, %v1656_v34  ;;  %v2912_v42 = vpop.xlane.xlu1 %2911  ;;  %v3430_v2 = vsub.f32 %v3206_v21, %v3398_v46  ;;  %v2419_v48 = vsub.f32 %v7345_v1, %v7344_v4  ;;  %v2423_v10 = vsub.f32 %v7347_v55, %v7346_v30  ;;  %v3081_v56 = vld [vmem:[#allocation2 + $0x60] sm:$0xff]  ;;  %v2380_v21 = vld [vmem:[#allocation5 + $0x90] sm:$0xff]  ;;  %v2391_v26 = vld [vmem:[#allocation5 + $0xe8] sm:$0xff] }
 0x5ae   :  { %v4513_v33 = vpop.eup %4512  ;;  %v3540_v49 = vmul.f32 0.5, %v3508_v54  ;;  %v3491_v11 = vadd.f32 %v3459_v62, %v3427_v12  ;;  %v3287_v43 = vld [vmem:[#allocation5 + $0xd0] sm:$0xff]  ;;  %v2982_v60 = vadd.f32 %v2912_v42, %v2502_v40  ;;  %v2468_v40 = vmul.f32 1.442695, %v2415_v9  ;;  %v3404_v9 = vld [vmem:[#allocation6 + $0x78] sm:$0xff]  ;;  %v7354_v4 = vld [vmem:[#allocation33_spill] sm:$0xff] }
 0x5af   :  { %v4515_v3 = vpop.eup %4514  ;;  %v3312_v44 = vmul.f32 0.6931472, %v4513_v33  ;;  %4518 = vlog2.f32 %v3287_v43  ;;  %2169 = vst.msk [vmem:[#allocation3 + $0xf8] sm:$0xff] %vm84_vm0, %v2136_v5  ;;  %v2476_v43 = vmul.f32 1.442695, %v2419_v48  ;;  %v7355_v1 = vld [vmem:[#allocation47_spill] sm:$0xff] }
 0x5b0   :  { %3572 = vst.msk [vmem:[%s6647_s4 + $0xb8] sm:$0xff] %vm84_vm0, %v3540_v49  ;;  %v3523_v61 = vmul.f32 0.5, %v3491_v11  ;;  %v4517_v14 = vpop.eup %4516  ;;  %4520 = vpow2.f32 %v1609_v63  ;;  %v3186_v51 = vmul.f32 0.6931472, %v4515_v3  ;;  %v2484_v63 = vmul.f32 1.442695, %v2423_v10 }
 0x5b1   :  { %v3366_v27 = vadd.f32 %v3312_v44, %v3238_v24  ;;  %3014 = vst.msk [vmem:[#allocation5 + $0x60] sm:$0xff] %vm84_vm0, %v2982_v60  ;;  %4522 = vlog2.f32 %v3113_v20  ;;  %v2505_v18 = vmul.f32 %v4517_v14, %v2377_v16  ;;  %v3241_v44 = vld [vmem:[#allocation4 + $0x60] sm:$0xff]  ;;  %v7348_v20 = vld [vmem:[#allocation235_spill] sm:$0xff]  ;;  %v2425_v48 = vsub.f32 %v7355_v1, %v7354_v4 }
 0x5b2   :  { %3555 = vst.msk [vmem:[%s6647_s4 + $0x30] sm:$0xff] %vm84_vm0, %v3523_v61  ;;  %v3223_v28 = vadd.f32 %v3186_v51, %v3095_v17  ;;  %4524 = vpow2.f32 %v2462_v32  ;;  %v7349_v61 = vld [vmem:[#allocation234_spill] sm:$0xff]  ;;  %v7351_v51 = vld [vmem:[#allocation239_spill] sm:$0xff] }
 0x5b3   :  { %v3462_v41 = vsub.f32 %v3366_v27, %v3398_v46  ;;  %v1556_v14 = vsub.f32 %v7349_v61, %v7348_v20  ;;  %v7350_v46 = vld [vmem:[#allocation241_spill] sm:$0xff]  ;;  %v3122_v20 = vld [vmem:[#allocation3 + $0xa8] sm:$0xff] }
 0x5b4   :  { %v3447_v59 = vsub.f32 %v3223_v28, %v3415_v58  ;;  %v2390_v61 = vld [vmem:[#allocation5 + $0xe0] sm:$0xff] }
 0x5b5   :  { %v4519_v25 = vpop.eup %4518  ;;  %v3494_v6 = vadd.f32 %v3462_v41, %v3430_v2  ;;  %v2921_v38 = vpop.xlane.xlu1 %2920  ;;  %v2422_v2 = vsub.f32 %v7351_v51, %v7350_v46 }
 0x5b6   :  { %v3346_v13 = vmul.f32 0.6931472, %v4519_v25  ;;  %v2985_v23 = vadd.f32 %v2921_v38, %v2505_v18  ;;  %v4521_v22 = vpop.eup %4520  ;;  %v3084_v18 = vld [vmem:[#allocation2 + $0x78] sm:$0xff]  ;;  %v1615_v38 = vmul.f32 1.442695, %v1556_v14 }
 0x5b7   :  { %v3526_v8 = vmul.f32 0.5, %v3494_v6  ;;  %v4523_v53 = vpop.eup %4522  ;;  %v1649_v54 = vmul.f32 %v4521_v22, %v1521_v36  ;;  %v2482_v22 = vmul.f32 1.442695, %v2422_v2 }
 0x5b8   :  { %v3383_v31 = vadd.f32 %v3346_v13, %v3255_v35  ;;  %v3273_v29 = vld [vmem:[#allocation5 + $0x60] sm:$0xff]  ;;  %3017 = vst.msk [vmem:[#allocation5 + $0x78] sm:$0xff] %vm84_vm0, %v2985_v23  ;;  %v3158_v34 = vmul.f32 0.6931472, %v4523_v53  ;;  %v4525_v19 = vpop.eup %4524  ;;  %v3119_v13 = vld [vmem:[#allocation3 + $0x90] sm:$0xff]  ;;  %v7353_v53 = vld [vmem:[#allocation204_spill] sm:$0xff] }
 0x5b9   :  { %3558 = vst.msk [vmem:[%s6647_s4 + $0x48] sm:$0xff] %vm84_vm0, %v3526_v8  ;;  %4526 = vlog2.f32 %v3273_v29  ;;  %v2508_v16 = vmul.f32 %v4525_v19, %v2380_v21  ;;  %v3244_v8 = vld [vmem:[#allocation4 + $0x78] sm:$0xff]  ;;  %v7352_v29 = vld [vmem:[#allocation207_spill] sm:$0xff] }
 0x5ba   :  { %4528 = vlog2.f32 %v3116_v47  ;;  %v3479_v45 = vsub.f32 %v3383_v31, %v3415_v58  ;;  %v3209_v60 = vadd.f32 %v3158_v34, %v3081_v56  ;;  %v2418_v58 = vsub.f32 %v7353_v53, %v7352_v29 }
 0x5bb   :  { %4530 = vpow2.f32 %v1619_v0 }
 0x5bc   :  { %v3511_v12 = vadd.f32 %v3479_v45, %v3447_v59  ;;  %v3433_v41 = vsub.f32 %v3209_v60, %v3401_v57  ;;  %v2387_v59 = vld [vmem:[#allocation5 + $0xc8] sm:$0xff]  ;;  %v2474_v34 = vmul.f32 1.442695, %v2418_v58  ;;  %v2393_v58 = vld [vmem:[#allocation5 + $0xf8] sm:$0xff] }
 0x5bd   :  { %v2083_v62 = vpop.xlane.xlu1 %2082  ;;  %v2383_v45 = vld [vmem:[#allocation5 + $0xa8] sm:$0xff] }
 0x5be   :  { %v3543_v5 = vmul.f32 0.5, %v3511_v12  ;;  %v2129_v42 = vadd.f32 %v2083_v62, %v1649_v54 }
 0x5bf   :  { %v4527_v33 = vpop.eup %4526  ;;  %v3276_v49 = vld [vmem:[#allocation5 + $0x78] sm:$0xff] }
 0x5c0   :  { %v4529_v11 = vpop.eup %4528  ;;  %3575 = vst.msk [vmem:[%s6647_s4 + $0xd0] sm:$0xff] %vm84_vm0, %v3543_v5  ;;  %v3318_v3 = vmul.f32 0.6931472, %v4527_v33  ;;  %4532 = vlog2.f32 %v3276_v49  ;;  %v7356_v5 = vld [vmem:[#allocation226_spill] sm:$0xff]  ;;  %v2488_v49 = vmul.f32 1.442695, %v2425_v48 }
 0x5c1   :  { %2162 = vst.msk [vmem:[#allocation3 + $0xc0] sm:$0xff] %vm84_vm0, %v2129_v42  ;;  %v4531_v24 = vpop.eup %4530  ;;  %4534 = vpow2.f32 %v2468_v40  ;;  %v3164_v27 = vmul.f32 0.6931472, %v4529_v11  ;;  %v7357_v42 = vld [vmem:[#allocation225_spill] sm:$0xff] }
 0x5c2   :  { %v3369_v52 = vadd.f32 %v3318_v3, %v3241_v44  ;;  %4536 = vpow2.f32 %v2484_v63  ;;  %v1654_v50 = vmul.f32 %v4531_v24, %v1526_v7  ;;  %v2421_v33 = vsub.f32 %v7357_v42, %v7356_v5  ;;  %v1524_v7 = vld [vmem:[#allocation3 + $0xd8] sm:$0xff] }
 0x5c3   :  { %4538 = vpow2.f32 %v2476_v43  ;;  %v3212_v28 = vadd.f32 %v3164_v27, %v3084_v18 }
 0x5c4   :  { %v3465_v32 = vsub.f32 %v3369_v52, %v3401_v57  ;;  %4540 = vlog2.f32 %v3119_v13  ;;  %v3126_v52 = vld [vmem:[#allocation3 + $0xc8] sm:$0xff]  ;;  %v2480_v14 = vmul.f32 1.442695, %v2421_v33 }
 0x5c5   :  { %v2930_v39 = vpop.xlane.xlu1 %2929  ;;  %4542 = vpow2.f32 %v1615_v38  ;;  %v3436_v30 = vsub.f32 %v3212_v28, %v3404_v9  ;;  %v3247_v28 = vld [vmem:[#allocation4 + $0x90] sm:$0xff] }
 0x5c6   :  { %v4533_v37 = vpop.eup %4532  ;;  %v3497_v25 = vadd.f32 %v3465_v32, %v3433_v41  ;;  %v2098_v17 = vpop.xlane.xlu0 %2097  ;;  %v2988_v6 = vadd.f32 %v2930_v39, %v2508_v16  ;;  %4544 = vpow2.f32 %v2482_v22  ;;  %v3087_v41 = vld [vmem:[#allocation2 + $0x90] sm:$0xff]  ;;  %v3129_v32 = vld [vmem:[#allocation3 + $0xe0] sm:$0xff] }
 0x5c7   :  { %v3324_v23 = vmul.f32 0.6931472, %v4533_v37  ;;  %v2134_v35 = vadd.f32 %v2098_v17, %v1654_v50  ;;  %v4535_v47 = vpop.eup %4534  ;;  %v3407_v22 = vld [vmem:[#allocation6 + $0x90] sm:$0xff] }
 0x5c8   :  { %v3529_v0 = vmul.f32 0.5, %v3497_v25  ;;  %3020 = vst.msk [vmem:[#allocation5 + $0x90] sm:$0xff] %vm84_vm0, %v2988_v6  ;;  %v4537_v31 = vpop.eup %4536  ;;  %v2511_v19 = vmul.f32 %v4535_v47, %v2383_v45  ;;  %v2386_v47 = vld [vmem:[#allocation5 + $0xc0] sm:$0xff] }
 0x5c9   :  { %v3372_v36 = vadd.f32 %v3324_v23, %v3244_v8  ;;  %2167 = vst.msk [vmem:[#allocation3 + $0xe8] sm:$0xff] %vm84_vm0, %v2134_v35  ;;  %v4539_v15 = vpop.eup %4538  ;;  %v2519_v10 = vmul.f32 %v4537_v31, %v2391_v26  ;;  %v7359_v31 = vld [vmem:[#allocation246_spill] sm:$0xff] }
 0x5ca   :  { %3561 = vst.msk [vmem:[%s6647_s4 + $0x60] sm:$0xff] %vm84_vm0, %v3529_v0  ;;  %v2515_v54 = vmul.f32 %v4539_v15, %v2387_v59  ;;  %v4541_v21 = vpop.eup %4540  ;;  %v7358_v0 = vld [vmem:[#allocation247_spill] sm:$0xff] }
 0x5cb   :  { %v3468_v55 = vsub.f32 %v3372_v36, %v3404_v9  ;;  %v4543_v24 = vpop.eup %4542  ;;  %v3170_v27 = vmul.f32 0.6931472, %v4541_v21  ;;  %v1559_v29 = vsub.f32 %v7359_v31, %v7358_v0 }
 0x5cc   :  { %v2963_v62 = vpop.xlane.xlu2 %2962  ;;  %v4545_v57 = vpop.eup %4544  ;;  %v1652_v16 = vmul.f32 %v4543_v24, %v1524_v7  ;;  %v2389_v7 = vld [vmem:[#allocation5 + $0xd8] sm:$0xff] }
 0x5cd   :  { %v3500_v12 = vadd.f32 %v3468_v55, %v3436_v30  ;;  %v2939_v40 = vpop.xlane.xlu1 %2938  ;;  %v2999_v63 = vadd.f32 %v2963_v62, %v2519_v10  ;;  %v2518_v46 = vmul.f32 %v4545_v57, %v2390_v61  ;;  %v3215_v18 = vadd.f32 %v3170_v27, %v3087_v41  ;;  %v3098_v10 = vld [vmem:[#allocation2 + $0xe8] sm:$0xff]  ;;  %v7360_v61 = vld [vmem:[#allocation237_spill] sm:$0xff] }
 0x5ce   :  { %v2951_v56 = vpop.xlane.xlu0 %2950  ;;  %v2991_v3 = vadd.f32 %v2939_v40, %v2511_v19  ;;  %v3125_v40 = vld [vmem:[#allocation3 + $0xc0] sm:$0xff]  ;;  %v3418_v57 = vld [vmem:[#allocation6 + $0xe8] sm:$0xff] }
 0x5cf   :  { %v3532_v11 = vmul.f32 0.5, %v3500_v12  ;;  %v3279_v43 = vld [vmem:[#allocation5 + $0x90] sm:$0xff]  ;;  %v2995_v60 = vadd.f32 %v2951_v56, %v2515_v54  ;;  %3031 = vst.msk [vmem:[#allocation5 + $0xe8] sm:$0xff] %vm84_vm0, %v2999_v63  ;;  %v3439_v26 = vsub.f32 %v3215_v18, %v3407_v22 }
 0x5d0   :  { %v3130_v44 = vld [vmem:[#allocation3 + $0xe8] sm:$0xff]  ;;  %4546 = vlog2.f32 %v3279_v43  ;;  %3023 = vst.msk [vmem:[#allocation5 + $0xa8] sm:$0xff] %vm84_vm0, %v2991_v3 }
 0x5d1   :  { %4548 = vpow2.f32 %v2474_v34  ;;  %3564 = vst.msk [vmem:[%s6647_s4 + $0x78] sm:$0xff] %vm84_vm0, %v3532_v11  ;;  %v1621_v34 = vmul.f32 1.442695, %v1559_v29  ;;  %v3258_v11 = vld [vmem:[#allocation4 + $0xe8] sm:$0xff] }
 0x5d2   :  { %4550 = vlog2.f32 %v3130_v44  ;;  %3027 = vst.msk [vmem:[#allocation5 + $0xc8] sm:$0xff] %vm84_vm0, %v2995_v60  ;;  %v3090_v3 = vld [vmem:[#allocation2 + $0xa8] sm:$0xff]  ;;  %v3132_v44 = vld [vmem:[#allocation3 + $0xf8] sm:$0xff] }
 0x5d3   :  { %4552 = vpow2.f32 %v2488_v49  ;;  %v3094_v49 = vld [vmem:[#allocation2 + $0xc8] sm:$0xff] }
 0x5d4   :  { %4554 = vlog2.f32 %v3126_v52 }
 0x5d5   :  { %4556 = vlog2.f32 %v3122_v20  ;;  %v2092_v51 = vpop.xlane.xlu1 %2091  ;;  %v3254_v20 = vld [vmem:[#allocation4 + $0xc8] sm:$0xff] }
 0x5d6   :  { %v4547_v2 = vpop.eup %4546  ;;  %v2960_v50 = vpop.xlane.xlu0 %2959  ;;  %v2132_v39 = vadd.f32 %v2092_v51, %v1652_v16  ;;  %4558 = vpow2.f32 %v2480_v14  ;;  %v3290_v17 = vld [vmem:[#allocation5 + $0xe8] sm:$0xff]  ;;  %v7361_v14 = vld [vmem:[#allocation236_spill] sm:$0xff] }
 0x5d7   :  { %v4549_v37 = vpop.eup %4548  ;;  %v3330_v25 = vmul.f32 0.6931472, %v4547_v2  ;;  %v2998_v6 = vadd.f32 %v2960_v50, %v2518_v46  ;;  %4560 = vlog2.f32 %v3290_v17  ;;  %v3282_v53 = vld [vmem:[#allocation5 + $0xa8] sm:$0xff]  ;;  %v2424_v27 = vsub.f32 %v7361_v14, %v7360_v61  ;;  %v3413_v61 = vld [vmem:[#allocation6 + $0xc0] sm:$0xff]  ;;  %v3260_v14 = vld [vmem:[#allocation4 + $0xf8] sm:$0xff] }
 0x5d8   :  { %v4551_v38 = vpop.eup %4550  ;;  %2165 = vst.msk [vmem:[#allocation3 + $0xd8] sm:$0xff] %vm84_vm0, %v2132_v39  ;;  %4562 = vlog2.f32 %v3129_v32  ;;  %v2514_v59 = vmul.f32 %v4549_v37, %v2386_v47  ;;  %v3250_v51 = vld [vmem:[#allocation4 + $0xa8] sm:$0xff] }
 0x5d9   :  { %v4553_v13 = vpop.eup %4552  ;;  %v3375_v23 = vadd.f32 %v3330_v25, %v3247_v28  ;;  %v3286_v35 = vld [vmem:[#allocation5 + $0xc8] sm:$0xff]  ;;  %3030 = vst.msk [vmem:[#allocation5 + $0xe0] sm:$0xff] %vm84_vm0, %v2998_v6  ;;  %v3192_v15 = vmul.f32 0.6931472, %v4551_v38  ;;  %v2486_v0 = vmul.f32 1.442695, %v2424_v27 }
 0x5da   :  { %v4555_v8 = vpop.eup %4554  ;;  %4564 = vlog2.f32 %v3286_v35  ;;  %v2521_v48 = vmul.f32 %v4553_v13, %v2393_v58  ;;  %v3414_v50 = vld [vmem:[#allocation6 + $0xc8] sm:$0xff] }
 0x5db   :  { %v4557_v36 = vpop.eup %4556  ;;  %v3471_v9 = vsub.f32 %v3375_v23, %v3407_v22  ;;  %4566 = vlog2.f32 %v3282_v53  ;;  %v3184_v4 = vmul.f32 0.6931472, %v4555_v8  ;;  %v3226_v5 = vadd.f32 %v3192_v15, %v3098_v10  ;;  %v3410_v25 = vld [vmem:[#allocation6 + $0xa8] sm:$0xff]  ;;  %v3097_v22 = vld [vmem:[#allocation2 + $0xe0] sm:$0xff] }
 0x5dc   :  { %v4559_v45 = vpop.eup %4558  ;;  %v3176_v12 = vmul.f32 0.6931472, %v4557_v36  ;;  %v3417_v10 = vld [vmem:[#allocation6 + $0xe0] sm:$0xff] }
 0x5dd   :  { %v3503_v1 = vadd.f32 %v3471_v9, %v3439_v26  ;;  %v2948_v30 = vpop.xlane.xlu1 %2947  ;;  %v4561_v55 = vpop.eup %4560  ;;  %v3222_v21 = vadd.f32 %v3184_v4, %v3094_v49  ;;  %v3450_v2 = vsub.f32 %v3226_v5, %v3418_v57  ;;  %v2517_v18 = vmul.f32 %v4559_v45, %v2389_v7 }
 0x5de   :  { %v2969_v54 = vpop.xlane.xlu0 %2968  ;;  %v2994_v62 = vadd.f32 %v2948_v30, %v2514_v59  ;;  %v4563_v19 = vpop.eup %4562  ;;  %v3352_v33 = vmul.f32 0.6931472, %v4561_v55  ;;  %v3218_v16 = vadd.f32 %v3176_v12, %v3090_v3  ;;  %v3257_v59 = vld [vmem:[#allocation4 + $0xe0] sm:$0xff] }
 0x5df   :  { %v3535_v42 = vmul.f32 0.5, %v3503_v1  ;;  %v3001_v56 = vadd.f32 %v2969_v54, %v2521_v48  ;;  %v3190_v39 = vmul.f32 0.6931472, %v4563_v19  ;;  %v3446_v17 = vsub.f32 %v3222_v21, %v3414_v50  ;;  %v3128_v35 = vld [vmem:[#allocation3 + $0xd8] sm:$0xff]  ;;  %v1527_v1 = vld [vmem:[#allocation3 + $0xf0] sm:$0xff]  ;;  %v3253_v3 = vld [vmem:[#allocation4 + $0xc0] sm:$0xff] }
 0x5e0   :  { %v4565_v63 = vpop.eup %4564  ;;  %v3289_v43 = vld [vmem:[#allocation5 + $0xe0] sm:$0xff]  ;;  %3026 = vst.msk [vmem:[#allocation5 + $0xc0] sm:$0xff] %vm84_vm0, %v2994_v62  ;;  %v3386_v52 = vadd.f32 %v3352_v33, %v3258_v11  ;;  %v3442_v13 = vsub.f32 %v3218_v16, %v3410_v25  ;;  %v3100_v21 = vld [vmem:[#allocation2 + $0xf8] sm:$0xff] }
 0x5e1   :  { %v4567_v60 = vpop.eup %4566  ;;  %3567 = vst.msk [vmem:[%s6647_s4 + $0x90] sm:$0xff] %vm84_vm0, %v3535_v42  ;;  %v3344_v24 = vmul.f32 0.6931472, %v4565_v63  ;;  %4568 = vlog2.f32 %v3289_v43  ;;  %v3225_v36 = vadd.f32 %v3190_v39, %v3097_v22  ;;  %v3093_v42 = vld [vmem:[#allocation2 + $0xc0] sm:$0xff]  ;;  %v3416_v22 = vld [vmem:[#allocation6 + $0xd8] sm:$0xff] }
 0x5e2   :  { %4570 = vlog2.f32 %v3125_v40  ;;  %v3336_v46 = vmul.f32 0.6931472, %v4567_v60  ;;  %3033 = vst.msk [vmem:[#allocation5 + $0xf8] sm:$0xff] %vm84_vm0, %v3001_v56  ;;  %v3482_v32 = vsub.f32 %v3386_v52, %v3418_v57 }
 0x5e3   :  { %4572 = vpow2.f32 %v1621_v34  ;;  %v3382_v41 = vadd.f32 %v3344_v24, %v3254_v20  ;;  %v3449_v12 = vsub.f32 %v3225_v36, %v3417_v10  ;;  %v2392_v20 = vld [vmem:[#allocation5 + $0xf0] sm:$0xff] }
 0x5e4   :  { %4574 = vlog2.f32 %v3132_v44  ;;  %v3378_v37 = vadd.f32 %v3336_v46, %v3250_v51  ;;  %v3514_v38 = vadd.f32 %v3482_v32, %v3450_v2  ;;  %v3420_v2 = vld [vmem:[#allocation6 + $0xf8] sm:$0xff] }
 0x5e5   :  { %v3478_v6 = vsub.f32 %v3382_v41, %v3414_v50  ;;  %v2957_v28 = vpop.xlane.xlu1 %2956 }
 0x5e6   :  { %v3474_v23 = vsub.f32 %v3378_v37, %v3410_v25  ;;  %v2997_v47 = vadd.f32 %v2957_v28, %v2517_v18  ;;  %v3546_v29 = vmul.f32 0.5, %v3514_v38  ;;  %v3096_v25 = vld [vmem:[#allocation2 + $0xd8] sm:$0xff] }
 0x5e7   :  { %v4569_v8 = vpop.eup %4568  ;;  %v3510_v31 = vadd.f32 %v3478_v6, %v3446_v17  ;;  %v3285_v53 = vld [vmem:[#allocation5 + $0xc0] sm:$0xff] }
 0x5e8   :  { %v4571_v58 = vpop.eup %4570  ;;  %v3506_v26 = vadd.f32 %v3474_v23, %v3442_v13  ;;  %v3350_v15 = vmul.f32 0.6931472, %v4569_v8  ;;  %4576 = vlog2.f32 %v3285_v53  ;;  %3029 = vst.msk [vmem:[#allocation5 + $0xd8] sm:$0xff] %vm84_vm0, %v2997_v47 }
 0x5e9   :  { %v4573_v9 = vpop.eup %4572  ;;  %v3542_v45 = vmul.f32 0.5, %v3510_v31  ;;  %3578 = vst.msk [vmem:[%s6647_s4 + $0xe8] sm:$0xff] %vm84_vm0, %v3546_v29  ;;  %4578 = vlog2.f32 %v3128_v35  ;;  %v3292_v4 = vld [vmem:[#allocation5 + $0xf8] sm:$0xff]  ;;  %v3182_v34 = vmul.f32 0.6931472, %v4571_v58 }
 0x5ea   :  { %v4575_v48 = vpop.eup %4574  ;;  %v3538_v30 = vmul.f32 0.5, %v3506_v26  ;;  %v3385_v55 = vadd.f32 %v3350_v15, %v3257_v59  ;;  %4580 = vlog2.f32 %v3292_v4  ;;  %v1655_v62 = vmul.f32 %v4573_v9, %v1527_v1  ;;  %v3256_v35 = vld [vmem:[#allocation4 + $0xd8] sm:$0xff]  ;;  %v3099_v9 = vld [vmem:[#allocation2 + $0xf0] sm:$0xff] }
 0x5eb   :  { %4582 = vpow2.f32 %v2486_v0  ;;  %3574 = vst.msk [vmem:[%s6647_s4 + $0xc8] sm:$0xff] %vm84_vm0, %v3542_v45  ;;  %v3196_v19 = vmul.f32 0.6931472, %v4575_v48  ;;  %v3221_v49 = vadd.f32 %v3182_v34, %v3093_v42  ;;  %v3259_v4 = vld [vmem:[#allocation4 + $0xf0] sm:$0xff] }
 0x5ec   :  { %3570 = vst.msk [vmem:[%s6647_s4 + $0xa8] sm:$0xff] %vm84_vm0, %v3538_v30  ;;  %v3481_v54 = vsub.f32 %v3385_v55, %v3417_v10  ;;  %v3419_v48 = vld [vmem:[#allocation6 + $0xf0] sm:$0xff] }
 0x5ed   :  { %v2101_v40 = vpop.xlane.xlu1 %2100  ;;  %v3228_v52 = vadd.f32 %v3196_v19, %v3100_v21  ;;  %v3445_v27 = vsub.f32 %v3221_v49, %v3413_v61 }
 0x5ee   :  { %v4577_v5 = vpop.eup %4576  ;;  %v3513_v33 = vadd.f32 %v3481_v54, %v3449_v12  ;;  %v2135_v56 = vadd.f32 %v2101_v40, %v1655_v62 }
 0x5ef   :  { %v4579_v63 = vpop.eup %4578  ;;  %v3342_v11 = vmul.f32 0.6931472, %v4577_v5  ;;  %v3288_v43 = vld [vmem:[#allocation5 + $0xd8] sm:$0xff]  ;;  %v3452_v32 = vsub.f32 %v3228_v52, %v3420_v2 }
 0x5f0   :  { %v4581_v60 = vpop.eup %4580  ;;  %v3545_v44 = vmul.f32 0.5, %v3513_v33  ;;  %4584 = vlog2.f32 %v3288_v43  ;;  %2168 = vst.msk [vmem:[#allocation3 + $0xf0] sm:$0xff] %vm84_vm0, %v2135_v56  ;;  %v3188_v16 = vmul.f32 0.6931472, %v4579_v63 }
 0x5f1   :  { %v4583_v24 = vpop.eup %4582  ;;  %v3356_v7 = vmul.f32 0.6931472, %v4581_v60  ;;  %v3381_v57 = vadd.f32 %v3342_v11, %v3253_v3 }
 0x5f2   :  { %3577 = vst.msk [vmem:[%s6647_s4 + $0xe0] sm:$0xff] %vm84_vm0, %v3545_v44  ;;  %v2520_v41 = vmul.f32 %v4583_v24, %v2392_v20  ;;  %v3224_v6 = vadd.f32 %v3188_v16, %v3096_v25 }
 0x5f3   :  { %v3388_v46 = vadd.f32 %v3356_v7, %v3260_v14  ;;  %v3477_v51 = vsub.f32 %v3381_v57, %v3413_v61 }
 0x5f4   :  { %v3448_v0 = vsub.f32 %v3224_v6, %v3416_v22 }
 0x5f5   :  { %v3484_v50 = vsub.f32 %v3388_v46, %v3420_v2  ;;  %v3509_v39 = vadd.f32 %v3477_v51, %v3445_v27  ;;  %v2966_v37 = vpop.xlane.xlu1 %2965 }
 0x5f6   :  { %v4585_v18 = vpop.eup %4584  ;;  %v3000_v17 = vadd.f32 %v2966_v37, %v2520_v41 }
 0x5f7   :  { %v3516_v38 = vadd.f32 %v3484_v50, %v3452_v32  ;;  %v3541_v28 = vmul.f32 0.5, %v3509_v39  ;;  %v3348_v13 = vmul.f32 0.6931472, %v4585_v18  ;;  %v3131_v23 = vld [vmem:[#allocation3 + $0xf0] sm:$0xff] }
 0x5f8   :  { %3032 = vst.msk [vmem:[#allocation5 + $0xf0] sm:$0xff] %vm84_vm0, %v3000_v17  ;;  %4586 = vlog2.f32 %v3131_v23 }
 0x5f9   :  { %v3548_v47 = vmul.f32 0.5, %v3516_v38  ;;  %3573 = vst.msk [vmem:[%s6647_s4 + $0xc0] sm:$0xff] %vm84_vm0, %v3541_v28  ;;  %v3384_v8 = vadd.f32 %v3348_v13, %v3256_v35 }
 0x5fb   :  { %3580 = vst.msk [vmem:[%s6647_s4 + $0xf8] sm:$0xff] %vm84_vm0, %v3548_v47  ;;  %v3480_v31 = vsub.f32 %v3384_v8, %v3416_v22 }
 0x5fd   :  { %v3512_v29 = vadd.f32 %v3480_v31, %v3448_v0 }
 0x5fe   :  { %v4587_v36 = vpop.eup %4586 }
 0x5ff   :  { %v3544_v53 = vmul.f32 0.5, %v3512_v29  ;;  %v3291_v58 = vld [vmem:[#allocation5 + $0xf0] sm:$0xff]  ;;  %v3194_v26 = vmul.f32 0.6931472, %v4587_v36 }
 0x600   :  { %4588 = vlog2.f32 %v3291_v58 }
 0x601   :  { %3576 = vst.msk [vmem:[%s6647_s4 + $0xd8] sm:$0xff] %vm84_vm0, %v3544_v53  ;;  %v3227_v59 = vadd.f32 %v3194_v26, %v3099_v9 }
 0x603   :  { %v3451_v30 = vsub.f32 %v3227_v59, %v3419_v48 }
 0x606   :  { %v4589_v15 = vpop.eup %4588 }
 0x607   :  { %v3354_v45 = vmul.f32 0.6931472, %v4589_v15 }
 0x609   :  { %v3387_v1 = vadd.f32 %v3354_v45, %v3259_v4 }
 0x60b   :  { %v3483_v55 = vsub.f32 %v3387_v1, %v3419_v48 }
 0x60d   :  { %v3515_v10 = vadd.f32 %v3483_v55, %v3451_v30 }
 0x60f   :  { %v3547_v34 = vmul.f32 0.5, %v3515_v10 }
 0x611   :  { %3579 = vst.msk [vmem:[%s6647_s4 + $0xf0] sm:$0xff] %vm84_vm0, %v3547_v34 }
 0x612   :  { %3585 = vsyncpa [#allocation8], 1 }
 0x613   :  { %3586 = vsyncpa [#allocation10], 1 }
 0x614   :  { %3587 = vsyncpa [#allocation13], 1 }

</bundles_post_ra>
